<compile_context>
chip_gen: v7x
topology: tpu7x:2x2x1
jax: 0.10.0
libtpu: 0.0.40
codegen_flags: <defaults>
</compile_context>

<pallas_src>
import functools

import jax
import jax.numpy as jnp
from jax.experimental import pallas as pl
from jax.experimental.pallas import tpu as pltpu


_VMEM_LIMIT = 32 * 1024 * 1024   # safe scoped-VMEM cap on v5e/v6e/v7x


# ------------------------------ tiling helpers -------------------------------

def _pick_tile(dim, target, mult):
    """Largest multiple of `mult` that divides `dim` and is <= target, else dim."""
    upper = min(target, dim)
    for cand in range(upper, 0, -1):
        if cand % mult == 0 and dim % cand == 0:
            return cand
    return dim


def _round_up(x, m):
    return ((x + m - 1) // m) * m


# ----------------------------- Pallas kernels --------------------------------

def _mm_kernel(*refs, activation, has_residual, nk):
    """Tiled matmul: out = act(x @ w + b) [+ residual]; f32 accumulator over K."""
    if has_residual:
        x_ref, w_ref, b_ref, r_ref, o_ref, acc_ref = refs
    else:
        x_ref, w_ref, b_ref, o_ref, acc_ref = refs
        r_ref = None

    @pl.when(pl.program_id(2) == 0)
    def _():
        acc_ref[...] = jnp.zeros_like(acc_ref)

    x = x_ref[...]
    if x.dtype != jnp.bfloat16:          # activations are already bf16; images f32
        x = x.astype(jnp.bfloat16)
    acc_ref[...] += jnp.dot(x, w_ref[...], preferred_element_type=jnp.float32)

    @pl.when(pl.program_id(2) == nk - 1)
    def _():
        out = acc_ref[...] + b_ref[...]
        if activation == "gelu":
            # TODO(synk): torch nn.GELU default is exact (erf) GELU; tanh approx
            # used because erf lowering is not guaranteed in Mosaic.
            out = jax.nn.gelu(out, approximate=True)
        if r_ref is not None:
            out = out + r_ref[...]
        o_ref[...] = out.astype(o_ref.dtype)


def _ln_mm_kernel(x_ref, g_ref, be_ref, w_ref, b_ref, o_ref, xn_ref, *,
                  eps, activation):
    """Fused LayerNorm + matmul (+ bias, optional GELU).

    Grid is (M tiles, N tiles) with N innermost ("arbitrary"); the normalized,
    bf16-cast x block is computed once per row block (j == 0) into VMEM scratch
    and reused for every N tile.
    """
    @pl.when(pl.program_id(1) == 0)
    def _():
        x = x_ref[...]
        mu = jnp.mean(x, axis=-1, keepdims=True)
        var = jnp.mean((x - mu) ** 2, axis=-1, keepdims=True)
        xn = (x - mu) * jax.lax.rsqrt(var + eps) * g_ref[...] + be_ref[...]
        xn_ref[...] = xn.astype(xn_ref.dtype)

    acc = jnp.dot(xn_ref[...], w_ref[...], preferred_element_type=jnp.float32)
    acc = acc + b_ref[...]
    if activation == "gelu":
        acc = jax.nn.gelu(acc, approximate=True)
    o_ref[...] = acc.astype(o_ref.dtype)


def _layernorm_kernel(x_ref, g_ref, b_ref, o_ref, *, eps):
    x = x_ref[...]
    mu = jnp.mean(x, axis=-1, keepdims=True)
    var = jnp.mean((x - mu) ** 2, axis=-1, keepdims=True)
    o_ref[...] = (x - mu) * jax.lax.rsqrt(var + eps) * g_ref[...] + b_ref[...]


def _attn_kernel(qkv_ref, o_ref, *, dh, scale, t_valid, t_pad):
    """Single-head attention for one (batch, head) grid step.

    qkv_ref block: (1, Tp, 3*dh) bf16 — per-head contiguous [q | k | v] columns.
    o_ref block  : (1, Tp, dh)   bf16 — lane-dense slab of the head-concat output.
    Padded key positions (>= t_valid) are masked with a (1, Tp) row bias.
    """
    # TODO(synk): for long sequences (Tp >> few hundred) switch to a KV-tiled
    # flash-style online softmax instead of materializing (Tp, Tp) scores.
    qkv = qkv_ref[0]                                   # (Tp, 3*dh) bf16
    q = qkv[:, 0:dh]
    k = qkv[:, dh:2 * dh]
    v = qkv[:, 2 * dh:3 * dh]

    s = jax.lax.dot_general(q, k, (((1,), (1,)), ((), ())),
                            preferred_element_type=jnp.float32) * scale
    if t_valid < t_pad:
        key_ids = jax.lax.broadcasted_iota(jnp.int32, (1, t_pad), 1)
        s = s + jnp.where(key_ids < t_valid, 0.0, -1e30).astype(jnp.float32)

    m = jnp.max(s, axis=-1, keepdims=True)
    p = jnp.exp(s - m)
    denom = jnp.sum(p, axis=-1, keepdims=True)
    o = jnp.dot(p.astype(jnp.bfloat16), v, preferred_element_type=jnp.float32)
    o_ref[0] = (o * pl.reciprocal(denom, approx=True)).astype(o_ref.dtype)


def _patch_kernel(p_ref, w_ref, b_ref, cls_ref, pos_ref, o_ref, *, N, T, Tp):
    """Patch-embed matmul with cls-token / pos-embed / token-pad fused epilogue."""
    pe = jnp.dot(p_ref[...].astype(jnp.bfloat16), w_ref[...],
                 preferred_element_type=jnp.float32) + b_ref[...]      # (N, D)
    D = pe.shape[-1]
    o_ref[0, 0:1, :] = cls_ref[...] + pos_ref[0:1, :]
    o_ref[0, 1:N + 1, :] = pe + pos_ref[1:N + 1, :]
    if T < Tp:
        o_ref[0, T:Tp, :] = jnp.zeros((Tp - T, D), jnp.float32)


# ------------------------------ wrappers --------------------------------------

def matmul_bias(x, w, b, residual=None, activation=None, out_dtype=jnp.float32):
    """out = act(x @ w + b) [+ residual]; f32 K-accumulation on the MXU."""
    M, K = x.shape
    _, N = w.shape
    tm = _pick_tile(M, 512, 8)
    tn = _pick_tile(N, 512, 128)
    tk = _pick_tile(K, 512, 128)
    nk = K // tk
    has_res = residual is not None

    kernel = functools.partial(_mm_kernel, activation=activation,
                               has_residual=has_res, nk=nk)
    in_specs = [pl.BlockSpec((tm, tk), lambda i, j, k: (i, k)),
                pl.BlockSpec((tk, tn), lambda i, j, k: (k, j)),
                pl.BlockSpec((1, tn), lambda i, j, k: (0, j))]
    args = [x, w, b.reshape(1, N)]
    if has_res:
        in_specs.append(pl.BlockSpec((tm, tn), lambda i, j, k: (i, j)))
        args.append(residual)

    return pl.pallas_call(
        kernel,
        out_shape=jax.ShapeDtypeStruct((M, N), out_dtype),
        grid=(M // tm, N // tn, nk),
        in_specs=in_specs,
        out_specs=pl.BlockSpec((tm, tn), lambda i, j, k: (i, j)),
        scratch_shapes=[pltpu.VMEM((tm, tn), jnp.float32)],
        compiler_params=pltpu.CompilerParams(
            dimension_semantics=("parallel", "parallel", "arbitrary"),
            vmem_limit_bytes=_VMEM_LIMIT),
    )(*args)


def ln_matmul_bias(x, gamma, beta, w, b, activation=None, eps=1e-6,
                   out_dtype=jnp.float32):
    """out = act(LN(x) @ w + b); LN computed once per row block, cached in VMEM."""
    M, K = x.shape
    _, N = w.shape
    tm = _pick_tile(M, 512, 8)
    tn = _pick_tile(N, 512, 128)
    kernel = functools.partial(_ln_mm_kernel, eps=eps, activation=activation)
    return pl.pallas_call(
        kernel,
        out_shape=jax.ShapeDtypeStruct((M, N), out_dtype),
        grid=(M // tm, N // tn),
        in_specs=[pl.BlockSpec((tm, K), lambda i, j: (i, 0)),
                  pl.BlockSpec((1, K), lambda i, j: (0, 0)),
                  pl.BlockSpec((1, K), lambda i, j: (0, 0)),
                  pl.BlockSpec((K, tn), lambda i, j: (0, j)),
                  pl.BlockSpec((1, tn), lambda i, j: (0, j))],
        out_specs=pl.BlockSpec((tm, tn), lambda i, j: (i, j)),
        scratch_shapes=[pltpu.VMEM((tm, K), jnp.bfloat16)],
        compiler_params=pltpu.CompilerParams(
            dimension_semantics=("parallel", "arbitrary"),
            vmem_limit_bytes=_VMEM_LIMIT),
    )(x, gamma.reshape(1, K), beta.reshape(1, K), w, b.reshape(1, N))


def layernorm(x, gamma, beta, eps=1e-6):
    M, D = x.shape
    tm = _pick_tile(M, 512, 8)
    kernel = functools.partial(_layernorm_kernel, eps=eps)
    return pl.pallas_call(
        kernel,
        out_shape=jax.ShapeDtypeStruct((M, D), jnp.float32),
        grid=(M // tm,),
        in_specs=[pl.BlockSpec((tm, D), lambda i: (i, 0)),
                  pl.BlockSpec((1, D), lambda i: (0, 0)),
                  pl.BlockSpec((1, D), lambda i: (0, 0))],
        out_specs=pl.BlockSpec((tm, D), lambda i: (i, 0)),
        compiler_params=pltpu.CompilerParams(
            dimension_semantics=("parallel",),
            vmem_limit_bytes=_VMEM_LIMIT),
    )(x, gamma.reshape(1, D), beta.reshape(1, D))


def attention(qkv, *, heads, dh, t_valid):
    """qkv: (B, Tp, 3*D) bf16, columns per-head [q|k|v]; out: (B, Tp, D) bf16."""
    B, Tp, _ = qkv.shape
    D = heads * dh
    kernel = functools.partial(_attn_kernel, dh=dh, scale=dh ** -0.5,
                               t_valid=t_valid, t_pad=Tp)
    return pl.pallas_call(
        kernel,
        out_shape=jax.ShapeDtypeStruct((B, Tp, D), jnp.bfloat16),
        grid=(B, heads),
        in_specs=[pl.BlockSpec((1, Tp, 3 * dh), lambda b, h: (b, 0, h))],
        out_specs=pl.BlockSpec((1, Tp, dh), lambda b, h: (b, 0, h)),
        compiler_params=pltpu.CompilerParams(
            dimension_semantics=("parallel", "parallel"),
            vmem_limit_bytes=_VMEM_LIMIT),
    )(qkv)


def patch_embed_tokens(patches, w, b, cls_tok, pos_pad, *, B, N, T, Tp, D):
    """(B*N, C*p*p) patches -> (B, Tp, D) tokens with cls/pos/pad fused."""
    Cpp = patches.shape[1]
    kernel = functools.partial(_patch_kernel, N=N, T=T, Tp=Tp)
    return pl.pallas_call(
        kernel,
        out_shape=jax.ShapeDtypeStruct((B, Tp, D), jnp.float32),
        grid=(B,),
        in_specs=[pl.BlockSpec((N, Cpp), lambda b: (b, 0)),
                  pl.BlockSpec((Cpp, D), lambda b: (0, 0)),
                  pl.BlockSpec((1, D), lambda b: (0, 0)),
                  pl.BlockSpec((1, D), lambda b: (0, 0)),
                  pl.BlockSpec((Tp, D), lambda b: (0, 0))],
        out_specs=pl.BlockSpec((1, Tp, D), lambda b: (b, 0, 0)),
        compiler_params=pltpu.CompilerParams(
            dimension_semantics=("parallel",),
            vmem_limit_bytes=_VMEM_LIMIT),
    )(patches, w, b.reshape(1, D), cls_tok, pos_pad)


# ----------------------------- model forward ----------------------------------

def encoder_forward(x, params, cfg):
    B, C, H, W = x.shape
    p = cfg["patch"]
    D = cfg["dim"]
    heads = cfg["heads"]
    Dh = D // heads
    Gh, Gw = H // p, W // p
    N = Gh * Gw
    T = N + 1                      # cls token + patches
    Tp = _round_up(T, 8)           # pad token axis for clean (8,128) tiles

    # Encoder.forward preamble `(x - pixel_mean)/pixel_std` is folded into the
    # patch-embed weights (see fold_and_cast_params) -> no normalization kernel.

    # TODO(synk): the patch gather below is still an XLA 6-D reshape/transpose
    # (one image-sized HBM pass); a Pallas Element-indexed gather over
    # (B, Gh, Gw) could feed the patch-embed matmul directly.
    patches = (x.reshape(B, C, Gh, p, Gw, p)
                 .transpose(0, 2, 4, 1, 3, 5)
                 .reshape(B * N, C * p * p))

    # patch embed + cls token + pos embed + token-axis pad, fused
    tokens = patch_embed_tokens(patches, params["patch_w"], params["patch_b"],
                                params["cls_token"], params["pos_embed_pad"],
                                B=B, N=N, T=T, Tp=Tp, D=D)          # (B, Tp, D) f32
    tokens = tokens.reshape(B * Tp, D)

    for blk in params["blocks"]:
        # --- multi-head self-attention branch (LN1 fused into qkv matmul) ---
        qkv = ln_matmul_bias(tokens, blk["ln1_g"], blk["ln1_b"],
                             blk["qkv_w"], blk["qkv_b"],
                             out_dtype=jnp.bfloat16)                # (B*Tp, 3D) bf16
        a = attention(qkv.reshape(B, Tp, 3 * D), heads=heads, dh=Dh,
                      t_valid=T)                                    # (B, Tp, D) bf16
        tokens = matmul_bias(a.reshape(B * Tp, D), blk["proj_w"],
                             blk["proj_b"], residual=tokens)        # f32 residual

        # --- MLP branch (LN2 fused into fc1, GELU in epilogue, residual in fc2) ---
        h = ln_matmul_bias(tokens, blk["ln2_g"], blk["ln2_b"],
                           blk["fc1_w"], blk["fc1_b"],
                           activation="gelu", out_dtype=jnp.bfloat16)
        tokens = matmul_bias(h, blk["fc2_w"], blk["fc2_b"], residual=tokens)

    # final norm (timm forward_features)
    tokens = layernorm(tokens, params["norm_g"], params["norm_b"])
    tokens = tokens.reshape(B, Tp, D)

    # Encoder.forward epilogue (3-D branch): x = x[:, num_prefix_tokens:]
    # (also drops the token-axis padding)
    return tokens[:, cfg["num_prefix_tokens"]:T]


# ------------------------- deterministic parameters ---------------------------

def init_params(key, *, C, patch, D, depth, mlp_hidden, N):
    keys = jax.random.split(key, 4 + depth)

    def nrm(k, shape, scale=0.02):
        return jax.random.normal(k, shape, dtype=jnp.float32) * scale

    params = {
        "pixel_mean": jnp.array([0.5, 0.5, 0.5], jnp.float32),
        "pixel_std": jnp.array([0.5, 0.5, 0.5], jnp.float32),
        "patch_w": nrm(keys[0], (C * patch * patch, D)),
        "patch_b": jnp.zeros((D,), jnp.float32),
        "cls_token": nrm(keys[1], (1, 1, D)),
        "pos_embed": nrm(keys[2], (1, N + 1, D)),
        "norm_g": jnp.ones((D,), jnp.float32),
        "norm_b": jnp.zeros((D,), jnp.float32),
        "blocks": [],
    }
    for d in range(depth):
        bk = jax.random.split(keys[4 + d], 4)
        params["blocks"].append({
            "ln1_g": jnp.ones((D,), jnp.float32),
            "ln1_b": jnp.zeros((D,), jnp.float32),
            "qkv_w": nrm(bk[0], (D, 3 * D)),
            "qkv_b": jnp.zeros((3 * D,), jnp.float32),
            "proj_w": nrm(bk[1], (D, D)),
            "proj_b": jnp.zeros((D,), jnp.float32),
            "ln2_g": jnp.ones((D,), jnp.float32),
            "ln2_b": jnp.zeros((D,), jnp.float32),
            "fc1_w": nrm(bk[2], (D, mlp_hidden)),
            "fc1_b": jnp.zeros((mlp_hidden,), jnp.float32),
            "fc2_w": nrm(bk[3], (mlp_hidden, D)),
            "fc2_b": jnp.zeros((D,), jnp.float32),
        })
    return params


def fold_and_cast_params(params, patch, heads):
    """One-time parameter prep:
      * fold pixel normalization into the patch-embed weights,
      * pad pos_embed to the padded token length, flatten cls token,
      * permute qkv columns from [q|k|v] (head-major each) to per-head [q|k|v],
      * pre-cast all matmul weights to bf16 (MXU-native).
    """
    # TODO(synk): on v7x the large weights (qkv/fc1/fc2) could be pre-quantized
    # to fp8 for ~2x MXU throughput, behind an accuracy check.
    out = dict(params)
    pp = patch * patch
    mean_flat = jnp.repeat(params["pixel_mean"], pp)     # order (C, ph, pw)
    std_flat = jnp.repeat(params["pixel_std"], pp)
    w = params["patch_w"]                                # (C*p*p, D) f32
    out["patch_w"] = (w / std_flat[:, None]).astype(jnp.bfloat16)
    out["patch_b"] = params["patch_b"] - (mean_flat / std_flat) @ w

    pos = params["pos_embed"][0]                         # (T, D)
    T, D = pos.shape
    Tp = _round_up(T, 8)
    out["pos_embed_pad"] = jnp.pad(pos, ((0, Tp - T), (0, 0)))
    out["cls_token"] = params["cls_token"].reshape(1, D)

    dh = D // heads
    blocks = []
    for blk in params["blocks"]:
        nb = dict(blk)
        qw = (blk["qkv_w"].reshape(D, 3, heads, dh)
                          .transpose(0, 2, 1, 3).reshape(D, 3 * D))
        qb = (blk["qkv_b"].reshape(3, heads, dh)
                          .transpose(1, 0, 2).reshape(3 * D))
        nb["qkv_w"] = qw.astype(jnp.bfloat16)
        nb["qkv_b"] = qb
        for name in ("proj_w", "fc1_w", "fc2_w"):
            nb[name] = blk[name].astype(jnp.bfloat16)
        blocks.append(nb)
    out["blocks"] = blocks
    return out


if __name__ == "__main__":
    # TODO(synk): text_conditioning=True path (FlamingoCrossAttn + LoRA) and
    # checkpoint/pos-embed resampling are init/IO-time machinery with no Pallas
    # equivalent; only the text_conditioning=False forward path is implemented.
    cfg = dict(patch=4, dim=256, heads=2, depth=2, mlp_hidden=1024,
               num_prefix_tokens=1)
    B, C, H, W = 2, 3, 16, 16
    N = (H // cfg["patch"]) * (W // cfg["patch"])

    key = jax.random.PRNGKey(0)
    kx, kp = jax.random.split(key)
    x = jax.random.normal(kx, (B, C, H, W), dtype=jnp.float32)
    raw = init_params(kp, C=C, patch=cfg["patch"], D=cfg["dim"],
                      depth=cfg["depth"], mlp_hidden=cfg["mlp_hidden"], N=N)
    params = fold_and_cast_params(raw, cfg["patch"], cfg["heads"])

    fwd = jax.jit(lambda xx, pp: encoder_forward(xx, pp, cfg))
    out = fwd(x, params)
    out = jax.block_until_ready(out)
    assert out.shape == (B, N, cfg["dim"]), out.shape
    assert bool(jnp.all(jnp.isfinite(out)))
    print("KERNEL_OK")
</pallas_src>

<mosaic_0001>
module attributes {stable_mosaic.version = 11 : i64} {
  func.func @_patch_kernel(%arg0: i32, %arg1: memref<16x48xf32, #tpu.memory_space<vmem>>, %arg2: memref<48x256xbf16, #tpu.memory_space<vmem>>, %arg3: memref<1x256xf32, #tpu.memory_space<vmem>>, %arg4: memref<1x256xf32, #tpu.memory_space<vmem>>, %arg5: memref<24x256xf32, #tpu.memory_space<vmem>>, %arg6: memref<1x24x256xf32, #tpu.memory_space<vmem>>) attributes {dimension_semantics = [#tpu.dimension_semantics<parallel>], iteration_bounds = array<i64: 2>, scalar_prefetch = 0 : i64, scratch_operands = 0 : i64, tpu.core_type = #tpu.core_type<tc>, window_params = [{transform_indices = @transform_0, window_bounds = array<i64: 16, 48>}, {pipeline_mode = #tpu.pipeline_mode<synchronous>, transform_indices = @transform_1, window_bounds = array<i64: 48, 256>}, {pipeline_mode = #tpu.pipeline_mode<synchronous>, transform_indices = @transform_2, window_bounds = array<i64: 1, 256>}, {pipeline_mode = #tpu.pipeline_mode<synchronous>, transform_indices = @transform_3, window_bounds = array<i64: 1, 256>}, {pipeline_mode = #tpu.pipeline_mode<synchronous>, transform_indices = @transform_4, window_bounds = array<i64: 24, 256>}, {transform_indices = @transform_5, window_bounds = array<i64: 1, 24, 256>}]} {
    %c0 = arith.constant 0 : index
    %c0_0 = arith.constant 0 : index
    %0 = vector.load %arg1[%c0, %c0_0] : memref<16x48xf32, #tpu.memory_space<vmem>>, vector<16x48xf32>
    %1 = arith.truncf %0 : vector<16x48xf32> to vector<16x48xbf16>
    %c0_1 = arith.constant 0 : index
    %c0_2 = arith.constant 0 : index
    %2 = vector.load %arg2[%c0_1, %c0_2] : memref<48x256xbf16, #tpu.memory_space<vmem>>, vector<48x256xbf16>
    %cst = arith.constant dense<0.000000e+00> : vector<16x256xf32>
    %3 = tpu.matmul %1, %2, %cst {dimension_numbers = #tpu.dot_dimension_numbers<[1], [0], [0], [1], [0, 0, 1, 1], [], []>} : vector<16x48xbf16>, vector<48x256xbf16>, vector<16x256xf32> -> vector<16x256xf32>
    %c0_3 = arith.constant 0 : index
    %c0_4 = arith.constant 0 : index
    %4 = vector.load %arg3[%c0_3, %c0_4] : memref<1x256xf32, #tpu.memory_space<vmem>>, vector<1x256xf32>
    %5 = vector.broadcast %4 : vector<1x256xf32> to vector<16x256xf32>
    %6 = arith.addf %3, %5 : vector<16x256xf32>
    %c0_5 = arith.constant 0 : index
    %c0_6 = arith.constant 0 : index
    %7 = vector.load %arg4[%c0_5, %c0_6] : memref<1x256xf32, #tpu.memory_space<vmem>>, vector<1x256xf32>
    %c0_7 = arith.constant 0 : index
    %c0_8 = arith.constant 0 : index
    %8 = vector.load %arg5[%c0_7, %c0_8] : memref<24x256xf32, #tpu.memory_space<vmem>>, vector<1x256xf32>
    %9 = arith.addf %7, %8 : vector<1x256xf32>
    %c0_9 = arith.constant 0 : index
    %c0_10 = arith.constant 0 : index
    %c0_11 = arith.constant 0 : index
    %10 = vector.load %arg6[%c0_9, %c0_10, %c0_11] : memref<1x24x256xf32, #tpu.memory_space<vmem>>, vector<1x1x256xf32>
    %11 = vector.shape_cast %10 : vector<1x1x256xf32> to vector<1x256xf32>
    %12 = vector.shape_cast %9 : vector<1x256xf32> to vector<1x1x256xf32>
    tpu.vector_store %arg6[%c0_9, %c0_10, %c0_11], %12 {strides = array<i32>} : memref<1x24x256xf32, #tpu.memory_space<vmem>>, vector<1x1x256xf32>,
    %c1 = arith.constant 1 : index
    %c0_12 = arith.constant 0 : index
    %13 = vector.load %arg5[%c1, %c0_12] : memref<24x256xf32, #tpu.memory_space<vmem>>, vector<16x256xf32>
    %14 = arith.addf %6, %13 : vector<16x256xf32>
    %c0_13 = arith.constant 0 : index
    %c1_14 = arith.constant 1 : index
    %c0_15 = arith.constant 0 : index
    %15 = vector.load %arg6[%c0_13, %c1_14, %c0_15] : memref<1x24x256xf32, #tpu.memory_space<vmem>>, vector<1x16x256xf32>
    %16 = vector.shape_cast %15 : vector<1x16x256xf32> to vector<16x256xf32>
    %17 = vector.shape_cast %14 : vector<16x256xf32> to vector<1x16x256xf32>
    tpu.vector_store %arg6[%c0_13, %c1_14, %c0_15], %17 {strides = array<i32>} : memref<1x24x256xf32, #tpu.memory_space<vmem>>, vector<1x16x256xf32>,
    %cst_16 = arith.constant 0.000000e+00 : f32
    %18 = vector.broadcast %cst_16 : f32 to vector<7x256xf32>
    %c0_17 = arith.constant 0 : index
    %c17 = arith.constant 17 : index
    %c0_18 = arith.constant 0 : index
    %19 = vector.load %arg6[%c0_17, %c17, %c0_18] : memref<1x24x256xf32, #tpu.memory_space<vmem>>, vector<1x7x256xf32>
    %20 = vector.shape_cast %19 : vector<1x7x256xf32> to vector<7x256xf32>
    %21 = vector.shape_cast %18 : vector<7x256xf32> to vector<1x7x256xf32>
    tpu.vector_store %arg6[%c0_17, %c17, %c0_18], %21 {strides = array<i32>} : memref<1x24x256xf32, #tpu.memory_space<vmem>>, vector<1x7x256xf32>,
    return
  }
  func.func @transform_0(%arg0: i32) -> (i32, i32) {
    %c0_i32 = arith.constant 0 : i32
    %c0_i32_0 = arith.constant 0 : i32
    return %arg0, %c0_i32 : i32, i32
  }
  func.func @transform_1(%arg0: i32) -> (i32, i32) {
    %c0_i32 = arith.constant 0 : i32
    %c0_i32_0 = arith.constant 0 : i32
    %c0_i32_1 = arith.constant 0 : i32
    return %c0_i32, %c0_i32_0 : i32, i32
  }
  func.func @transform_2(%arg0: i32) -> (i32, i32) {
    %c0_i32 = arith.constant 0 : i32
    %c0_i32_0 = arith.constant 0 : i32
    %c0_i32_1 = arith.constant 0 : i32
    return %c0_i32, %c0_i32_0 : i32, i32
  }
  func.func @transform_3(%arg0: i32) -> (i32, i32) {
    %c0_i32 = arith.constant 0 : i32
    %c0_i32_0 = arith.constant 0 : i32
    %c0_i32_1 = arith.constant 0 : i32
    return %c0_i32, %c0_i32_0 : i32, i32
  }
  func.func @transform_4(%arg0: i32) -> (i32, i32) {
    %c0_i32 = arith.constant 0 : i32
    %c0_i32_0 = arith.constant 0 : i32
    %c0_i32_1 = arith.constant 0 : i32
    return %c0_i32, %c0_i32_0 : i32, i32
  }
  func.func @transform_5(%arg0: i32) -> (i32, i32, i32) {
    %c0_i32 = arith.constant 0 : i32
    %c0_i32_0 = arith.constant 0 : i32
    %c0_i32_1 = arith.constant 0 : i32
    return %arg0, %c0_i32, %c0_i32_0 : i32, i32, i32
  }
}

module attributes {stable_mosaic.version = 11 : i64} {
  func.func @_ln_mm_kernel(%arg0: i32, %arg1: i32, %arg2: memref<48x256xf32, #tpu.memory_space<vmem>>, %arg3: memref<1x256xf32, #tpu.memory_space<vmem>>, %arg4: memref<1x256xf32, #tpu.memory_space<vmem>>, %arg5: memref<256x384xbf16, #tpu.memory_space<vmem>>, %arg6: memref<1x384xf32, #tpu.memory_space<vmem>>, %arg7: memref<48x384xbf16, #tpu.memory_space<vmem>>, %arg8: memref<48x256xbf16, #tpu.memory_space<vmem>>) attributes {dimension_semantics = [#tpu.dimension_semantics<parallel>, #tpu.dimension_semantics<arbitrary>], iteration_bounds = array<i64: 1, 2>, scalar_prefetch = 0 : i64, scratch_operands = 1 : i64, tpu.core_type = #tpu.core_type<tc>, window_params = [{transform_indices = @transform_0, window_bounds = array<i64: 48, 256>}, {pipeline_mode = #tpu.pipeline_mode<synchronous>, transform_indices = @transform_1, window_bounds = array<i64: 1, 256>}, {pipeline_mode = #tpu.pipeline_mode<synchronous>, transform_indices = @transform_2, window_bounds = array<i64: 1, 256>}, {transform_indices = @transform_3, window_bounds = array<i64: 256, 384>}, {transform_indices = @transform_4, window_bounds = array<i64: 1, 384>}, {transform_indices = @transform_5, window_bounds = array<i64: 48, 384>}]} {
    %c0_i32 = arith.constant 0 : i32
    %0 = arith.cmpi eq, %arg1, %c0_i32 : i32
    %1 = arith.extui %0 : i1 to i32
    %c0_i32_0 = arith.constant 0 : i32
    %2 = arith.cmpi ne, %1, %c0_i32_0 : i32
    scf.if %2 {
      %c0_8 = arith.constant 0 : index
      %c0_9 = arith.constant 0 : index
      %11 = vector.load %arg2[%c0_8, %c0_9] : memref<48x256xf32, #tpu.memory_space<vmem>>, vector<48x256xf32>
      %cst_10 = arith.constant dense<0.000000e+00> : vector<48xf32>
      %12 = vector.multi_reduction <add>, %11, %cst_10 [1] : vector<48x256xf32> to vector<48xf32>
      %13 = vector.shape_cast %12 : vector<48xf32> to vector<48x1xf32>
      %cst_11 = arith.constant 2.560000e+02 : f32
      %14 = vector.broadcast %cst_11 : f32 to vector<48x1xf32>
      %15 = arith.divf %13, %14 : vector<48x1xf32>
      %16 = vector.broadcast %15 : vector<48x1xf32> to vector<48x256xf32>
      %17 = arith.subf %11, %16 : vector<48x256xf32>
      %18 = arith.mulf %17, %17 : vector<48x256xf32>
      %cst_12 = arith.constant dense<0.000000e+00> : vector<48xf32>
      %19 = vector.multi_reduction <add>, %18, %cst_12 [1] : vector<48x256xf32> to vector<48xf32>
      %20 = vector.shape_cast %19 : vector<48xf32> to vector<48x1xf32>
      %cst_13 = arith.constant 2.560000e+02 : f32
      %21 = vector.broadcast %cst_13 : f32 to vector<48x1xf32>
      %22 = arith.divf %20, %21 : vector<48x1xf32>
      %23 = vector.broadcast %15 : vector<48x1xf32> to vector<48x256xf32>
      %24 = arith.subf %11, %23 : vector<48x256xf32>
      %cst_14 = arith.constant 9.99999997E-7 : f32
      %25 = vector.broadcast %cst_14 : f32 to vector<48x1xf32>
      %26 = arith.addf %22, %25 : vector<48x1xf32>
      %27 = math.rsqrt %26 : vector<48x1xf32>
      %28 = vector.broadcast %27 : vector<48x1xf32> to vector<48x256xf32>
      %29 = arith.mulf %24, %28 : vector<48x256xf32>
      %c0_15 = arith.constant 0 : index
      %c0_16 = arith.constant 0 : index
      %30 = vector.load %arg3[%c0_15, %c0_16] : memref<1x256xf32, #tpu.memory_space<vmem>>, vector<1x256xf32>
      %31 = vector.broadcast %30 : vector<1x256xf32> to vector<48x256xf32>
      %32 = arith.mulf %29, %31 : vector<48x256xf32>
      %c0_17 = arith.constant 0 : index
      %c0_18 = arith.constant 0 : index
      %33 = vector.load %arg4[%c0_17, %c0_18] : memref<1x256xf32, #tpu.memory_space<vmem>>, vector<1x256xf32>
      %34 = vector.broadcast %33 : vector<1x256xf32> to vector<48x256xf32>
      %35 = arith.addf %32, %34 : vector<48x256xf32>
      %36 = arith.truncf %35 : vector<48x256xf32> to vector<48x256xbf16>
      %c0_19 = arith.constant 0 : index
      %c0_20 = arith.constant 0 : index
      %37 = vector.load %arg8[%c0_19, %c0_20] : memref<48x256xbf16, #tpu.memory_space<vmem>>, vector<48x256xbf16>
      tpu.vector_store %arg8[%c0_19, %c0_20], %36 {strides = array<i32>} : memref<48x256xbf16, #tpu.memory_space<vmem>>, vector<48x256xbf16>,
    } else {
    }
    %c0 = arith.constant 0 : index
    %c0_1 = arith.constant 0 : index
    %3 = vector.load %arg8[%c0, %c0_1] : memref<48x256xbf16, #tpu.memory_space<vmem>>, vector<48x256xbf16>
    %c0_2 = arith.constant 0 : index
    %c0_3 = arith.constant 0 : index
    %4 = vector.load %arg5[%c0_2, %c0_3] : memref<256x384xbf16, #tpu.memory_space<vmem>>, vector<256x384xbf16>
    %cst = arith.constant dense<0.000000e+00> : vector<48x384xf32>
    %5 = tpu.matmul %3, %4, %cst {dimension_numbers = #tpu.dot_dimension_numbers<[1], [0], [0], [1], [0, 0, 1, 1], [], []>} : vector<48x256xbf16>, vector<256x384xbf16>, vector<48x384xf32> -> vector<48x384xf32>
    %c0_4 = arith.constant 0 : index
    %c0_5 = arith.constant 0 : index
    %6 = vector.load %arg6[%c0_4, %c0_5] : memref<1x384xf32, #tpu.memory_space<vmem>>, vector<1x384xf32>
    %7 = vector.broadcast %6 : vector<1x384xf32> to vector<48x384xf32>
    %8 = arith.addf %5, %7 : vector<48x384xf32>
    %9 = arith.truncf %8 : vector<48x384xf32> to vector<48x384xbf16>
    %c0_6 = arith.constant 0 : index
    %c0_7 = arith.constant 0 : index
    %10 = vector.load %arg7[%c0_6, %c0_7] : memref<48x384xbf16, #tpu.memory_space<vmem>>, vector<48x384xbf16>
    tpu.vector_store %arg7[%c0_6, %c0_7], %9 {strides = array<i32>} : memref<48x384xbf16, #tpu.memory_space<vmem>>, vector<48x384xbf16>,
    return
  }
  func.func @transform_0(%arg0: i32, %arg1: i32) -> (i32, i32) {
    %c0_i32 = arith.constant 0 : i32
    %c0_i32_0 = arith.constant 0 : i32
    return %arg0, %c0_i32 : i32, i32
  }
  func.func @transform_1(%arg0: i32, %arg1: i32) -> (i32, i32) {
    %c0_i32 = arith.constant 0 : i32
    %c0_i32_0 = arith.constant 0 : i32
    %c0_i32_1 = arith.constant 0 : i32
    return %c0_i32, %c0_i32_0 : i32, i32
  }
  func.func @transform_2(%arg0: i32, %arg1: i32) -> (i32, i32) {
    %c0_i32 = arith.constant 0 : i32
    %c0_i32_0 = arith.constant 0 : i32
    %c0_i32_1 = arith.constant 0 : i32
    return %c0_i32, %c0_i32_0 : i32, i32
  }
  func.func @transform_3(%arg0: i32, %arg1: i32) -> (i32, i32) {
    %c0_i32 = arith.constant 0 : i32
    %c0_i32_0 = arith.constant 0 : i32
    return %c0_i32, %arg1 : i32, i32
  }
  func.func @transform_4(%arg0: i32, %arg1: i32) -> (i32, i32) {
    %c0_i32 = arith.constant 0 : i32
    %c0_i32_0 = arith.constant 0 : i32
    return %c0_i32, %arg1 : i32, i32
  }
  func.func @transform_5(%arg0: i32, %arg1: i32) -> (i32, i32) {
    %c0_i32 = arith.constant 0 : i32
    return %arg0, %arg1 : i32, i32
  }
}

module attributes {stable_mosaic.version = 11 : i64} {
  func.func @_mm_kernel(%arg0: i32, %arg1: i32, %arg2: i32, %arg3: memref<48x256xbf16, #tpu.memory_space<vmem>>, %arg4: memref<256x256xbf16, #tpu.memory_space<vmem>>, %arg5: memref<1x256xf32, #tpu.memory_space<vmem>>, %arg6: memref<48x256xf32, #tpu.memory_space<vmem>>, %arg7: memref<48x256xf32, #tpu.memory_space<vmem>>, %arg8: memref<48x256xf32, #tpu.memory_space<vmem>>) attributes {dimension_semantics = [#tpu.dimension_semantics<parallel>, #tpu.dimension_semantics<parallel>, #tpu.dimension_semantics<arbitrary>], iteration_bounds = array<i64: 1, 1, 1>, scalar_prefetch = 0 : i64, scratch_operands = 1 : i64, tpu.core_type = #tpu.core_type<tc>, window_params = [{transform_indices = @transform_0, window_bounds = array<i64: 48, 256>}, {transform_indices = @transform_1, window_bounds = array<i64: 256, 256>}, {transform_indices = @transform_2, window_bounds = array<i64: 1, 256>}, {transform_indices = @transform_3, window_bounds = array<i64: 48, 256>}, {transform_indices = @transform_4, window_bounds = array<i64: 48, 256>}]} {
    %c0_i32 = arith.constant 0 : i32
    %0 = arith.cmpi eq, %arg2, %c0_i32 : i32
    %1 = arith.extui %0 : i1 to i32
    %c0_i32_0 = arith.constant 0 : i32
    %2 = arith.cmpi ne, %1, %c0_i32_0 : i32
    scf.if %2 {
      %cst_10 = arith.constant 0.000000e+00 : f32
      %12 = vector.broadcast %cst_10 : f32 to vector<48x256xf32>
      %c0_11 = arith.constant 0 : index
      %c0_12 = arith.constant 0 : index
      %13 = vector.load %arg8[%c0_11, %c0_12] : memref<48x256xf32, #tpu.memory_space<vmem>>, vector<48x256xf32>
      tpu.vector_store %arg8[%c0_11, %c0_12], %12 {strides = array<i32>} : memref<48x256xf32, #tpu.memory_space<vmem>>, vector<48x256xf32>,
    } else {
    }
    %c0 = arith.constant 0 : index
    %c0_1 = arith.constant 0 : index
    %3 = vector.load %arg3[%c0, %c0_1] : memref<48x256xbf16, #tpu.memory_space<vmem>>, vector<48x256xbf16>
    %c0_2 = arith.constant 0 : index
    %c0_3 = arith.constant 0 : index
    %4 = vector.load %arg8[%c0_2, %c0_3] : memref<48x256xf32, #tpu.memory_space<vmem>>, vector<48x256xf32>
    %c0_4 = arith.constant 0 : index
    %c0_5 = arith.constant 0 : index
    %5 = vector.load %arg4[%c0_4, %c0_5] : memref<256x256xbf16, #tpu.memory_space<vmem>>, vector<256x256xbf16>
    %cst = arith.constant dense<0.000000e+00> : vector<48x256xf32>
    %6 = tpu.matmul %3, %5, %cst {dimension_numbers = #tpu.dot_dimension_numbers<[1], [0], [0], [1], [0, 0, 1, 1], [], []>} : vector<48x256xbf16>, vector<256x256xbf16>, vector<48x256xf32> -> vector<48x256xf32>
    %7 = arith.addf %4, %6 : vector<48x256xf32>
    %c0_6 = arith.constant 0 : index
    %c0_7 = arith.constant 0 : index
    %8 = vector.load %arg8[%c0_6, %c0_7] : memref<48x256xf32, #tpu.memory_space<vmem>>, vector<48x256xf32>
    tpu.vector_store %arg8[%c0_6, %c0_7], %7 {strides = array<i32>} : memref<48x256xf32, #tpu.memory_space<vmem>>, vector<48x256xf32>,
    %c0_i32_8 = arith.constant 0 : i32
    %9 = arith.cmpi eq, %arg2, %c0_i32_8 : i32
    %10 = arith.extui %9 : i1 to i32
    %c0_i32_9 = arith.constant 0 : i32
    %11 = arith.cmpi ne, %10, %c0_i32_9 : i32
    scf.if %11 {
      %c0_10 = arith.constant 0 : index
      %c0_11 = arith.constant 0 : index
      %12 = vector.load %arg8[%c0_10, %c0_11] : memref<48x256xf32, #tpu.memory_space<vmem>>, vector<48x256xf32>
      %c0_12 = arith.constant 0 : index
      %c0_13 = arith.constant 0 : index
      %13 = vector.load %arg5[%c0_12, %c0_13] : memref<1x256xf32, #tpu.memory_space<vmem>>, vector<1x256xf32>
      %14 = vector.broadcast %13 : vector<1x256xf32> to vector<48x256xf32>
      %15 = arith.addf %12, %14 : vector<48x256xf32>
      %c0_14 = arith.constant 0 : index
      %c0_15 = arith.constant 0 : index
      %16 = vector.load %arg6[%c0_14, %c0_15] : memref<48x256xf32, #tpu.memory_space<vmem>>, vector<48x256xf32>
      %17 = arith.addf %15, %16 : vector<48x256xf32>
      %c0_16 = arith.constant 0 : index
      %c0_17 = arith.constant 0 : index
      %18 = vector.load %arg7[%c0_16, %c0_17] : memref<48x256xf32, #tpu.memory_space<vmem>>, vector<48x256xf32>
      tpu.vector_store %arg7[%c0_16, %c0_17], %17 {strides = array<i32>} : memref<48x256xf32, #tpu.memory_space<vmem>>, vector<48x256xf32>,
    } else {
    }
    return
  }
  func.func @transform_0(%arg0: i32, %arg1: i32, %arg2: i32) -> (i32, i32) {
    %c0_i32 = arith.constant 0 : i32
    return %arg0, %arg2 : i32, i32
  }
  func.func @transform_1(%arg0: i32, %arg1: i32, %arg2: i32) -> (i32, i32) {
    %c0_i32 = arith.constant 0 : i32
    return %arg2, %arg1 : i32, i32
  }
  func.func @transform_2(%arg0: i32, %arg1: i32, %arg2: i32) -> (i32, i32) {
    %c0_i32 = arith.constant 0 : i32
    %c0_i32_0 = arith.constant 0 : i32
    return %c0_i32, %arg1 : i32, i32
  }
  func.func @transform_3(%arg0: i32, %arg1: i32, %arg2: i32) -> (i32, i32) {
    %c0_i32 = arith.constant 0 : i32
    return %arg0, %arg1 : i32, i32
  }
  func.func @transform_4(%arg0: i32, %arg1: i32, %arg2: i32) -> (i32, i32) {
    %c0_i32 = arith.constant 0 : i32
    return %arg0, %arg1 : i32, i32
  }
}

module attributes {stable_mosaic.version = 11 : i64} {
  func.func @_attn_kernel(%arg0: i32, %arg1: i32, %arg2: memref<1x24x384xbf16, #tpu.memory_space<vmem>>, %arg3: memref<1x24x128xbf16, #tpu.memory_space<vmem>>) attributes {dimension_semantics = [#tpu.dimension_semantics<parallel>, #tpu.dimension_semantics<parallel>], iteration_bounds = array<i64: 2, 2>, scalar_prefetch = 0 : i64, scratch_operands = 0 : i64, tpu.core_type = #tpu.core_type<tc>, window_params = [{transform_indices = @transform_0, window_bounds = array<i64: 1, 24, 384>}, {transform_indices = @transform_1, window_bounds = array<i64: 1, 24, 128>}]} {
    %c0 = arith.constant 0 : index
    %c0_0 = arith.constant 0 : index
    %c0_1 = arith.constant 0 : index
    %0 = vector.load %arg2[%c0, %c0_0, %c0_1] : memref<1x24x384xbf16, #tpu.memory_space<vmem>>, vector<1x24x384xbf16>
    %1 = vector.shape_cast %0 : vector<1x24x384xbf16> to vector<24x384xbf16>
    %2 = vector.extract_strided_slice %1 {offsets = [0, 0], sizes = [24, 128], strides = [1, 1]} : vector<24x384xbf16> to vector<24x128xbf16>
    %3 = vector.extract_strided_slice %1 {offsets = [0, 128], sizes = [24, 128], strides = [1, 1]} : vector<24x384xbf16> to vector<24x128xbf16>
    %4 = vector.extract_strided_slice %1 {offsets = [0, 256], sizes = [24, 128], strides = [1, 1]} : vector<24x384xbf16> to vector<24x128xbf16>
    %cst = arith.constant dense<0.000000e+00> : vector<24x24xf32>
    %5 = tpu.matmul %2, %3, %cst {dimension_numbers = #tpu.dot_dimension_numbers<[1], [1], [0], [0], [0, 0, 1, 0], [], []>} : vector<24x128xbf16>, vector<24x128xbf16>, vector<24x24xf32> -> vector<24x24xf32>
    %cst_2 = arith.constant 0.0883883461 : f32
    %6 = vector.broadcast %cst_2 : f32 to vector<24x24xf32>
    %7 = arith.mulf %5, %6 : vector<24x24xf32>
    %8 = tpu.iota {dimensions = array<i32: 1>} : vector<1x24xi32>
    %c17_i32 = arith.constant 17 : i32
    %9 = vector.broadcast %c17_i32 : i32 to vector<1x24xi32>
    %10 = arith.cmpi slt, %8, %9 : vector<1x24xi32>
    %cst_3 = arith.constant 0.000000e+00 : f32
    %cst_4 = arith.constant -1.000000e+30 : f32
    %11 = vector.broadcast %cst_3 : f32 to vector<1x24xf32>
    %12 = vector.broadcast %cst_4 : f32 to vector<1x24xf32>
    %13 = arith.select %10, %11, %12 : vector<1x24xi1>, vector<1x24xf32>
    %14 = vector.broadcast %13 : vector<1x24xf32> to vector<24x24xf32>
    %15 = arith.addf %7, %14 : vector<24x24xf32>
    %cst_5 = arith.constant dense<0xFF800000> : vector<24xf32>
    %16 = vector.multi_reduction <maximumf>, %15, %cst_5 [1] : vector<24x24xf32> to vector<24xf32>
    %17 = vector.shape_cast %16 : vector<24xf32> to vector<24x1xf32>
    %18 = vector.broadcast %17 : vector<24x1xf32> to vector<24x24xf32>
    %19 = arith.subf %15, %18 : vector<24x24xf32>
    %20 = math.exp %19 : vector<24x24xf32>
    %cst_6 = arith.constant dense<0.000000e+00> : vector<24xf32>
    %21 = vector.multi_reduction <add>, %20, %cst_6 [1] : vector<24x24xf32> to vector<24xf32>
    %22 = vector.shape_cast %21 : vector<24xf32> to vector<24x1xf32>
    %23 = arith.truncf %20 : vector<24x24xf32> to vector<24x24xbf16>
    %cst_7 = arith.constant dense<0.000000e+00> : vector<24x128xf32>
    %24 = tpu.matmul %23, %4, %cst_7 {dimension_numbers = #tpu.dot_dimension_numbers<[1], [0], [0], [1], [0, 0, 1, 1], [], []>} : vector<24x24xbf16>, vector<24x128xbf16>, vector<24x128xf32> -> vector<24x128xf32>
    %25 = tpu.reciprocal %22 {approx = true} : vector<24x1xf32> -> vector<24x1xf32>
    %26 = vector.broadcast %25 : vector<24x1xf32> to vector<24x128xf32>
    %27 = arith.mulf %24, %26 : vector<24x128xf32>
    %28 = arith.truncf %27 : vector<24x128xf32> to vector<24x128xbf16>
    %c0_8 = arith.constant 0 : index
    %c0_9 = arith.constant 0 : index
    %c0_10 = arith.constant 0 : index
    %29 = vector.load %arg3[%c0_8, %c0_9, %c0_10] : memref<1x24x128xbf16, #tpu.memory_space<vmem>>, vector<1x24x128xbf16>
    %30 = vector.shape_cast %29 : vector<1x24x128xbf16> to vector<24x128xbf16>
    %31 = vector.shape_cast %28 : vector<24x128xbf16> to vector<1x24x128xbf16>
    tpu.vector_store %arg3[%c0_8, %c0_9, %c0_10], %31 {strides = array<i32>} : memref<1x24x128xbf16, #tpu.memory_space<vmem>>, vector<1x24x128xbf16>,
    return
  }
  func.func @transform_0(%arg0: i32, %arg1: i32) -> (i32, i32, i32) {
    %c0_i32 = arith.constant 0 : i32
    %c0_i32_0 = arith.constant 0 : i32
    return %arg0, %c0_i32, %arg1 : i32, i32, i32
  }
  func.func @transform_1(%arg0: i32, %arg1: i32) -> (i32, i32, i32) {
    %c0_i32 = arith.constant 0 : i32
    %c0_i32_0 = arith.constant 0 : i32
    return %arg0, %c0_i32, %arg1 : i32, i32, i32
  }
}

module attributes {stable_mosaic.version = 11 : i64} {
  func.func @_ln_mm_kernel(%arg0: i32, %arg1: i32, %arg2: memref<48x256xf32, #tpu.memory_space<vmem>>, %arg3: memref<1x256xf32, #tpu.memory_space<vmem>>, %arg4: memref<1x256xf32, #tpu.memory_space<vmem>>, %arg5: memref<256x512xbf16, #tpu.memory_space<vmem>>, %arg6: memref<1x512xf32, #tpu.memory_space<vmem>>, %arg7: memref<48x512xbf16, #tpu.memory_space<vmem>>, %arg8: memref<48x256xbf16, #tpu.memory_space<vmem>>) attributes {dimension_semantics = [#tpu.dimension_semantics<parallel>, #tpu.dimension_semantics<arbitrary>], iteration_bounds = array<i64: 1, 2>, scalar_prefetch = 0 : i64, scratch_operands = 1 : i64, tpu.core_type = #tpu.core_type<tc>, window_params = [{transform_indices = @transform_0, window_bounds = array<i64: 48, 256>}, {pipeline_mode = #tpu.pipeline_mode<synchronous>, transform_indices = @transform_1, window_bounds = array<i64: 1, 256>}, {pipeline_mode = #tpu.pipeline_mode<synchronous>, transform_indices = @transform_2, window_bounds = array<i64: 1, 256>}, {transform_indices = @transform_3, window_bounds = array<i64: 256, 512>}, {transform_indices = @transform_4, window_bounds = array<i64: 1, 512>}, {transform_indices = @transform_5, window_bounds = array<i64: 48, 512>}]} {
    %c0_i32 = arith.constant 0 : i32
    %0 = arith.cmpi eq, %arg1, %c0_i32 : i32
    %1 = arith.extui %0 : i1 to i32
    %c0_i32_0 = arith.constant 0 : i32
    %2 = arith.cmpi ne, %1, %c0_i32_0 : i32
    scf.if %2 {
      %c0_12 = arith.constant 0 : index
      %c0_13 = arith.constant 0 : index
      %24 = vector.load %arg2[%c0_12, %c0_13] : memref<48x256xf32, #tpu.memory_space<vmem>>, vector<48x256xf32>
      %cst_14 = arith.constant dense<0.000000e+00> : vector<48xf32>
      %25 = vector.multi_reduction <add>, %24, %cst_14 [1] : vector<48x256xf32> to vector<48xf32>
      %26 = vector.shape_cast %25 : vector<48xf32> to vector<48x1xf32>
      %cst_15 = arith.constant 2.560000e+02 : f32
      %27 = vector.broadcast %cst_15 : f32 to vector<48x1xf32>
      %28 = arith.divf %26, %27 : vector<48x1xf32>
      %29 = vector.broadcast %28 : vector<48x1xf32> to vector<48x256xf32>
      %30 = arith.subf %24, %29 : vector<48x256xf32>
      %31 = arith.mulf %30, %30 : vector<48x256xf32>
      %cst_16 = arith.constant dense<0.000000e+00> : vector<48xf32>
      %32 = vector.multi_reduction <add>, %31, %cst_16 [1] : vector<48x256xf32> to vector<48xf32>
      %33 = vector.shape_cast %32 : vector<48xf32> to vector<48x1xf32>
      %cst_17 = arith.constant 2.560000e+02 : f32
      %34 = vector.broadcast %cst_17 : f32 to vector<48x1xf32>
      %35 = arith.divf %33, %34 : vector<48x1xf32>
      %36 = vector.broadcast %28 : vector<48x1xf32> to vector<48x256xf32>
      %37 = arith.subf %24, %36 : vector<48x256xf32>
      %cst_18 = arith.constant 9.99999997E-7 : f32
      %38 = vector.broadcast %cst_18 : f32 to vector<48x1xf32>
      %39 = arith.addf %35, %38 : vector<48x1xf32>
      %40 = math.rsqrt %39 : vector<48x1xf32>
      %41 = vector.broadcast %40 : vector<48x1xf32> to vector<48x256xf32>
      %42 = arith.mulf %37, %41 : vector<48x256xf32>
      %c0_19 = arith.constant 0 : index
      %c0_20 = arith.constant 0 : index
      %43 = vector.load %arg3[%c0_19, %c0_20] : memref<1x256xf32, #tpu.memory_space<vmem>>, vector<1x256xf32>
      %44 = vector.broadcast %43 : vector<1x256xf32> to vector<48x256xf32>
      %45 = arith.mulf %42, %44 : vector<48x256xf32>
      %c0_21 = arith.constant 0 : index
      %c0_22 = arith.constant 0 : index
      %46 = vector.load %arg4[%c0_21, %c0_22] : memref<1x256xf32, #tpu.memory_space<vmem>>, vector<1x256xf32>
      %47 = vector.broadcast %46 : vector<1x256xf32> to vector<48x256xf32>
      %48 = arith.addf %45, %47 : vector<48x256xf32>
      %49 = arith.truncf %48 : vector<48x256xf32> to vector<48x256xbf16>
      %c0_23 = arith.constant 0 : index
      %c0_24 = arith.constant 0 : index
      %50 = vector.load %arg8[%c0_23, %c0_24] : memref<48x256xbf16, #tpu.memory_space<vmem>>, vector<48x256xbf16>
      tpu.vector_store %arg8[%c0_23, %c0_24], %49 {strides = array<i32>} : memref<48x256xbf16, #tpu.memory_space<vmem>>, vector<48x256xbf16>,
    } else {
    }
    %c0 = arith.constant 0 : index
    %c0_1 = arith.constant 0 : index
    %3 = vector.load %arg8[%c0, %c0_1] : memref<48x256xbf16, #tpu.memory_space<vmem>>, vector<48x256xbf16>
    %c0_2 = arith.constant 0 : index
    %c0_3 = arith.constant 0 : index
    %4 = vector.load %arg5[%c0_2, %c0_3] : memref<256x512xbf16, #tpu.memory_space<vmem>>, vector<256x512xbf16>
    %cst = arith.constant dense<0.000000e+00> : vector<48x512xf32>
    %5 = tpu.matmul %3, %4, %cst {dimension_numbers = #tpu.dot_dimension_numbers<[1], [0], [0], [1], [0, 0, 1, 1], [], []>} : vector<48x256xbf16>, vector<256x512xbf16>, vector<48x512xf32> -> vector<48x512xf32>
    %c0_4 = arith.constant 0 : index
    %c0_5 = arith.constant 0 : index
    %6 = vector.load %arg6[%c0_4, %c0_5] : memref<1x512xf32, #tpu.memory_space<vmem>>, vector<1x512xf32>
    %7 = vector.broadcast %6 : vector<1x512xf32> to vector<48x512xf32>
    %8 = arith.addf %5, %7 : vector<48x512xf32>
    %9 = arith.mulf %8, %8 : vector<48x512xf32>
    %10 = arith.mulf %8, %9 : vector<48x512xf32>
    %cst_6 = arith.constant 4.471500e-02 : f32
    %11 = vector.broadcast %cst_6 : f32 to vector<48x512xf32>
    %12 = arith.mulf %11, %10 : vector<48x512xf32>
    %13 = arith.addf %8, %12 : vector<48x512xf32>
    %cst_7 = arith.constant 0.797884583 : f32
    %14 = vector.broadcast %cst_7 : f32 to vector<48x512xf32>
    %15 = arith.mulf %14, %13 : vector<48x512xf32>
    %16 = math.tanh %15 : vector<48x512xf32>
    %cst_8 = arith.constant 1.000000e+00 : f32
    %17 = vector.broadcast %cst_8 : f32 to vector<48x512xf32>
    %18 = arith.addf %17, %16 : vector<48x512xf32>
    %cst_9 = arith.constant 5.000000e-01 : f32
    %19 = vector.broadcast %cst_9 : f32 to vector<48x512xf32>
    %20 = arith.mulf %19, %18 : vector<48x512xf32>
    %21 = arith.mulf %8, %20 : vector<48x512xf32>
    %22 = arith.truncf %21 : vector<48x512xf32> to vector<48x512xbf16>
    %c0_10 = arith.constant 0 : index
    %c0_11 = arith.constant 0 : index
    %23 = vector.load %arg7[%c0_10, %c0_11] : memref<48x512xbf16, #tpu.memory_space<vmem>>, vector<48x512xbf16>
    tpu.vector_store %arg7[%c0_10, %c0_11], %22 {strides = array<i32>} : memref<48x512xbf16, #tpu.memory_space<vmem>>, vector<48x512xbf16>,
    return
  }
  func.func @transform_0(%arg0: i32, %arg1: i32) -> (i32, i32) {
    %c0_i32 = arith.constant 0 : i32
    %c0_i32_0 = arith.constant 0 : i32
    return %arg0, %c0_i32 : i32, i32
  }
  func.func @transform_1(%arg0: i32, %arg1: i32) -> (i32, i32) {
    %c0_i32 = arith.constant 0 : i32
    %c0_i32_0 = arith.constant 0 : i32
    %c0_i32_1 = arith.constant 0 : i32
    return %c0_i32, %c0_i32_0 : i32, i32
  }
  func.func @transform_2(%arg0: i32, %arg1: i32) -> (i32, i32) {
    %c0_i32 = arith.constant 0 : i32
    %c0_i32_0 = arith.constant 0 : i32
    %c0_i32_1 = arith.constant 0 : i32
    return %c0_i32, %c0_i32_0 : i32, i32
  }
  func.func @transform_3(%arg0: i32, %arg1: i32) -> (i32, i32) {
    %c0_i32 = arith.constant 0 : i32
    %c0_i32_0 = arith.constant 0 : i32
    return %c0_i32, %arg1 : i32, i32
  }
  func.func @transform_4(%arg0: i32, %arg1: i32) -> (i32, i32) {
    %c0_i32 = arith.constant 0 : i32
    %c0_i32_0 = arith.constant 0 : i32
    return %c0_i32, %arg1 : i32, i32
  }
  func.func @transform_5(%arg0: i32, %arg1: i32) -> (i32, i32) {
    %c0_i32 = arith.constant 0 : i32
    return %arg0, %arg1 : i32, i32
  }
}

module attributes {stable_mosaic.version = 11 : i64} {
  func.func @_mm_kernel(%arg0: i32, %arg1: i32, %arg2: i32, %arg3: memref<48x512xbf16, #tpu.memory_space<vmem>>, %arg4: memref<512x256xbf16, #tpu.memory_space<vmem>>, %arg5: memref<1x256xf32, #tpu.memory_space<vmem>>, %arg6: memref<48x256xf32, #tpu.memory_space<vmem>>, %arg7: memref<48x256xf32, #tpu.memory_space<vmem>>, %arg8: memref<48x256xf32, #tpu.memory_space<vmem>>) attributes {dimension_semantics = [#tpu.dimension_semantics<parallel>, #tpu.dimension_semantics<parallel>, #tpu.dimension_semantics<arbitrary>], iteration_bounds = array<i64: 1, 1, 2>, scalar_prefetch = 0 : i64, scratch_operands = 1 : i64, tpu.core_type = #tpu.core_type<tc>, window_params = [{transform_indices = @transform_0, window_bounds = array<i64: 48, 512>}, {transform_indices = @transform_1, window_bounds = array<i64: 512, 256>}, {transform_indices = @transform_2, window_bounds = array<i64: 1, 256>}, {transform_indices = @transform_3, window_bounds = array<i64: 48, 256>}, {transform_indices = @transform_4, window_bounds = array<i64: 48, 256>}]} {
    %c0_i32 = arith.constant 0 : i32
    %0 = arith.cmpi eq, %arg2, %c0_i32 : i32
    %1 = arith.extui %0 : i1 to i32
    %c0_i32_0 = arith.constant 0 : i32
    %2 = arith.cmpi ne, %1, %c0_i32_0 : i32
    scf.if %2 {
      %cst_9 = arith.constant 0.000000e+00 : f32
      %12 = vector.broadcast %cst_9 : f32 to vector<48x256xf32>
      %c0_10 = arith.constant 0 : index
      %c0_11 = arith.constant 0 : index
      %13 = vector.load %arg8[%c0_10, %c0_11] : memref<48x256xf32, #tpu.memory_space<vmem>>, vector<48x256xf32>
      tpu.vector_store %arg8[%c0_10, %c0_11], %12 {strides = array<i32>} : memref<48x256xf32, #tpu.memory_space<vmem>>, vector<48x256xf32>,
    } else {
    }
    %c0 = arith.constant 0 : index
    %c0_1 = arith.constant 0 : index
    %3 = vector.load %arg3[%c0, %c0_1] : memref<48x512xbf16, #tpu.memory_space<vmem>>, vector<48x512xbf16>
    %c0_2 = arith.constant 0 : index
    %c0_3 = arith.constant 0 : index
    %4 = vector.load %arg8[%c0_2, %c0_3] : memref<48x256xf32, #tpu.memory_space<vmem>>, vector<48x256xf32>
    %c0_4 = arith.constant 0 : index
    %c0_5 = arith.constant 0 : index
    %5 = vector.load %arg4[%c0_4, %c0_5] : memref<512x256xbf16, #tpu.memory_space<vmem>>, vector<512x256xbf16>
    %cst = arith.constant dense<0.000000e+00> : vector<48x256xf32>
    %6 = tpu.matmul %3, %5, %cst {dimension_numbers = #tpu.dot_dimension_numbers<[1], [0], [0], [1], [0, 0, 1, 1], [], []>} : vector<48x512xbf16>, vector<512x256xbf16>, vector<48x256xf32> -> vector<48x256xf32>
    %7 = arith.addf %4, %6 : vector<48x256xf32>
    %c0_6 = arith.constant 0 : index
    %c0_7 = arith.constant 0 : index
    %8 = vector.load %arg8[%c0_6, %c0_7] : memref<48x256xf32, #tpu.memory_space<vmem>>, vector<48x256xf32>
    tpu.vector_store %arg8[%c0_6, %c0_7], %7 {strides = array<i32>} : memref<48x256xf32, #tpu.memory_space<vmem>>, vector<48x256xf32>,
    %c1_i32 = arith.constant 1 : i32
    %9 = arith.cmpi eq, %arg2, %c1_i32 : i32
    %10 = arith.extui %9 : i1 to i32
    %c0_i32_8 = arith.constant 0 : i32
    %11 = arith.cmpi ne, %10, %c0_i32_8 : i32
    scf.if %11 {
      %c0_9 = arith.constant 0 : index
      %c0_10 = arith.constant 0 : index
      %12 = vector.load %arg8[%c0_9, %c0_10] : memref<48x256xf32, #tpu.memory_space<vmem>>, vector<48x256xf32>
      %c0_11 = arith.constant 0 : index
      %c0_12 = arith.constant 0 : index
      %13 = vector.load %arg5[%c0_11, %c0_12] : memref<1x256xf32, #tpu.memory_space<vmem>>, vector<1x256xf32>
      %14 = vector.broadcast %13 : vector<1x256xf32> to vector<48x256xf32>
      %15 = arith.addf %12, %14 : vector<48x256xf32>
      %c0_13 = arith.constant 0 : index
      %c0_14 = arith.constant 0 : index
      %16 = vector.load %arg6[%c0_13, %c0_14] : memref<48x256xf32, #tpu.memory_space<vmem>>, vector<48x256xf32>
      %17 = arith.addf %15, %16 : vector<48x256xf32>
      %c0_15 = arith.constant 0 : index
      %c0_16 = arith.constant 0 : index
      %18 = vector.load %arg7[%c0_15, %c0_16] : memref<48x256xf32, #tpu.memory_space<vmem>>, vector<48x256xf32>
      tpu.vector_store %arg7[%c0_15, %c0_16], %17 {strides = array<i32>} : memref<48x256xf32, #tpu.memory_space<vmem>>, vector<48x256xf32>,
    } else {
    }
    return
  }
  func.func @transform_0(%arg0: i32, %arg1: i32, %arg2: i32) -> (i32, i32) {
    %c0_i32 = arith.constant 0 : i32
    return %arg0, %arg2 : i32, i32
  }
  func.func @transform_1(%arg0: i32, %arg1: i32, %arg2: i32) -> (i32, i32) {
    %c0_i32 = arith.constant 0 : i32
    return %arg2, %arg1 : i32, i32
  }
  func.func @transform_2(%arg0: i32, %arg1: i32, %arg2: i32) -> (i32, i32) {
    %c0_i32 = arith.constant 0 : i32
    %c0_i32_0 = arith.constant 0 : i32
    return %c0_i32, %arg1 : i32, i32
  }
  func.func @transform_3(%arg0: i32, %arg1: i32, %arg2: i32) -> (i32, i32) {
    %c0_i32 = arith.constant 0 : i32
    return %arg0, %arg1 : i32, i32
  }
  func.func @transform_4(%arg0: i32, %arg1: i32, %arg2: i32) -> (i32, i32) {
    %c0_i32 = arith.constant 0 : i32
    return %arg0, %arg1 : i32, i32
  }
}

module attributes {stable_mosaic.version = 11 : i64} {
  func.func @_layernorm_kernel(%arg0: i32, %arg1: memref<48x256xf32, #tpu.memory_space<vmem>>, %arg2: memref<1x256xf32, #tpu.memory_space<vmem>>, %arg3: memref<1x256xf32, #tpu.memory_space<vmem>>, %arg4: memref<48x256xf32, #tpu.memory_space<vmem>>) attributes {dimension_semantics = [#tpu.dimension_semantics<parallel>], iteration_bounds = array<i64: 1>, scalar_prefetch = 0 : i64, scratch_operands = 0 : i64, tpu.core_type = #tpu.core_type<tc>, window_params = [{transform_indices = @transform_0, window_bounds = array<i64: 48, 256>}, {pipeline_mode = #tpu.pipeline_mode<synchronous>, transform_indices = @transform_1, window_bounds = array<i64: 1, 256>}, {pipeline_mode = #tpu.pipeline_mode<synchronous>, transform_indices = @transform_2, window_bounds = array<i64: 1, 256>}, {transform_indices = @transform_3, window_bounds = array<i64: 48, 256>}]} {
    %c0 = arith.constant 0 : index
    %c0_0 = arith.constant 0 : index
    %0 = vector.load %arg1[%c0, %c0_0] : memref<48x256xf32, #tpu.memory_space<vmem>>, vector<48x256xf32>
    %cst = arith.constant dense<0.000000e+00> : vector<48xf32>
    %1 = vector.multi_reduction <add>, %0, %cst [1] : vector<48x256xf32> to vector<48xf32>
    %2 = vector.shape_cast %1 : vector<48xf32> to vector<48x1xf32>
    %cst_1 = arith.constant 2.560000e+02 : f32
    %3 = vector.broadcast %cst_1 : f32 to vector<48x1xf32>
    %4 = arith.divf %2, %3 : vector<48x1xf32>
    %5 = vector.broadcast %4 : vector<48x1xf32> to vector<48x256xf32>
    %6 = arith.subf %0, %5 : vector<48x256xf32>
    %7 = arith.mulf %6, %6 : vector<48x256xf32>
    %cst_2 = arith.constant dense<0.000000e+00> : vector<48xf32>
    %8 = vector.multi_reduction <add>, %7, %cst_2 [1] : vector<48x256xf32> to vector<48xf32>
    %9 = vector.shape_cast %8 : vector<48xf32> to vector<48x1xf32>
    %cst_3 = arith.constant 2.560000e+02 : f32
    %10 = vector.broadcast %cst_3 : f32 to vector<48x1xf32>
    %11 = arith.divf %9, %10 : vector<48x1xf32>
    %12 = vector.broadcast %4 : vector<48x1xf32> to vector<48x256xf32>
    %13 = arith.subf %0, %12 : vector<48x256xf32>
    %cst_4 = arith.constant 9.99999997E-7 : f32
    %14 = vector.broadcast %cst_4 : f32 to vector<48x1xf32>
    %15 = arith.addf %11, %14 : vector<48x1xf32>
    %16 = math.rsqrt %15 : vector<48x1xf32>
    %17 = vector.broadcast %16 : vector<48x1xf32> to vector<48x256xf32>
    %18 = arith.mulf %13, %17 : vector<48x256xf32>
    %c0_5 = arith.constant 0 : index
    %c0_6 = arith.constant 0 : index
    %19 = vector.load %arg2[%c0_5, %c0_6] : memref<1x256xf32, #tpu.memory_space<vmem>>, vector<1x256xf32>
    %20 = vector.broadcast %19 : vector<1x256xf32> to vector<48x256xf32>
    %21 = arith.mulf %18, %20 : vector<48x256xf32>
    %c0_7 = arith.constant 0 : index
    %c0_8 = arith.constant 0 : index
    %22 = vector.load %arg3[%c0_7, %c0_8] : memref<1x256xf32, #tpu.memory_space<vmem>>, vector<1x256xf32>
    %23 = vector.broadcast %22 : vector<1x256xf32> to vector<48x256xf32>
    %24 = arith.addf %21, %23 : vector<48x256xf32>
    %c0_9 = arith.constant 0 : index
    %c0_10 = arith.constant 0 : index
    %25 = vector.load %arg4[%c0_9, %c0_10] : memref<48x256xf32, #tpu.memory_space<vmem>>, vector<48x256xf32>
    tpu.vector_store %arg4[%c0_9, %c0_10], %24 {strides = array<i32>} : memref<48x256xf32, #tpu.memory_space<vmem>>, vector<48x256xf32>,
    return
  }
  func.func @transform_0(%arg0: i32) -> (i32, i32) {
    %c0_i32 = arith.constant 0 : i32
    %c0_i32_0 = arith.constant 0 : i32
    return %arg0, %c0_i32 : i32, i32
  }
  func.func @transform_1(%arg0: i32) -> (i32, i32) {
    %c0_i32 = arith.constant 0 : i32
    %c0_i32_0 = arith.constant 0 : i32
    %c0_i32_1 = arith.constant 0 : i32
    return %c0_i32, %c0_i32_0 : i32, i32
  }
  func.func @transform_2(%arg0: i32) -> (i32, i32) {
    %c0_i32 = arith.constant 0 : i32
    %c0_i32_0 = arith.constant 0 : i32
    %c0_i32_1 = arith.constant 0 : i32
    return %c0_i32, %c0_i32_0 : i32, i32
  }
  func.func @transform_3(%arg0: i32) -> (i32, i32) {
    %c0_i32 = arith.constant 0 : i32
    %c0_i32_0 = arith.constant 0 : i32
    return %arg0, %c0_i32 : i32, i32
  }
}

</mosaic_0001>

<bundles_post_ra>
// kernel: _lambda_.12
= control target key start
LH: loop header
LB: loop body
LE: loop exit
PB: predicated region body
PF: predicated region fallthrough
CT: control target
= control target key end

     0   :  { %s523_s18 = smov 0   ;;  %s605_s0 = inlined_call_operand.vmem [shape: f32[32,48], index: 0, kind: input, shape index: {}]   ;;  %s606_s1 = inlined_call_operand.vmem [shape: bf16[48,256], index: 1, kind: input, shape index: {}]   ;;  %s607_s2 = inlined_call_operand.vmem [shape: f32[1,256], index: 2, kind: input, shape index: {}]   ;;  %s608_s3 = inlined_call_operand.vmem [shape: f32[1,256], index: 3, kind: input, shape index: {}]   ;;  %s609_s4 = inlined_call_operand.vmem [shape: f32[24,256], index: 4, kind: input, shape index: {}]   ;;  %s610_s5 = inlined_call_operand.vmem [shape: f32[2,24,256], index: 5, kind: output, shape index: {}]  }
   0x1 LB: > { %s529_s19 = sadd.s32 4294967295, %s489_s18   ;;  %p450_p0 = scmp.ge.s32.totalorder %s489_s18, 1  ;;  %s489_s18 = sphi %s523_s18, %s15_s18  }
   0x2   : > { %p188_p1 = scmp.lt.s32.totalorder %s489_s18, 3 }
   0x4   : > { %p189_p2 = pnand %p450_p0, %p188_p1 }
   0x5   : > { %v474_v0 = vld [vmem:[%s606_s1 + $0x4] ss:$8 sps:$4 sm:$0xff] (!%p189_p2)   ;;  %s451_s22 = sshll.u32 (!%p189_p2), %s529_s19, 1  ;;  %v476_v1 = vld [vmem:[%s606_s1] ss:$8 sps:$4 sm:$0xff] (!%p189_p2)   ;;  %v491_v2 = vmov (!%p189_p2), 0   ;;  %v239_v10 = vlaneseq (!%p189_p2) }
   0x6   : > { %192 = sbr.rel (%p189_p2) target bundleno = 242 (0xf2), region = 40  ;;  %315 = vmatprep.mubr.bf16.mxu0 (!%p189_p2), %v491_v2  ;;  %p217_p3 = scmp.lt.s32.totalorder (!%p189_p2), %s451_s22, 3  ;;  %283 = vmatprep.subr.bf16.mxu0 (!%p189_p2), %v474_v0  ;;  %v477_v3 = vld [vmem:[%s606_s1 + $0x14] ss:$8 sps:$4 sm:$0xff] (!%p189_p2)   ;;  %v479_v4 = vld [vmem:[%s606_s1 + $0x10] ss:$8 sps:$4 sm:$0xff] (!%p189_p2)  }
   0x7   : > { %284 = vmatpush1.bf16.msra.mxu0 (!%p189_p2), %v476_v1  ;;  %v480_v5 = vld [vmem:[%s606_s1 + $0x24] ss:$8 sps:$4 sm:$0xff] (!%p189_p2)   ;;  %v482_v6 = vld [vmem:[%s606_s1 + $0x20] ss:$8 sps:$4 sm:$0xff] (!%p189_p2)   ;;  %vm279_vm0 = vcmask (!%p189_p2), 392192   ;;  %p222_p4 = scmp.lt.s32.totalorder (!%p189_p2), %s529_s19, 1 }
   0x8   : > { %285 = vmatprep.subr.bf16.mxu0 (!%p189_p2), %v477_v3  ;;  %v326_v11 = vld [vmem:[%s608_s3] sm:$0x3] (!%p189_p2)  ;;  %vm331_vm1 = vcmp.lt.s32.totalorder (!%p189_p2), %v239_v10, 256  ;;  %v492_v14 = vmov (!%p189_p2), 0.0   ;;  %v240_v15 = vshrl.u32 (!%p189_p2), %v239_v10, 7  ;;  %v337_v18 = vld [vmem:[%s609_s4 + $0x10] sm:$0xff] (!%p189_p2) }
   0x9   : > { %v327_v12 = vld [vmem:[%s609_s4] ss:$8 sm:$0x3] (!%p189_p2)  ;;  %v335_v17 = vld [vmem:[%s609_s4] sm:$0xfe] (!%p189_p2)  ;;  %v338_v22 = vld [vmem:[%s609_s4 + $0x18] sm:$0xff] (!%p189_p2) }
   0xa   : > { %v328_v13 = vadd.f32 (!%p189_p2), %v327_v12, %v326_v11  ;;  %v241_v16 = vsub.s32 (!%p189_p2), 0, %v240_v15  ;;  %v237_v19 = vld [vmem:[%s607_s2] sm:$0x3] (!%p189_p2)  ;;  %v245_v20 = vsub.s32 (!%p189_p2), 1, %v240_v15  ;;  %v336_v21 = vld [vmem:[%s609_s4 + $0x8] sm:$0xfe] (!%p189_p2) }
   0xb   : > { %286 = vmatpush1.bf16.msra.mxu0 (!%p189_p2), %v479_v4  ;;  %v339_v23 = vld [vmem:[%s609_s4 + $0x20] sm:$0x1] (!%p189_p2)  ;;  %v348_v24 = vrot.slane (!%p189_p2), %v335_v17, 1  ;;  %v349_v25 = vrot.slane (!%p189_p2), %v337_v18, 1  ;;  %v340_v26 = vld [vmem:[%s609_s4 + $0x28] sm:$0x1] (!%p189_p2) }
   0xc   : > { %287 = vmatprep.subr.bf16.mxu0 (!%p189_p2), %v480_v5  ;;  %v242_v27 = vrot.slane (!%p189_p2), %v237_v19, %v241_v16  ;;  %vm347_vm2 = vcmask (!%p189_p2), 1046528   ;;  %v351_v28 = vrot.slane (!%p189_p2), %v336_v21, 1  ;;  %v352_v29 = vrot.slane (!%p189_p2), %v338_v22, 1 }
   0xd   : > { %s612_s22 = smov (!%p217_p3, %s451_s22), 3  ;;  %s614_s19 = smov (!%p222_p4, %s529_s19), 1  ;;  %v246_v30 = vrot.slane %v237_v19, %v245_v20  ;;  %v354_v31 = vrot.slane %v339_v23, 1  ;;  %v356_v32 = vrot.slane %v340_v26, 1  ;;  %v350_v34 = vsel %vm347_vm2, %v348_v24, %v349_v25 }
   0xe   : > { %s452_s6 = sshll.u32 %s612_s22, 3  ;;  %s463_s12 = smul.u32 48, %s614_s19  ;;  %v353_v37 = vsel %vm347_vm2, %v351_v28, %v352_v29  ;;  %vm370_vm3 = vcmask 1040384  }
   0xf   : > { %s220_s9 = scalar_lea.vmem %s605_s0, %s452_s6  ;;  %288 = vmatpush1.bf16.msra.mxu0 %v482_v6  ;;  %v355_v40 = vsel %vm347_vm2, %v349_v25, %v354_v31  ;;  %v357_v44 = vsel %vm347_vm2, %v352_v29, %v356_v32 }
  0x10   : > { %v228_v7 = vld [vmem:[%s220_s9] sm:$0xff]  ;;  %v229_v8 = vld [vmem:[%s220_s9 + $0x8] sm:$0xff]  ;;  %s566_s21 = scalar_lea.vmem %s610_s5, %s463_s12 }
  0x11   : > { %v230_v9 = vpack.c.bf16 %v229_v8, %v228_v7  ;;  %333 = vst.msk [vmem:[%s566_s21] ss:$8 sm:$0x3] %vm331_vm1, %v328_v13  ;;  %389 = vst [vmem:[%s566_s21 + $0x20] sm:$0xfe] %v492_v14 }
  0x12   : > { %390 = vst [vmem:[%s566_s21 + $0x28] sm:$0xfe] %v492_v14 }
  0x13   : > { %460 = vmatmul.mubr.msk.bf16.vlgmr.msra.gmra.mrb[0].mxu0 %vm279_vm0, %v230_v9 }
  0xe6   : > { %v317_v33 = vpop.f32.mrb[0].mxu0 }
  0xe7   : > { %v318_v35 = vadd.f32 %v317_v33, %v242_v27  ;;  %v319_v36 = vpop.f32.mrb[1].mxu0 }
  0xe8   : > { %v320_v38 = vadd.f32 %v319_v36, %v246_v30  ;;  %v321_v39 = vpop.f32.mrb[2].mxu0 }
  0xe9   : > { %v362_v41 = vadd.f32 %v350_v34, %v318_v35  ;;  %v322_v42 = vadd.f32 %v321_v39, %v242_v27  ;;  %v323_v43 = vpop.f32.mrb[3].mxu0 }
  0xea   : > { %v363_v45 = vadd.f32 %v353_v37, %v320_v38  ;;  %v324_v46 = vadd.f32 %v323_v43, %v246_v30 }
  0xeb   : > { %v371_v47 = vrot.slane %v362_v41, 7  ;;  %v364_v48 = vadd.f32 %v355_v40, %v322_v42 }
  0xec   : > { %v372_v49 = vrot.slane %v363_v45, 7  ;;  %v365_v50 = vadd.f32 %v357_v44, %v324_v46 }
  0xed   : > { %383 = vst [vmem:[%s566_s21] sm:$0xfe] %v371_v47  ;;  %v373_v51 = vrot.slane %v364_v48, 7 }
  0xee   : > { %384 = vst [vmem:[%s566_s21 + $0x8] sm:$0xfe] %v372_v49  ;;  %v375_v52 = vrot.slane %v365_v50, 7 }
  0xef   : > { %v374_v53 = vsel %vm370_vm3, %v371_v47, %v373_v51  ;;  %387 = vst [vmem:[%s566_s21 + $0x20] sm:$0x1] %v373_v51 }
  0xf0   : > { %385 = vst [vmem:[%s566_s21 + $0x10] sm:$0xff] %v374_v53  ;;  %v376_v54 = vsel %vm370_vm3, %v372_v49, %v375_v52  ;;  %388 = vst [vmem:[%s566_s21 + $0x28] sm:$0x1] %v375_v52 }
  0xf1   : > { %386 = vst [vmem:[%s566_s21 + $0x18] sm:$0xff] %v376_v54 }
  0xf2 PF: > { %s15_s18 = sadd.s32 1, %s489_s18  }
  0xf3   : > { %p12_p5 = scmp.ge.s32.totalorder %s15_s18, 4  }
  0xf5   :  { %14 = sbr.rel (!%p12_p5) target bundleno = 1 (0x1), region = 70 }

// kernel: _lambda_.14
= control target key start
LH: loop header
LB: loop body
LE: loop exit
PB: predicated region body
PF: predicated region fallthrough
CT: control target
= control target key end

     0   :  { %s712_s6 = smov 0   ;;  %s714_s7 = smov 0   ;;  %s827_s0 = inlined_call_operand.vmem [shape: bf16[2,24,768], index: 0, kind: input, shape index: {}]   ;;  %s828_s1 = inlined_call_operand.vmem [shape: bf16[2,24,256], index: 1, kind: output, shape index: {}]  }
   0x1   :  { %s716_s8 = smov 0   ;;  %s718_s9 = smov 0  }
   0x2   :  { %s720_s10 = smov 0   ;;  %s722_s11 = smov 0  }
   0x3   :  { %s724_s12 = smov 0  }
   0x4 LB: > { %s20_s13 = sadd.s32 1, %s691_s10  ;;  %s23_s14 = sadd.s32 1, %s695_s11  ;;  %s699_s12 = sphi %s724_s12, %s11_s12   ;;  %s695_s11 = sphi %s722_s11, %s835_s11   ;;  %s691_s10 = sphi %s720_s10, %s834_s10   ;;  %s687_s9 = sphi %s718_s9, %s833_s9   ;;  %s683_s8 = sphi %s716_s8, %s832_s8   ;;  %s679_s7 = sphi %s714_s7, %s831_s7   ;;  %s675_s6 = sphi %s712_s6, %s830_s6  }
   0x5   : > { %p21_p0 = scmp.ge.s32.totalorder %s20_s13, 2  ;;  %s505_s15 = sadd.s32 4294967295, %s699_s12  }
   0x6   : > { %p39_p1 = scmp.ne.s32.totalorder %s679_s7, %s675_s6  ;;  %p40_p2 = scmp.eq.s32.totalorder %s699_s12, 0 }
   0x7   : > { %s837_s13 = smov (%p21_p0, %s20_s13), 0  ;;  %s839_s14 = smov (!%p21_p0, %s23_s14), %s695_s11 }
   0x8   : > { %p25_p3 = scmp.ge.s32.totalorder %s839_s14, 2  ;;  %p71_p4 = scmp.eq.s32.totalorder %s505_s15, 3 }
   0x9   : > { %s28_s16 = ssub.s32 %s691_s10, %s837_s13  ;;  %p41_p5 = por %p40_p2, %p39_p1 }
   0xa   : > { %s841_s14 = smov (%p25_p3, %s839_s14), 0  ;;  %p760_p6 = por %p71_p4, %p39_p1 }
   0xb   : > { %s27_s18 = ssub.s32 %s695_s11, %s841_s14  ;;  %s32_s20 = sadd.s32 1, %s679_s7 }
   0xc   : > { %s29_s19 = sor.u32 %s28_s16, %s27_s18  ;;  %p508_p8 = scmp.ge.s32.totalorder %s699_s12, 4 }
   0xd   : > { %p30_p7 = scmp.eq.s32.totalorder %s29_s19, 0 }
   0xe   : > { %93 = sbr.rel (%p508_p8) target bundleno = 33 (0x21), region = 16 }
   0xf   : > { %s768_s21 = scalar_select %p30_p7, %s679_s7, %s32_s20  }
  0x15   : > { %96 = sbr.rel (!%p41_p5) target bundleno = 33 (0x21), region = 20  ;;  %s98_s22 = sand.u32 (%p41_p5), 1, %s679_s7  }
  0x16   : > { %s101_s23 = smul.u32 (%p41_p5), 3, %s691_s10 }
  0x17   : > { %s564_s24 = smul.u32 (%p41_p5), 36, %s98_s22 }
  0x18   : > { %s565_s25 = smul.u32 (%p41_p5), 18, %s695_s11 }
  0x19   : > { %s100_s2 = scalar_lea.vmem (%p41_p5), [#allocation2], %s564_s24 }
  0x1a   : > { %s103_s26 = sadd.s32 (%p41_p5), %s565_s25, %s101_s23 }
  0x1b   : > { %s509_s27 = sshll.u32 (%p41_p5), %s103_s26, 2 }
  0x1c   : > { %s105_s30 = scalar_lea.vmem %s827_s0, %s509_s27 }
  0x1d   : > { %v120_v0 = vld [vmem:[%s105_s30] sm:$0xff]  ;;  %v122_v1 = vld [vmem:[%s105_s30 + $0x18] sm:$0xff]  ;;  %v124_v2 = vld [vmem:[%s105_s30 + $0x30] sm:$0xff] }
  0x1e   : > { %121 = vst [vmem:[%s100_s2] sm:$0xff] %v120_v0  ;;  %123 = vst [vmem:[%s100_s2 + $0xc] sm:$0xff] %v122_v1  ;;  %v510_v3 = vld [vmem:[%s105_s30 + $0x8] sm:$0xf]  ;;  %v512_v4 = vld [vmem:[%s105_s30 + $0x20] sm:$0xf] }
  0x1f   : > { %125 = vst [vmem:[%s100_s2 + $0x18] sm:$0xff] %v124_v2  ;;  %v514_v5 = vld [vmem:[%s105_s30 + $0x38] sm:$0xf]  ;;  %511 = vst [vmem:[%s100_s2 + $0x8] sm:$0xf] %v510_v3 }
  0x20   : > { %513 = vst [vmem:[%s100_s2 + $0x14] sm:$0xf] %v512_v4  ;;  %515 = vst [vmem:[%s100_s2 + $0x20] sm:$0xf] %v514_v5 }
  0x21 PF: > { %p516_p9 = scmp.ge.s32.totalorder %s699_s12, 1  ;;  %p143_p10 = scmp.lt.s32.totalorder %s699_s12, 5 }
  0x23   : > { %p144_p11 = pnand %p516_p9, %p143_p10 }
  0x24   : > { %s150_s3 = sand.u32 (!%p144_p11), 1, %s675_s6   ;;  %v244_v11 = vlaneseq (!%p144_p11)  ;;  %v701_v14 = vmov (!%p144_p11), -1e+30   ;;  %vm251_vm1 = vcmask (!%p144_p11), 195584   ;;  %vm296_vm2 = vcmask (!%p144_p11), 1043456  }
  0x25   : > { %147 = sbr.rel (%p144_p11) target bundleno = 668 (0x29c), region = 46 }
  0x26   : > { %s566_s4 = smul.u32 (!%p144_p11), 36, %s150_s3  ;;  %v245_v12 = vand.u32 (!%p144_p11), 127, %v244_v11 }
  0x27   : > { %s567_s15 = smul.u32 (!%p144_p11), 12, %s150_s3 }
  0x28   : > { %s782_s5 = scalar_lea.vmem (!%p144_p11), [#allocation2], %s566_s4  ;;  %vm246_vm0 = vcmp.lt.s32.totalorder (!%p144_p11), %v245_v12, 17 }
  0x29   : > { %v626_v6 = vld [vmem:[%s782_s5 + $0x4] ss:$12 sps:$4 sm:$0xff] (!%p144_p11)   ;;  %v174_v7 = vld [vmem:[%s782_s5 + $0x18] sm:$0xff] (!%p144_p11)  ;;  %v629_v8 = vld [vmem:[%s782_s5] ss:$12 sps:$4 sm:$0xff] (!%p144_p11)   ;;  %v247_v15 = vsel (!%p144_p11), %vm246_vm0, 0.0, %v701_v14 }
  0x2a   : > { %547 = vmatprep.subr.bf16.mxu0 (!%p144_p11), %v626_v6  ;;  %v520_v9 = vcombine.high (!%p144_p11), %v174_v7, %v174_v7  ;;  %551 = vmatprep.mubr.bf16.mxu0 (!%p144_p11), %v629_v8  ;;  %v518_v10 = vcombine.low (!%p144_p11), %v174_v7, %v174_v7  ;;  %v631_v28 = vld [vmem:[%s782_s5 + $0x8] ss:$12 sps:$4 sm:$0xff] (!%p144_p11)   ;;  %v632_v29 = vld [vmem:[%s782_s5 + $0x20] ss:$0 sps:$4 sm:$0xff] (!%p144_p11)   ;;  %s167_s16 = scalar_lea.vmem (!%p144_p11), [#allocation3], %s567_s15 }
  0x2b   : > { %548 = vmatpush3.bf16.xpose.msra.mxu0 (!%p144_p11), %v626_v6  ;;  %555 = vmatprep.subr.bf16.mxu1 (!%p144_p11), %v631_v28  ;;  %v298_v30 = vsel (!%p144_p11), %vm296_vm2, %v632_v29, 0 }
  0x2c   : > { %549 = vmatprep.subr.bf16.mxu0 %v520_v9  ;;  %556 = vmatpush3.bf16.msra.mxu1 %v631_v28  ;;  %s568_s6 = smul.u32 (%p760_p6), 6, %s687_s9 }
  0x2d   : > { %563 = vmatprep.subr.msk.bf16.mxu1 %vm296_vm2, %v632_v29 }
  0x2e   : > { %s378_s18 = sadd.s32 (%p760_p6), %s683_s8, %s568_s6 }
  0x2f   : > { %s528_s19 = sshll.u32 (%p760_p6), %s378_s18, 2 }
  0x30   : > { %558 = vmatpush3.bf16.msra.mxu1 %v298_v30  ;;  %s380_s23 = scalar_lea.vmem (%p760_p6), %s828_s1, %s528_s19 }
  0x33   : > { %550 = vmatpush3.bf16.xpose.msra.mxu0 %v520_v9 }
  0x3a   : > { %552 = vmatmul.mubr.bf16.vlgmr.msra.gmra.mrb[0].mxu0 %v518_v10 }
 0x10d   : > { %v553_v13 = vpop.f32.mrb[0].mxu0 }
 0x10e   : > { %v243_v16 = vmul.f32 0.088388346, %v553_v13  ;;  %v227_v17 = vpop.f32.mrb[1].mxu0 }
 0x10f   : > { %v241_v18 = vmul.f32 0.088388346, %v227_v17  ;;  %v554_v19 = vpop.f32.mrb[2].mxu0 }
 0x110   : > { %v230_v20 = vpop.f32.mrb[3].mxu0  ;;  %v250_v21 = vadd.f32 %v247_v15, %v243_v16 }
 0x111   : > { %v242_v22 = vmul.f32 0.088388346, %v230_v20  ;;  %v248_v23 = vadd.f32 %v247_v15, %v241_v18 }
 0x112   : > { %v258_v24 = vsel %vm251_vm1, %v250_v21, -inf }
 0x113   : > { %v249_v25 = vadd.f32 %v247_v15, %v242_v22  ;;  %259 = vmax.xlane.f32.xlu1 %v258_v24  ;;  %v252_v26 = vsel %vm251_vm1, %v248_v23, -inf }
 0x114   : > { %253 = vmax.xlane.f32.xlu0 %v252_v26 }
 0x115   : > { %v255_v27 = vsel %vm251_vm1, %v249_v25, -inf }
 0x118   : > { %256 = vmax.xlane.f32.xlu0 %v255_v27 }
 0x1a0   : > { %v260_v31 = vpop.xlane.xlu1 %259 }
 0x1a1   : > { %v263_v32 = vsub.f32 %v250_v21, %v260_v31  ;;  %v254_v33 = vpop.xlane.xlu0 %253 }
 0x1a2   : > { %v261_v34 = vsub.f32 %v248_v23, %v254_v33 }
 0x1a3   : > { %v268_v35 = vmul.f32 1.442695, %v263_v32 }
 0x1a4   : > { %v264_v36 = vmul.f32 1.442695, %v261_v34 }
 0x1a5   : > { %v257_v37 = vpop.xlane.xlu0 %256 }
 0x1a6   : > { %633 = vpow2.f32 %v264_v36  ;;  %v262_v38 = vsub.f32 %v249_v25, %v257_v37 }
 0x1a7   : > { %635 = vpow2.f32 %v268_v35 }
 0x1a8   : > { %v266_v39 = vmul.f32 1.442695, %v262_v38 }
 0x1aa   : > { %637 = vpow2.f32 %v266_v39 }
 0x1b0   : > { %v634_v40 = vpop.eup %633 }
 0x1b1   : > { %v270_v41 = vsel %vm251_vm1, %v634_v40, 0.0  ;;  %v636_v42 = vpop.eup %635 }
 0x1b2   : > { %271 = vadd.xlane.f32.xlu1 %v270_v41  ;;  %v276_v44 = vsel %vm251_vm1, %v636_v42, 0.0  ;;  %v280_v47 = vpack.c.bf16 %v636_v42, %v636_v42 }
 0x1b4   : > { %v638_v43 = vpop.eup %637 }
 0x1b5   : > { %v273_v45 = vsel %vm251_vm1, %v638_v43, 0.0  ;;  %v279_v46 = vpack.c.bf16 %v638_v43, %v634_v40 }
 0x1b6   : > { %277 = vadd.xlane.f32.xlu1 %v276_v44  ;;  %274 = vadd.xlane.f32.xlu0 %v273_v45 }
 0x1b7   : > { %559 = vmatprep.mubr.msk.bf16.mxu1 %vm251_vm1, %v279_v46 }
 0x1b8   : > { %560 = vmatmul.mubr.msk.bf16.vlgmr.msra.gmra.mrb[0].mxu1 %vm251_vm1, %v280_v47 }
 0x23f   : > { %v272_v48 = vpop.xlane.xlu1 %271 }
 0x243   : > { %v278_v49 = vpop.xlane.xlu1 %277  ;;  %v275_v50 = vpop.xlane.xlu0 %274 }
 0x244   : > { %639 = vrcp.f32 %v278_v49 }
 0x245   : > { %641 = vrcp.f32 %v272_v48 }
 0x246   : > { %643 = vrcp.f32 %v275_v50 }
 0x24e   : > { %v640_v51 = vpop.eup %639 }
 0x24f   : > { %v642_v55 = vpop.eup %641 }
 0x250   : > { %v644_v57 = vpop.eup %643 }
 0x28b   : > { %v561_v52 = vpop.f32.mrb[0].mxu1 }
 0x28c   : > { %v353_v53 = vmul.f32 %v640_v51, %v561_v52  ;;  %v334_v54 = vpop.f32.mrb[1].mxu1 }
 0x28d   : > { %v562_v56 = vpop.f32.mrb[2].mxu1  ;;  %v351_v60 = vmul.f32 %v642_v55, %v334_v54  ;;  %376 = sbr.rel (!%p760_p6) target bundleno = 668 (0x29c), region = 54 }
 0x28e   : > { %v533_v58 = vpack.c.bf16 %v353_v53, %v353_v53  ;;  %v337_v59 = vpop.f32.mrb[3].mxu1 }
 0x28f   : > { %v352_v61 = vmul.f32 %v644_v57, %v337_v59 }
 0x290   : > { %369 = vst [vmem:[%s167_s16 + $0x8] sm:$0xf] %v533_v58 }
 0x291   : > { %v537_v62 = vpack.c.bf16 %v352_v61, %v351_v60 }
 0x293   : > { %538 = vst [vmem:[%s167_s16] sm:$0xff] %v537_v62  }
 0x297   : > { %v400_v1 = vld [vmem:[%s167_s16 + $0x8] sm:$0xf] }
 0x298   : > { %401 = vst [vmem:[%s380_s23 + $0x10] sm:$0xf] %v400_v1 }
 0x29a   : > { %v396_v63 = vld [vmem:[%s167_s16] sm:$0xf]  ;;  %v398_v0 = vld [vmem:[%s167_s16 + $0x4] sm:$0xf] }
 0x29b   : > { %397 = vst [vmem:[%s380_s23] sm:$0xf] %v396_v63  ;;  %399 = vst [vmem:[%s380_s23 + $0x8] sm:$0xf] %v398_v0 }
 0x29c PF: > { %s11_s12 = sadd.s32 1, %s699_s12   ;;  %s830_s6 = smov %s679_s7 }
 0x29d   : > { %p8_p12 = scmp.ge.s32.totalorder %s11_s12, 6   ;;  %s831_s7 = smov %s768_s21 }
 0x29e   : > { %s832_s8 = smov %s691_s10  ;;  %s833_s9 = smov %s695_s11 }
 0x29f   : > { %s834_s10 = smov %s837_s13  ;;  %s835_s11 = smov %s841_s14 }
 0x2a0   :  { %10 = sbr.rel (!%p8_p12) target bundleno = 4 (0x4), region = 132 }

// kernel: _lambda_.13
= control target key start
LH: loop header
LB: loop body
LE: loop exit
PB: predicated region body
PF: predicated region fallthrough
CT: control target
= control target key end

     0   :  { %s1689_s18 = smov 0   ;;  %s1691_s19 = smov 0   ;;  %s2084_s0 = inlined_call_operand.vmem [shape: f32[48,256], index: 0, kind: input, shape index: {}]   ;;  %s2085_s1 = inlined_call_operand.vmem [shape: f32[1,256], index: 1, kind: input, shape index: {}]   ;;  %s2086_s2 = inlined_call_operand.vmem [shape: f32[1,256], index: 2, kind: input, shape index: {}]   ;;  %s2087_s3 = inlined_call_operand.vmem [shape: bf16[256,768], index: 3, kind: input, shape index: {}]   ;;  %s2088_s4 = inlined_call_operand.vmem [shape: f32[1,768], index: 4, kind: input, shape index: {}]   ;;  %s2089_s5 = inlined_call_operand.vmem [shape: bf16[48,768], index: 5, kind: output, shape index: {}]  }
   0x1   :  { %s1693_s20 = smov 0   ;;  %s1695_s21 = smov 0  }
   0x2   :  { %s1697_s22 = smov 0  }
   0x3 LB: > { %s24_s23 = sadd.s32 1, %s1653_s21  ;;  %s1305_s24 = sadd.s32 4294967295, %s1657_s22   ;;  %s1657_s22 = sphi %s1697_s22, %s15_s22   ;;  %s1653_s21 = sphi %s1695_s21, %s2094_s21   ;;  %s1649_s20 = sphi %s1693_s20, %s2093_s20   ;;  %s1645_s19 = sphi %s1691_s19, %s2092_s19   ;;  %s1641_s18 = sphi %s1689_s18, %s2091_s18  }
   0x4   : > { %p25_p0 = scmp.ge.s32.totalorder %s24_s23, 2  ;;  %p109_p1 = scmp.ne.s32.totalorder %s1645_s19, %s1641_s18 }
   0x5   : > { %p110_p2 = scmp.eq.s32.totalorder %s1657_s22, 0  ;;  %p167_p4 = scmp.eq.s32.totalorder %s1305_s24, 1 }
   0x6   : > { %s2096_s23 = smov (%p25_p0, %s24_s23), 0  ;;  %s102_s26 = sadd.s32 1, %s1645_s19 }
   0x7   : > { %p111_p3 = por %p110_p2, %p109_p1  ;;  %s99_s25 = ssub.s32 %s1653_s21, %s2096_s23 }
   0x8   : > { %p100_p5 = scmp.eq.s32.totalorder %s99_s25, 0  ;;  %p1724_p6 = por %p167_p4, %p109_p1 }
   0x9   : > { %p1309_p7 = scmp.ge.s32.totalorder %s1657_s22, 2 }
   0xa   : > { %s1729_s28 = scalar_select %p100_p5, %s1645_s19, %s102_s26  }
   0xb   : > { %205 = sbr.rel (%p1309_p7) target bundleno = 60 (0x3c), region = 28 }
  0x12   : > { %208 = sbr.rel (!%p111_p3) target bundleno = 60 (0x3c), region = 32  ;;  %s210_s29 = sand.u32 (%p111_p3), 1, %s1645_s19  }
  0x13   : > { %s1452_s30 = smul.u32 (%p111_p3), 12, %s1653_s21 }
  0x14   : > { %s1500_s6 = smul.u32 (%p111_p3), 384, %s210_s29 }
  0x15   : > { %s1737_s9 = scalar_lea.vmem (%p111_p3), %s2087_s3, %s1452_s30 }
  0x16   : > { %v230_v0 = vld [vmem:[%s1737_s9] sm:$0xff] (%p111_p3)  ;;  %v232_v1 = vld [vmem:[%s1737_s9 + $0x18] sm:$0xff] (%p111_p3)  ;;  %v234_v2 = vld [vmem:[%s1737_s9 + $0x30] sm:$0xff] (%p111_p3)  ;;  %s1742_s10 = scalar_lea.vmem (%p111_p3), [#allocation3], %s1500_s6 }
  0x17   : > { %231 = vst [vmem:[%s1742_s10] sm:$0xff] (%p111_p3), %v230_v0  ;;  %233 = vst [vmem:[%s1742_s10 + $0xc] sm:$0xff] (%p111_p3), %v232_v1  ;;  %v236_v3 = vld [vmem:[%s1737_s9 + $0x48] sm:$0xff] (%p111_p3)  ;;  %v238_v4 = vld [vmem:[%s1737_s9 + $0x60] sm:$0xff] (%p111_p3) }
  0x18   : > { %235 = vst [vmem:[%s1742_s10 + $0x18] sm:$0xff] (%p111_p3), %v234_v2  ;;  %v240_v5 = vld [vmem:[%s1737_s9 + $0x78] sm:$0xff] (%p111_p3)  ;;  %237 = vst [vmem:[%s1742_s10 + $0x24] sm:$0xff] (%p111_p3), %v236_v3  ;;  %v242_v6 = vld [vmem:[%s1737_s9 + $0x90] sm:$0xff] (%p111_p3) }
  0x19   : > { %239 = vst [vmem:[%s1742_s10 + $0x30] sm:$0xff] %v238_v4  ;;  %241 = vst [vmem:[%s1742_s10 + $0x3c] sm:$0xff] %v240_v5  ;;  %v244_v7 = vld [vmem:[%s1737_s9 + $0xa8] sm:$0xff]  ;;  %v246_v8 = vld [vmem:[%s1737_s9 + $0xc0] sm:$0xff] }
  0x1a   : > { %243 = vst [vmem:[%s1742_s10 + $0x48] sm:$0xff] %v242_v6  ;;  %245 = vst [vmem:[%s1742_s10 + $0x54] sm:$0xff] %v244_v7  ;;  %v248_v9 = vld [vmem:[%s1737_s9 + $0xd8] sm:$0xff]  ;;  %v250_v10 = vld [vmem:[%s1737_s9 + $0xf0] sm:$0xff] }
  0x1b   : > { %247 = vst [vmem:[%s1742_s10 + $0x60] sm:$0xff] %v246_v8  ;;  %v252_v11 = vld [vmem:[%s1737_s9 + $0x108] sm:$0xff]  ;;  %249 = vst [vmem:[%s1742_s10 + $0x6c] sm:$0xff] %v248_v9  ;;  %v254_v12 = vld [vmem:[%s1737_s9 + $0x120] sm:$0xff] }
  0x1c   : > { %251 = vst [vmem:[%s1742_s10 + $0x78] sm:$0xff] %v250_v10  ;;  %253 = vst [vmem:[%s1742_s10 + $0x84] sm:$0xff] %v252_v11  ;;  %v256_v13 = vld [vmem:[%s1737_s9 + $0x138] sm:$0xff]  ;;  %v258_v14 = vld [vmem:[%s1737_s9 + $0x150] sm:$0xff] }
  0x1d   : > { %255 = vst [vmem:[%s1742_s10 + $0x90] sm:$0xff] %v254_v12  ;;  %257 = vst [vmem:[%s1742_s10 + $0x9c] sm:$0xff] %v256_v13  ;;  %v260_v15 = vld [vmem:[%s1737_s9 + $0x168] sm:$0xff]  ;;  %v262_v16 = vld [vmem:[%s1737_s9 + $0x180] sm:$0xff] }
  0x1e   : > { %259 = vst [vmem:[%s1742_s10 + $0xa8] sm:$0xff] %v258_v14  ;;  %v264_v17 = vld [vmem:[%s1737_s9 + $0x198] sm:$0xff]  ;;  %261 = vst [vmem:[%s1742_s10 + $0xb4] sm:$0xff] %v260_v15  ;;  %v266_v18 = vld [vmem:[%s1737_s9 + $0x1b0] sm:$0xff] }
  0x1f   : > { %263 = vst [vmem:[%s1742_s10 + $0xc0] sm:$0xff] %v262_v16  ;;  %265 = vst [vmem:[%s1742_s10 + $0xcc] sm:$0xff] %v264_v17  ;;  %v268_v19 = vld [vmem:[%s1737_s9 + $0x1c8] sm:$0xff]  ;;  %v270_v20 = vld [vmem:[%s1737_s9 + $0x1e0] sm:$0xff] }
  0x20   : > { %267 = vst [vmem:[%s1742_s10 + $0xd8] sm:$0xff] %v266_v18  ;;  %269 = vst [vmem:[%s1742_s10 + $0xe4] sm:$0xff] %v268_v19  ;;  %v272_v21 = vld [vmem:[%s1737_s9 + $0x1f8] sm:$0xff]  ;;  %v274_v22 = vld [vmem:[%s1737_s9 + $0x210] sm:$0xff] }
  0x21   : > { %271 = vst [vmem:[%s1742_s10 + $0xf0] sm:$0xff] %v270_v20  ;;  %v276_v23 = vld [vmem:[%s1737_s9 + $0x228] sm:$0xff]  ;;  %273 = vst [vmem:[%s1742_s10 + $0xfc] sm:$0xff] %v272_v21  ;;  %v278_v24 = vld [vmem:[%s1737_s9 + $0x240] sm:$0xff] }
  0x22   : > { %275 = vst [vmem:[%s1742_s10 + $0x108] sm:$0xff] %v274_v22  ;;  %277 = vst [vmem:[%s1742_s10 + $0x114] sm:$0xff] %v276_v23  ;;  %v280_v25 = vld [vmem:[%s1737_s9 + $0x258] sm:$0xff]  ;;  %v282_v26 = vld [vmem:[%s1737_s9 + $0x270] sm:$0xff] }
  0x23   : > { %279 = vst [vmem:[%s1742_s10 + $0x120] sm:$0xff] %v278_v24  ;;  %281 = vst [vmem:[%s1742_s10 + $0x12c] sm:$0xff] %v280_v25  ;;  %v284_v27 = vld [vmem:[%s1737_s9 + $0x288] sm:$0xff]  ;;  %v286_v28 = vld [vmem:[%s1737_s9 + $0x2a0] sm:$0xff] }
  0x24   : > { %283 = vst [vmem:[%s1742_s10 + $0x138] sm:$0xff] %v282_v26  ;;  %v288_v29 = vld [vmem:[%s1737_s9 + $0x2b8] sm:$0xff]  ;;  %285 = vst [vmem:[%s1742_s10 + $0x144] sm:$0xff] %v284_v27  ;;  %v290_v30 = vld [vmem:[%s1737_s9 + $0x2d0] sm:$0xff] }
  0x25   : > { %287 = vst [vmem:[%s1742_s10 + $0x150] sm:$0xff] %v286_v28  ;;  %289 = vst [vmem:[%s1742_s10 + $0x15c] sm:$0xff] %v288_v29  ;;  %v292_v31 = vld [vmem:[%s1737_s9 + $0x2e8] sm:$0xff]  ;;  %v1313_v33 = vld [vmem:[%s1737_s9 + $0x20] sm:$0xf] }
  0x26   : > { %v1311_v32 = vld [vmem:[%s1737_s9 + $0x8] sm:$0xf]  ;;  %291 = vst [vmem:[%s1742_s10 + $0x168] sm:$0xff] %v290_v30  ;;  %293 = vst [vmem:[%s1742_s10 + $0x174] sm:$0xff] %v292_v31  ;;  %v1315_v34 = vld [vmem:[%s1737_s9 + $0x38] sm:$0xf] }
  0x27   : > { %1312 = vst [vmem:[%s1742_s10 + $0x8] sm:$0xf] %v1311_v32  ;;  %v1317_v35 = vld [vmem:[%s1737_s9 + $0x50] sm:$0xf]  ;;  %1314 = vst [vmem:[%s1742_s10 + $0x14] sm:$0xf] %v1313_v33 }
  0x28   : > { %1316 = vst [vmem:[%s1742_s10 + $0x20] sm:$0xf] %v1315_v34  ;;  %1318 = vst [vmem:[%s1742_s10 + $0x2c] sm:$0xf] %v1317_v35  ;;  %v1319_v36 = vld [vmem:[%s1737_s9 + $0x68] sm:$0xf] }
  0x29   : > { %v1321_v37 = vld [vmem:[%s1737_s9 + $0x80] sm:$0xf]  ;;  %v1323_v38 = vld [vmem:[%s1737_s9 + $0x98] sm:$0xf]  ;;  %1320 = vst [vmem:[%s1742_s10 + $0x38] sm:$0xf] %v1319_v36 }
  0x2a   : > { %1322 = vst [vmem:[%s1742_s10 + $0x44] sm:$0xf] %v1321_v37  ;;  %1324 = vst [vmem:[%s1742_s10 + $0x50] sm:$0xf] %v1323_v38  ;;  %v1325_v39 = vld [vmem:[%s1737_s9 + $0xb0] sm:$0xf] }
  0x2b   : > { %v1327_v40 = vld [vmem:[%s1737_s9 + $0xc8] sm:$0xf]  ;;  %v1329_v41 = vld [vmem:[%s1737_s9 + $0xe0] sm:$0xf]  ;;  %1326 = vst [vmem:[%s1742_s10 + $0x5c] sm:$0xf] %v1325_v39 }
  0x2c   : > { %1328 = vst [vmem:[%s1742_s10 + $0x68] sm:$0xf] %v1327_v40  ;;  %1330 = vst [vmem:[%s1742_s10 + $0x74] sm:$0xf] %v1329_v41  ;;  %v1331_v42 = vld [vmem:[%s1737_s9 + $0xf8] sm:$0xf] }
  0x2d   : > { %v1333_v43 = vld [vmem:[%s1737_s9 + $0x110] sm:$0xf]  ;;  %v1335_v44 = vld [vmem:[%s1737_s9 + $0x128] sm:$0xf]  ;;  %1332 = vst [vmem:[%s1742_s10 + $0x80] sm:$0xf] %v1331_v42 }
  0x2e   : > { %1334 = vst [vmem:[%s1742_s10 + $0x8c] sm:$0xf] %v1333_v43  ;;  %1336 = vst [vmem:[%s1742_s10 + $0x98] sm:$0xf] %v1335_v44  ;;  %v1337_v45 = vld [vmem:[%s1737_s9 + $0x140] sm:$0xf] }
  0x2f   : > { %v1339_v46 = vld [vmem:[%s1737_s9 + $0x158] sm:$0xf]  ;;  %v1341_v47 = vld [vmem:[%s1737_s9 + $0x170] sm:$0xf]  ;;  %1338 = vst [vmem:[%s1742_s10 + $0xa4] sm:$0xf] %v1337_v45 }
  0x30   : > { %1340 = vst [vmem:[%s1742_s10 + $0xb0] sm:$0xf] %v1339_v46  ;;  %1342 = vst [vmem:[%s1742_s10 + $0xbc] sm:$0xf] %v1341_v47  ;;  %v1343_v48 = vld [vmem:[%s1737_s9 + $0x188] sm:$0xf] }
  0x31   : > { %v1345_v49 = vld [vmem:[%s1737_s9 + $0x1a0] sm:$0xf]  ;;  %v1347_v50 = vld [vmem:[%s1737_s9 + $0x1b8] sm:$0xf]  ;;  %1344 = vst [vmem:[%s1742_s10 + $0xc8] sm:$0xf] %v1343_v48 }
  0x32   : > { %1346 = vst [vmem:[%s1742_s10 + $0xd4] sm:$0xf] %v1345_v49  ;;  %1348 = vst [vmem:[%s1742_s10 + $0xe0] sm:$0xf] %v1347_v50  ;;  %v1349_v51 = vld [vmem:[%s1737_s9 + $0x1d0] sm:$0xf] }
  0x33   : > { %v1351_v52 = vld [vmem:[%s1737_s9 + $0x1e8] sm:$0xf]  ;;  %v1353_v53 = vld [vmem:[%s1737_s9 + $0x200] sm:$0xf]  ;;  %1350 = vst [vmem:[%s1742_s10 + $0xec] sm:$0xf] %v1349_v51 }
  0x34   : > { %1352 = vst [vmem:[%s1742_s10 + $0xf8] sm:$0xf] %v1351_v52  ;;  %1354 = vst [vmem:[%s1742_s10 + $0x104] sm:$0xf] %v1353_v53  ;;  %v1355_v54 = vld [vmem:[%s1737_s9 + $0x218] sm:$0xf] }
  0x35   : > { %v1357_v55 = vld [vmem:[%s1737_s9 + $0x230] sm:$0xf]  ;;  %v1359_v56 = vld [vmem:[%s1737_s9 + $0x248] sm:$0xf]  ;;  %1356 = vst [vmem:[%s1742_s10 + $0x110] sm:$0xf] %v1355_v54 }
  0x36   : > { %1358 = vst [vmem:[%s1742_s10 + $0x11c] sm:$0xf] %v1357_v55  ;;  %1360 = vst [vmem:[%s1742_s10 + $0x128] sm:$0xf] %v1359_v56  ;;  %v1361_v57 = vld [vmem:[%s1737_s9 + $0x260] sm:$0xf] }
  0x37   : > { %v1363_v58 = vld [vmem:[%s1737_s9 + $0x278] sm:$0xf]  ;;  %v1365_v59 = vld [vmem:[%s1737_s9 + $0x290] sm:$0xf]  ;;  %1362 = vst [vmem:[%s1742_s10 + $0x134] sm:$0xf] %v1361_v57 }
  0x38   : > { %1364 = vst [vmem:[%s1742_s10 + $0x140] sm:$0xf] %v1363_v58  ;;  %1366 = vst [vmem:[%s1742_s10 + $0x14c] sm:$0xf] %v1365_v59  ;;  %v1367_v60 = vld [vmem:[%s1737_s9 + $0x2a8] sm:$0xf] }
  0x39   : > { %v1369_v61 = vld [vmem:[%s1737_s9 + $0x2c0] sm:$0xf]  ;;  %v1371_v62 = vld [vmem:[%s1737_s9 + $0x2d8] sm:$0xf]  ;;  %1368 = vst [vmem:[%s1742_s10 + $0x158] sm:$0xf] %v1367_v60 }
  0x3a   : > { %1370 = vst [vmem:[%s1742_s10 + $0x164] sm:$0xf] %v1369_v61  ;;  %1372 = vst [vmem:[%s1742_s10 + $0x170] sm:$0xf] %v1371_v62  ;;  %v1373_v63 = vld [vmem:[%s1737_s9 + $0x2f0] sm:$0xf] }
  0x3b   : > { %1374 = vst [vmem:[%s1742_s10 + $0x17c] sm:$0xf] %v1373_v63 }
  0x3c PF: > { %p1375_p8 = scmp.ge.s32.totalorder %s1657_s22, 1  ;;  %p377_p9 = scmp.lt.s32.totalorder %s1657_s22, 3 }
  0x3e   : > { %p378_p10 = pnand %p1375_p8, %p377_p9 }
  0x3f   : > { %s384_s11 = sand.u32 (!%p378_p10), 1, %s1641_s18   ;;  %s428_s12 = smul.u32 (!%p378_p10), 3, %s1649_s20 }
  0x40   : > { %381 = sbr.rel (%p378_p10) target bundleno = 713 (0x2c9), region = 62  ;;  %p1376_p12 = scmp.ne.s32.totalorder (!%p378_p10), %s1649_s20, 0 }
  0x41   : > { %s1501_s13 = smul.u32 (!%p378_p10), 384, %s384_s11  ;;  %p429_p11 = scmp.lt.s32.totalorder (!%p378_p10), %s428_s12, 5 }
  0x42   : > { %s1502_s14 = smul.u32 (!%p378_p10), 72, %s384_s11 }
  0x43   : > { %s1879_s24 = scalar_lea.vmem (!%p378_p10), [#allocation3], %s1501_s13 }
  0x44   : > { %s1881_s25 = scalar_lea.vmem (!%p378_p10), [#allocation4], %s1502_s14 }
  0x47   : > { %s2098_s12 = smov (!%p429_p11, %s428_s12), 5  ;;  %439 = sbr.rel (%p1376_p12) target bundleno = 404 (0x194), region = 70 }
  0x48   : > { %s431_s17 = scalar_lea.vmem %s2088_s4, %s2098_s12  ;;  %v440_v0 = vld [vmem:[%s2084_s0] sm:$0xff] (!%p1376_p12)  ;;  %v441_v1 = vld [vmem:[%s2084_s0 + $0x8] sm:$0xff] (!%p1376_p12)  ;;  %v442_v5 = vld [vmem:[%s2084_s0 + $0x10] sm:$0xff] (!%p1376_p12)  ;;  %v551_v62 = vlaneseq (!%p1376_p12) }
  0x49   : > { %v444_v2 = vld [vmem:[%s2084_s0 + $0x20] sm:$0xff] (!%p1376_p12)  ;;  %v452_v3 = vadd.f32 (!%p1376_p12), %v441_v1, %v440_v0  ;;  %v445_v4 = vld [vmem:[%s2084_s0 + $0x28] sm:$0xff] (!%p1376_p12)  ;;  %v443_v6 = vld [vmem:[%s2084_s0 + $0x18] sm:$0xff] (!%p1376_p12) }
  0x4a   : > { %v458_v7 = vadd.f32 (!%p1376_p12), %v445_v4, %v444_v2  ;;  %v446_v8 = vld [vmem:[%s2084_s0 + $0x30] sm:$0xff] (!%p1376_p12)  ;;  %v447_v9 = vld [vmem:[%s2084_s0 + $0x38] sm:$0xff] (!%p1376_p12)  ;;  %v455_v10 = vadd.f32 (!%p1376_p12), %v443_v6, %v442_v5  ;;  %v448_v12 = vld [vmem:[%s2084_s0 + $0x40] sm:$0xff] (!%p1376_p12) }
  0x4b   : > { %453 = vadd.xlane.f32.xlu0 (!%p1376_p12), %v452_v3  ;;  %v461_v11 = vadd.f32 (!%p1376_p12), %v447_v9, %v446_v8  ;;  %v449_v13 = vld [vmem:[%s2084_s0 + $0x48] sm:$0xff] (!%p1376_p12)  ;;  %v450_v14 = vld [vmem:[%s2084_s0 + $0x50] sm:$0xff] (!%p1376_p12)  ;;  %v451_v15 = vld [vmem:[%s2084_s0 + $0x58] sm:$0xff] (!%p1376_p12) }
  0x4c   : > { %459 = vadd.xlane.f32.xlu1 (!%p1376_p12), %v458_v7  ;;  %v464_v16 = vadd.f32 (!%p1376_p12), %v449_v13, %v448_v12  ;;  %v467_v17 = vadd.f32 (!%p1376_p12), %v451_v15, %v450_v14 }
  0x4f   : > { %456 = vadd.xlane.f32.xlu0 %v455_v10 }
  0x50   : > { %462 = vadd.xlane.f32.xlu1 %v461_v11 }
  0x53   : > { %465 = vadd.xlane.f32.xlu0 %v464_v16 }
  0x54   : > { %468 = vadd.xlane.f32.xlu1 %v467_v17 }
  0xd8   : > { %v454_v18 = vpop.xlane.xlu0 %453 }
  0xd9   : > { %v471_v19 = vmul.f32 0.00390625, %v454_v18  ;;  %v460_v20 = vpop.xlane.xlu1 %459 }
  0xda   : > { %v473_v21 = vmul.f32 0.00390625, %v460_v20 }
  0xdb   : > { %v1920_v22 = vsub.f32 %v440_v0, %v471_v19  ;;  %v1922_v23 = vsub.f32 %v441_v1, %v471_v19 }
  0xdc   : > { %v1924_v24 = vsub.f32 %v444_v2, %v473_v21  ;;  %v1926_v25 = vsub.f32 %v445_v4, %v473_v21  ;;  %v457_v26 = vpop.xlane.xlu0 %456  ;;  %v552_v4 = vshrl.u32 %v551_v62, 7 }
  0xdd   : > { %v472_v27 = vmul.f32 0.00390625, %v457_v26  ;;  %v463_v28 = vpop.xlane.xlu1 %462  ;;  %v489_v29 = vmul.f32 %v1920_v22, %v1920_v22  ;;  %v490_v30 = vmul.f32 %v1922_v23, %v1922_v23  ;;  %v573_v26 = vld [vmem:[%s2086_s2] sm:$0x3] }
  0xde   : > { %v474_v31 = vmul.f32 0.00390625, %v463_v28  ;;  %v493_v32 = vmul.f32 %v1924_v24, %v1924_v24  ;;  %v494_v33 = vmul.f32 %v1926_v25, %v1926_v25  ;;  %v553_v11 = vsub.s32 0, %v552_v4 }
  0xdf   : > { %v1936_v34 = vsub.f32 %v442_v5, %v472_v27  ;;  %v1938_v35 = vsub.f32 %v443_v6, %v472_v27  ;;  %v501_v36 = vadd.f32 %v490_v30, %v489_v29 }
  0xe0   : > { %v1940_v37 = vsub.f32 %v446_v8, %v474_v31  ;;  %v1942_v38 = vsub.f32 %v447_v9, %v474_v31  ;;  %v466_v39 = vpop.xlane.xlu0 %465  ;;  %v507_v42 = vadd.f32 %v494_v33, %v493_v32  ;;  %v578_v30 = vrot.slane %v573_v26, %v553_v11 }
  0xe1   : > { %v475_v40 = vmul.f32 0.00390625, %v466_v39  ;;  %502 = vadd.xlane.f32.xlu0 %v501_v36  ;;  %v469_v41 = vpop.xlane.xlu1 %468  ;;  %v491_v43 = vmul.f32 %v1936_v34, %v1936_v34  ;;  %v492_v44 = vmul.f32 %v1938_v35, %v1938_v35 }
  0xe2   : > { %v476_v45 = vmul.f32 0.00390625, %v469_v41  ;;  %v495_v46 = vmul.f32 %v1940_v37, %v1940_v37  ;;  %v496_v47 = vmul.f32 %v1942_v38, %v1942_v38 }
  0xe3   : > { %v1952_v48 = vsub.f32 %v448_v12, %v475_v40  ;;  %v1954_v49 = vsub.f32 %v449_v13, %v475_v40  ;;  %v504_v50 = vadd.f32 %v492_v44, %v491_v43  ;;  %v557_v12 = vsub.s32 1, %v552_v4 }
  0xe4   : > { %v1956_v51 = vsub.f32 %v450_v14, %v476_v45  ;;  %v1958_v52 = vsub.f32 %v451_v15, %v476_v45  ;;  %v510_v53 = vadd.f32 %v496_v47, %v495_v46  ;;  %v549_v15 = vld [vmem:[%s2085_s1] sm:$0x3] }
  0xe5   : > { %508 = vadd.xlane.f32.xlu0 %v507_v42  ;;  %505 = vadd.xlane.f32.xlu1 %v504_v50  ;;  %v497_v54 = vmul.f32 %v1952_v48, %v1952_v48  ;;  %v498_v55 = vmul.f32 %v1954_v49, %v1954_v49  ;;  %v554_v19 = vrot.slane %v549_v15, %v553_v11 }
  0xe6   : > { %v499_v56 = vmul.f32 %v1956_v51, %v1956_v51  ;;  %v500_v57 = vmul.f32 %v1958_v52, %v1958_v52  ;;  %v558_v20 = vrot.slane %v549_v15, %v557_v12  ;;  %v582_v31 = vrot.slane %v573_v26, %v557_v12 }
  0xe7   : > { %v513_v58 = vadd.f32 %v498_v55, %v497_v54 }
  0xe8   : > { %v516_v59 = vadd.f32 %v500_v57, %v499_v56 }
  0xe9   : > { %511 = vadd.xlane.f32.xlu1 %v510_v53  ;;  %514 = vadd.xlane.f32.xlu0 %v513_v58 }
  0xed   : > { %517 = vadd.xlane.f32.xlu1 %v516_v59 }
 0x16e   : > { %v503_v60 = vpop.xlane.xlu0 %502 }
 0x16f   : > { %v519_v61 = vmul.f32 0.00390625, %v503_v60 }
 0x171   : > { %v525_v63 = vadd.f32 1e-06, %v519_v61 }
 0x172   : > { %v506_v0 = vpop.xlane.xlu1 %505  ;;  %v509_v1 = vpop.xlane.xlu0 %508 }
 0x173   : > { %1543 = vrsqrt.f32 %v525_v63  ;;  %v520_v2 = vmul.f32 0.00390625, %v506_v0  ;;  %v521_v3 = vmul.f32 0.00390625, %v509_v1 }
 0x175   : > { %v526_v5 = vadd.f32 1e-06, %v520_v2  ;;  %v527_v6 = vadd.f32 1e-06, %v521_v3 }
 0x176   : > { %v512_v7 = vpop.xlane.xlu1 %511  ;;  %v515_v8 = vpop.xlane.xlu0 %514 }
 0x177   : > { %1545 = vrsqrt.f32 %v526_v5  ;;  %v522_v9 = vmul.f32 0.00390625, %v512_v7  ;;  %v523_v10 = vmul.f32 0.00390625, %v515_v8 }
 0x178   : > { %1547 = vrsqrt.f32 %v527_v6 }
 0x179   : > { %v528_v13 = vadd.f32 1e-06, %v522_v9  ;;  %v529_v14 = vadd.f32 1e-06, %v523_v10 }
 0x17a   : > { %v518_v16 = vpop.xlane.xlu1 %517 }
 0x17b   : > { %1549 = vrsqrt.f32 %v528_v13  ;;  %v524_v17 = vmul.f32 0.00390625, %v518_v16 }
 0x17c   : > { %1551 = vrsqrt.f32 %v529_v14 }
 0x17d   : > { %v1544_v18 = vpop.eup %1543  ;;  %v530_v21 = vadd.f32 1e-06, %v524_v17 }
 0x17e   : > { %v537_v27 = vmul.f32 %v1544_v18, %v1920_v22  ;;  %v538_v28 = vmul.f32 %v1544_v18, %v1922_v23 }
 0x17f   : > { %1553 = vrsqrt.f32 %v530_v21 }
 0x180   : > { %v561_v32 = vmul.f32 %v554_v19, %v537_v27  ;;  %v562_v33 = vmul.f32 %v558_v20, %v538_v28 }
 0x181   : > { %v1546_v29 = vpop.eup %1545 }
 0x182   : > { %v1548_v36 = vpop.eup %1547  ;;  %v539_v39 = vmul.f32 %v1546_v29, %v1936_v34  ;;  %v540_v40 = vmul.f32 %v1546_v29, %v1938_v35  ;;  %v585_v45 = vadd.f32 %v578_v30, %v561_v32  ;;  %v586_v23 = vadd.f32 %v582_v31, %v562_v33 }
 0x183   : > { %v541_v41 = vmul.f32 %v1548_v36, %v1924_v24  ;;  %v542_v42 = vmul.f32 %v1548_v36, %v1926_v25 }
 0x184   : > { %v563_v43 = vmul.f32 %v554_v19, %v539_v39  ;;  %v564_v44 = vmul.f32 %v558_v20, %v540_v40 }
 0x185   : > { %v1550_v22 = vpop.eup %1549  ;;  %v565_v46 = vmul.f32 %v554_v19, %v541_v41  ;;  %v566_v47 = vmul.f32 %v558_v20, %v542_v42 }
 0x186   : > { %v1552_v50 = vpop.eup %1551  ;;  %v587_v53 = vadd.f32 %v578_v30, %v563_v43  ;;  %v588_v54 = vadd.f32 %v582_v31, %v564_v44  ;;  %v543_v55 = vmul.f32 %v1550_v22, %v1940_v37  ;;  %v544_v34 = vmul.f32 %v1550_v22, %v1942_v38 }
 0x187   : > { %v545_v35 = vmul.f32 %v1552_v50, %v1952_v48  ;;  %v546_v24 = vmul.f32 %v1552_v50, %v1954_v49  ;;  %v589_v60 = vadd.f32 %v578_v30, %v565_v46  ;;  %v590_v61 = vadd.f32 %v582_v31, %v566_v47 }
 0x188   : > { %v597_v56 = vpack.c.bf16 %v587_v53, %v585_v45  ;;  %v598_v25 = vpack.c.bf16 %v588_v54, %v586_v23  ;;  %v567_v57 = vmul.f32 %v554_v19, %v543_v55  ;;  %v568_v58 = vmul.f32 %v558_v20, %v544_v34 }
 0x189   : > { %v1554_v59 = vpop.eup %1553  ;;  %v569_v62 = vmul.f32 %v554_v19, %v545_v35  ;;  %v570_v63 = vmul.f32 %v558_v20, %v546_v24 }
 0x18a   : > { %603 = vst [vmem:[#allocation2] sm:$0xff] %v597_v56  ;;  %604 = vst [vmem:[#allocation2 + $0x8] sm:$0xff] %v598_v25  ;;  %v591_v0 = vadd.f32 %v578_v30, %v567_v57  ;;  %v592_v1 = vadd.f32 %v582_v31, %v568_v58  ;;  %v547_v37 = vmul.f32 %v1554_v59, %v1956_v51 }
 0x18b   : > { %v548_v38 = vmul.f32 %v1554_v59, %v1958_v52  ;;  %v593_v4 = vadd.f32 %v578_v30, %v569_v62  ;;  %v594_v5 = vadd.f32 %v582_v31, %v570_v63 }
 0x18c   : > { %v599_v48 = vpack.c.bf16 %v591_v0, %v589_v60  ;;  %v600_v2 = vpack.c.bf16 %v592_v1, %v590_v61  ;;  %v571_v49 = vmul.f32 %v554_v19, %v547_v37 }
 0x18d   : > { %v572_v3 = vmul.f32 %v558_v20, %v548_v38 }
 0x18e   : > { %605 = vst [vmem:[#allocation2 + $0x10] sm:$0xff] %v599_v48  ;;  %606 = vst [vmem:[#allocation2 + $0x18] sm:$0xff] %v600_v2  ;;  %v595_v6 = vadd.f32 %v578_v30, %v571_v49 }
 0x18f   : > { %v596_v7 = vadd.f32 %v582_v31, %v572_v3 }
 0x190   : > { %v601_v8 = vpack.c.bf16 %v595_v6, %v593_v4 }
 0x191   : > { %v602_v9 = vpack.c.bf16 %v596_v7, %v594_v5 }
 0x192   : > { %607 = vst [vmem:[#allocation2 + $0x20] sm:$0xff] %v601_v8 }
 0x193   : > { %608 = vst [vmem:[#allocation2 + $0x28] sm:$0xff] %v602_v9 }
 0x194 PF: > { %v1555_v51 = vld [vmem:[%s1879_s24 + $0x4] ss:$12 sps:$4 sm:$0xff]   ;;  %v1557_v52 = vld [vmem:[%s1879_s24] ss:$12 sps:$4 sm:$0xff]   ;;  %v1558_v10 = vld [vmem:[%s1879_s24 + $0x1c] ss:$12 sps:$4 sm:$0xff]   ;;  %v681_v48 = vlaneseq }
 0x195   : > { %952 = vmatprep.subr.bf16.mxu0 %v1555_v51  ;;  %v1560_v11 = vld [vmem:[%s1879_s24 + $0x18] ss:$12 sps:$4 sm:$0xff]   ;;  %v1561_v12 = vld [vmem:[%s1879_s24 + $0x34] ss:$12 sps:$4 sm:$0xff]   ;;  %v1563_v13 = vld [vmem:[%s1879_s24 + $0x30] ss:$12 sps:$4 sm:$0xff]  }
 0x196   : > { %953 = vmatpush1.bf16.msra.mxu0 %v1557_v52  ;;  %v1564_v14 = vld [vmem:[%s1879_s24 + $0x4c] ss:$12 sps:$4 sm:$0xff]   ;;  %v1576_v15 = vld [vmem:[%s1879_s24 + $0xc8] ss:$12 sps:$4 sm:$0xff]   ;;  %v1567_v17 = vld [vmem:[%s1879_s24 + $0x64] ss:$12 sps:$4 sm:$0xff]  }
 0x197   : > { %954 = vmatprep.subr.bf16.mxu0 %v1558_v10  ;;  %v1566_v16 = vld [vmem:[%s1879_s24 + $0x48] ss:$12 sps:$4 sm:$0xff]   ;;  %1466 = vmatprep.subr.bf16.mxu1 %v1576_v15  ;;  %v1581_v19 = vld [vmem:[%s1879_s24 + $0xe0] ss:$12 sps:$4 sm:$0xff]   ;;  %v1586_v27 = vld [vmem:[%s1879_s24 + $0xf8] ss:$12 sps:$4 sm:$0xff]  }
 0x198   : > { %v1579_v18 = vld [vmem:[%s1879_s24 + $0x8] ss:$12 sps:$4 sm:$0xff]   ;;  %v1569_v20 = vld [vmem:[%s1879_s24 + $0x60] ss:$12 sps:$4 sm:$0xff]   ;;  %v1572_v28 = vld [vmem:[%s1879_s24 + $0x78] ss:$12 sps:$4 sm:$0xff]  }
 0x199   : > { %1467 = vmatpush3.bf16.msra.mxu1 %v1579_v18  ;;  %v1570_v21 = vld [vmem:[%s1879_s24 + $0x7c] ss:$12 sps:$4 sm:$0xff]   ;;  %v1584_v26 = vld [vmem:[%s1879_s24 + $0x20] ss:$12 sps:$4 sm:$0xff]   ;;  %v1589_v29 = vld [vmem:[%s1879_s24 + $0x38] ss:$12 sps:$4 sm:$0xff]  }
 0x19a   : > { %955 = vmatpush1.bf16.msra.mxu0 %v1560_v11  ;;  %1468 = vmatprep.subr.bf16.mxu1 %v1581_v19  ;;  %v1573_v30 = vld [vmem:[%s1879_s24 + $0x94] ss:$12 sps:$4 sm:$0xff]   ;;  %v1591_v31 = vld [vmem:[%s1879_s24 + $0x110] ss:$12 sps:$4 sm:$0xff]   ;;  %v1577_v39 = vld [vmem:[%s1879_s24 + $0xac] ss:$12 sps:$4 sm:$0xff]  }
 0x19b   : > { %956 = vmatprep.subr.bf16.mxu0 %v1561_v12  ;;  %v1575_v32 = vld [vmem:[%s1879_s24 + $0x90] ss:$12 sps:$4 sm:$0xff]   ;;  %v1596_v36 = vld [vmem:[%s1879_s24 + $0x128] ss:$12 sps:$4 sm:$0xff]   ;;  %v1601_v42 = vld [vmem:[%s1879_s24 + $0x140] ss:$12 sps:$4 sm:$0xff]  }
 0x19c   : > { %v1594_v33 = vld [vmem:[%s1879_s24 + $0x50] ss:$12 sps:$4 sm:$0xff]   ;;  %v1580_v40 = vld [vmem:[%s1879_s24 + $0xa8] ss:$12 sps:$4 sm:$0xff]   ;;  %v1585_v44 = vld [vmem:[%s1879_s24 + $0xc0] ss:$12 sps:$4 sm:$0xff]  }
 0x19d   : > { %1469 = vmatpush3.bf16.msra.mxu1 %v1584_v26  ;;  %v1599_v41 = vld [vmem:[%s1879_s24 + $0x68] ss:$12 sps:$4 sm:$0xff]   ;;  %v1582_v43 = vld [vmem:[%s1879_s24 + $0xc4] ss:$12 sps:$4 sm:$0xff]   ;;  %v1604_v22 = vld [vmem:[%s1879_s24 + $0x80] ss:$12 sps:$4 sm:$0xff]  }
 0x19e   : > { %957 = vmatpush1.bf16.msra.mxu0 %v1563_v13  ;;  %1470 = vmatprep.subr.bf16.mxu1 %v1586_v27  ;;  %v1606_v45 = vld [vmem:[%s1879_s24 + $0x158] ss:$12 sps:$4 sm:$0xff]   ;;  %v1587_v23 = vld [vmem:[%s1879_s24 + $0xdc] ss:$12 sps:$4 sm:$0xff]   ;;  %v1592_v53 = vld [vmem:[%s1879_s24 + $0xf4] ss:$12 sps:$4 sm:$0xff]  }
 0x19f   : > { %958 = vmatprep.subr.bf16.mxu0 %v1564_v14  ;;  %v1609_v46 = vld [vmem:[%s1879_s24 + $0x98] ss:$12 sps:$4 sm:$0xff]   ;;  %v1611_v50 = vld [vmem:[%s1879_s24 + $0x170] ss:$12 sps:$4 sm:$0xff]   ;;  %v1600_v56 = vld [vmem:[%s1879_s24 + $0x108] ss:$12 sps:$4 sm:$0xff]  }
 0x1a0   : > { %v1590_v47 = vld [vmem:[%s1879_s24 + $0xd8] ss:$12 sps:$4 sm:$0xff]   ;;  %v1614_v55 = vld [vmem:[%s1879_s24 + $0xb0] ss:$12 sps:$4 sm:$0xff]   ;;  %v612_v25 = vld [vmem:[#allocation2 + $0x18] sm:$0xff]  ;;  %v682_v2 = vshrl.u32 %v681_v48, 7 }
 0x1a1   : > { %1471 = vmatpush3.bf16.msra.mxu1 %v1589_v29  ;;  %v610_v54 = vld [vmem:[#allocation2 + $0x8] sm:$0xff]  ;;  %v609_v24 = vld [vmem:[#allocation2] sm:$0xff]  ;;  %v1605_v58 = vld [vmem:[%s1879_s24 + $0x120] ss:$12 sps:$4 sm:$0xff]   ;;  %s1465_s12 = smul.u32 (%p1724_p6), 12, %s1649_s20 }
 0x1a2   : > { %959 = vmatpush1.bf16.msra.mxu0 %v1566_v16  ;;  %1472 = vmatprep.subr.bf16.mxu1 %v1591_v31  ;;  %v1595_v34 = vld [vmem:[%s1879_s24 + $0xf0] ss:$12 sps:$4 sm:$0xff]   ;;  %v1597_v35 = vld [vmem:[%s1879_s24 + $0x10c] ss:$12 sps:$4 sm:$0xff]   ;;  %v611_v60 = vld [vmem:[#allocation2 + $0x10] sm:$0xff]  ;;  %v691_v49 = vsub.s32 2, %v682_v2 }
 0x1a3   : > { %960 = vmatprep.subr.bf16.mxu0 %v1567_v17  ;;  %1047 = vmatprep.mubr.bf16.mxu1 %v610_v54  ;;  %v1602_v57 = vld [vmem:[%s1879_s24 + $0x124] ss:$12 sps:$4 sm:$0xff]   ;;  %v1607_v59 = vld [vmem:[%s1879_s24 + $0x13c] ss:$12 sps:$4 sm:$0xff]   ;;  %v1612_v63 = vld [vmem:[%s1879_s24 + $0x154] ss:$12 sps:$4 sm:$0xff]  }
 0x1a4   : > { %984 = vmatprep.mubr.bf16.mxu0 %v610_v54  ;;  %v1610_v61 = vld [vmem:[%s1879_s24 + $0x138] ss:$12 sps:$4 sm:$0xff]   ;;  %v1615_v0 = vld [vmem:[%s1879_s24 + $0x150] ss:$12 sps:$4 sm:$0xff]   ;;  %v1618_v38 = vld [vmem:[%s1879_s24 + $0x168] ss:$12 sps:$4 sm:$0xff]  }
 0x1a5   : > { %1473 = vmatpush3.bf16.msra.mxu1 %v1594_v33  ;;  %v614_v62 = vld [vmem:[#allocation2 + $0x28] sm:$0xff]  ;;  %v613_v37 = vld [vmem:[#allocation2 + $0x20] sm:$0xff]  ;;  %v687_v27 = vsub.s32 1, %v682_v2 }
 0x1a6   : > { %961 = vmatpush1.bf16.msra.mxu0 %v1569_v20  ;;  %1474 = vmatprep.subr.bf16.mxu1 %v1596_v36  ;;  %v1616_v1 = vld [vmem:[%s1879_s24 + $0x16c] ss:$12 sps:$4 sm:$0xff]   ;;  %v679_v3 = vld [vmem:[%s431_s17] sm:$0x7]  ;;  %v683_v20 = vsub.s32 0, %v682_v2  ;;  %s1156_s24 = scalar_lea.vmem (%p1724_p6), %s2089_s5, %s1465_s12 }
 0x1a7   : > { %962 = vmatprep.subr.bf16.mxu0 %v1570_v21  ;;  %v692_v5 = vrot.slane %v679_v3, %v691_v49  ;;  %v688_v36 = vrot.slane %v679_v3, %v687_v27 }
 0x1a8   : > { %v684_v31 = vrot.slane %v679_v3, %v683_v20 }
 0x1a9   : > { %1475 = vmatpush3.bf16.msra.mxu1 %v1599_v41 }
 0x1aa   : > { %963 = vmatpush1.bf16.msra.mxu0 %v1572_v28  ;;  %1476 = vmatprep.subr.bf16.mxu1 %v1601_v42 }
 0x1ab   : > { %964 = vmatprep.subr.bf16.mxu0 %v1573_v30 }
 0x1ad   : > { %1477 = vmatpush3.bf16.msra.mxu1 %v1604_v22 }
 0x1ae   : > { %965 = vmatpush1.bf16.msra.mxu0 %v1575_v32  ;;  %1478 = vmatprep.subr.bf16.mxu1 %v1606_v45 }
 0x1af   : > { %966 = vmatprep.subr.bf16.mxu0 %v1577_v39 }
 0x1b1   : > { %1479 = vmatpush3.bf16.msra.mxu1 %v1609_v46 }
 0x1b2   : > { %967 = vmatpush1.bf16.msra.mxu0 %v1580_v40  ;;  %1480 = vmatprep.subr.bf16.mxu1 %v1611_v50 }
 0x1b3   : > { %968 = vmatprep.subr.bf16.mxu0 %v1582_v43 }
 0x1b5   : > { %1481 = vmatpush3.bf16.msra.mxu1 %v1614_v55 }
 0x1b6   : > { %969 = vmatpush1.bf16.msra.mxu0 %v1585_v44 }
 0x1b7   : > { %970 = vmatprep.subr.bf16.mxu0 %v1587_v23 }
 0x1b8   : > { %1048 = vmatmul.mubr.bf16.vlgmr.msra.gmra.mrb[0].mxu1 %v609_v24 }
 0x1b9   : > { %1055 = vmatprep.mubr.bf16.mxu1 %v612_v25 }
 0x1ba   : > { %971 = vmatpush1.bf16.msra.mxu0 %v1590_v47 }
 0x1bb   : > { %972 = vmatprep.subr.bf16.mxu0 %v1592_v53 }
 0x1be   : > { %973 = vmatpush1.bf16.msra.mxu0 %v1595_v34 }
 0x1bf   : > { %974 = vmatprep.subr.bf16.mxu0 %v1597_v35 }
 0x1c0   : > { %1056 = vmatmul.mubr.bf16.gmra.mrb[4].mxu1 %v611_v60 }
 0x1c1   : > { %1063 = vmatprep.mubr.bf16.mxu1 %v614_v62 }
 0x1c2   : > { %975 = vmatpush1.bf16.msra.mxu0 %v1600_v56 }
 0x1c3   : > { %976 = vmatprep.subr.bf16.mxu0 %v1602_v57 }
 0x1c6   : > { %977 = vmatpush1.bf16.msra.mxu0 %v1605_v58 }
 0x1c7   : > { %978 = vmatprep.subr.bf16.mxu0 %v1607_v59 }
 0x1c8   : > { %1064 = vmatmul.mubr.bf16.gmra.mrb[8].mxu1 %v613_v37 }
 0x1ca   : > { %979 = vmatpush1.bf16.msra.mxu0 %v1610_v61 }
 0x1cb   : > { %980 = vmatprep.subr.bf16.mxu0 %v1612_v63 }
 0x1ce   : > { %981 = vmatpush1.bf16.msra.mxu0 %v1615_v0 }
 0x1cf   : > { %982 = vmatprep.subr.bf16.mxu0 %v1616_v1 }
 0x1d2   : > { %983 = vmatpush1.bf16.msra.mxu0 %v1618_v38 }
 0x1d5   : > { %985 = vmatmul.mubr.bf16.vlgmr.msra.gmra.mrb[0].mxu0 %v609_v24 }
 0x1d6   : > { %994 = vmatprep.mubr.bf16.mxu0 %v612_v25 }
 0x1dd   : > { %995 = vmatmul.mubr.bf16.gmra.mrb[4].mxu0 %v611_v60 }
 0x1de   : > { %1004 = vmatprep.mubr.bf16.mxu0 %v614_v62 }
 0x1e5   : > { %1005 = vmatmul.mubr.bf16.gmra.mrb[8].mxu0 %v613_v37 }
 0x28b   : > { %v1482_v4 = vpop.f32.mrb[0].mxu1 }
 0x28c   : > { %v1483_v6 = vpop.f32.mrb[1].mxu1 }
 0x28d   : > { %v1484_v7 = vadd.f32 %v1483_v6, %v1482_v4  ;;  %v1485_v8 = vpop.f32.mrb[2].mxu1 }
 0x28e   : > { %v1486_v9 = vpop.f32.mrb[3].mxu1 }
 0x28f   : > { %v1050_v51 = vadd.f32 %v1484_v7, %v692_v5  ;;  %v1487_v52 = vadd.f32 %v1486_v9, %v1485_v8 }
 0x291   : > { %v1454_v10 = vpack.c.bf16 %v1050_v51, %v1050_v51  ;;  %v1053_v11 = vadd.f32 %v1487_v52, %v692_v5 }
 0x293   : > { %1133 = vst [vmem:[%s1881_s25 + $0x8] sm:$0xf] %v1454_v10  ;;  %v1456_v12 = vpack.c.bf16 %v1053_v11, %v1053_v11  ;;  %v1488_v13 = vpop.f32.mrb[4].mxu1 }
 0x294   : > { %v1489_v14 = vpop.f32.mrb[5].mxu1 }
 0x295   : > { %1135 = vst [vmem:[%s1881_s25 + $0x14] sm:$0xf] %v1456_v12  ;;  %v1490_v15 = vadd.f32 %v1489_v14, %v1488_v13  ;;  %v1491_v16 = vpop.f32.mrb[6].mxu1 }
 0x296   : > { %v1492_v17 = vpop.f32.mrb[7].mxu1 }
 0x297   : > { %v1058_v18 = vadd.f32 %v1490_v15, %v692_v5  ;;  %v1493_v19 = vadd.f32 %v1492_v17, %v1491_v16 }
 0x299   : > { %v1458_v21 = vpack.c.bf16 %v1058_v18, %v1058_v18  ;;  %v1061_v26 = vadd.f32 %v1493_v19, %v692_v5 }
 0x29a   : > { %v1438_v52 = vld [vmem:[%s1881_s25 + $0x8] sm:$0xf] (%p1724_p6) }
 0x29b   : > { %1137 = vst [vmem:[%s1881_s25 + $0x20] sm:$0xf] %v1458_v21  ;;  %v1460_v28 = vpack.c.bf16 %v1061_v26, %v1061_v26  ;;  %v1494_v29 = vpop.f32.mrb[8].mxu1  ;;  %1439 = vst [vmem:[%s1156_s24 + $0x8] sm:$0xf] (%p1724_p6), %v1438_v52 }
 0x29c   : > { %v1495_v30 = vpop.f32.mrb[9].mxu1  ;;  %v1440_v10 = vld [vmem:[%s1881_s25 + $0x14] sm:$0xf] (%p1724_p6) }
 0x29d   : > { %1139 = vst [vmem:[%s1881_s25 + $0x2c] sm:$0xf] %v1460_v28  ;;  %v1496_v32 = vadd.f32 %v1495_v30, %v1494_v29  ;;  %v1497_v33 = vpop.f32.mrb[10].mxu1  ;;  %1441 = vst [vmem:[%s1156_s24 + $0x20] sm:$0xf] (%p1724_p6), %v1440_v10 }
 0x29e   : > { %v1498_v39 = vpop.f32.mrb[11].mxu1 }
 0x29f   : > { %v1066_v40 = vadd.f32 %v1496_v32, %v692_v5  ;;  %v1499_v41 = vadd.f32 %v1498_v39, %v1497_v33 }
 0x2a1   : > { %v1462_v22 = vpack.c.bf16 %v1066_v40, %v1066_v40  ;;  %v1069_v45 = vadd.f32 %v1499_v41, %v692_v5 }
 0x2a2   : > { %v1442_v11 = vld [vmem:[%s1881_s25 + $0x20] sm:$0xf] (%p1724_p6) }
 0x2a3   : > { %1141 = vst [vmem:[%s1881_s25 + $0x38] sm:$0xf] %v1462_v22  ;;  %v1464_v53 = vpack.c.bf16 %v1069_v45, %v1069_v45  ;;  %1443 = vst [vmem:[%s1156_s24 + $0x38] sm:$0xf] (%p1724_p6), %v1442_v11 }
 0x2a4   : > { %v1444_v12 = vld [vmem:[%s1881_s25 + $0x2c] sm:$0xf] (%p1724_p6) }
 0x2a5   : > { %1143 = vst [vmem:[%s1881_s25 + $0x44] sm:$0xf] %v1464_v53  ;;  %1445 = vst [vmem:[%s1156_s24 + $0x50] sm:$0xf] (%p1724_p6), %v1444_v12 }
 0x2a8   : > { %v986_v42 = vpop.f32.mrb[0].mxu0 }
 0x2a9   : > { %v987_v43 = vadd.f32 %v986_v42, %v684_v31  ;;  %v988_v44 = vpop.f32.mrb[1].mxu0 }
 0x2aa   : > { %v989_v23 = vadd.f32 %v988_v44, %v688_v36  ;;  %v990_v46 = vpop.f32.mrb[2].mxu0  ;;  %v1446_v13 = vld [vmem:[%s1881_s25 + $0x38] sm:$0xf] (%p1724_p6) }
 0x2ab   : > { %v991_v47 = vadd.f32 %v990_v46, %v684_v31  ;;  %v992_v50 = vpop.f32.mrb[3].mxu0  ;;  %1447 = vst [vmem:[%s1156_s24 + $0x68] sm:$0xf] (%p1724_p6), %v1446_v13 }
 0x2ac   : > { %v1453_v54 = vpack.c.bf16 %v989_v23, %v987_v43  ;;  %v993_v55 = vadd.f32 %v992_v50, %v688_v36  ;;  %v1448_v14 = vld [vmem:[%s1881_s25 + $0x44] sm:$0xf] (%p1724_p6) }
 0x2ad   : > { %1449 = vst [vmem:[%s1156_s24 + $0x80] sm:$0xf] (%p1724_p6), %v1448_v14 }
 0x2ae   : > { %1132 = vst [vmem:[%s1881_s25] sm:$0xff] %v1453_v54  ;;  %v1455_v34 = vpack.c.bf16 %v993_v55, %v991_v47 }
 0x2b0   : > { %1134 = vst [vmem:[%s1881_s25 + $0xc] sm:$0xff] %v1455_v34  ;;  %v996_v35 = vpop.f32.mrb[4].mxu0 }
 0x2b1   : > { %v997_v24 = vadd.f32 %v996_v35, %v684_v31  ;;  %v998_v56 = vpop.f32.mrb[5].mxu0 }
 0x2b2   : > { %v999_v25 = vadd.f32 %v998_v56, %v688_v36  ;;  %v1000_v57 = vpop.f32.mrb[6].mxu0 }
 0x2b3   : > { %v1001_v58 = vadd.f32 %v1000_v57, %v684_v31  ;;  %v1002_v59 = vpop.f32.mrb[7].mxu0 }
 0x2b4   : > { %v1457_v60 = vpack.c.bf16 %v999_v25, %v997_v24  ;;  %v1003_v61 = vadd.f32 %v1002_v59, %v688_v36 }
 0x2b5   : > { %v1171_v5 = vld [vmem:[%s1881_s25] sm:$0xff] (%p1724_p6) }
 0x2b6   : > { %1136 = vst [vmem:[%s1881_s25 + $0x18] sm:$0xff] %v1457_v60  ;;  %v1459_v62 = vpack.c.bf16 %v1003_v61, %v1001_v58  ;;  %1172 = vst [vmem:[%s1156_s24] sm:$0xff] (%p1724_p6), %v1171_v5 }
 0x2b7   : > { %v1173_v6 = vld [vmem:[%s1881_s25 + $0xc] sm:$0xff] (%p1724_p6) }
 0x2b8   : > { %1138 = vst [vmem:[%s1881_s25 + $0x24] sm:$0xff] %v1459_v62  ;;  %v1006_v63 = vpop.f32.mrb[8].mxu0  ;;  %1174 = vst [vmem:[%s1156_s24 + $0x18] sm:$0xff] (%p1724_p6), %v1173_v6 }
 0x2b9   : > { %v1007_v0 = vadd.f32 %v1006_v63, %v684_v31  ;;  %v1008_v1 = vpop.f32.mrb[9].mxu0 }
 0x2ba   : > { %v1009_v37 = vadd.f32 %v1008_v1, %v688_v36  ;;  %v1010_v38 = vpop.f32.mrb[10].mxu0  ;;  %1150 = sbr.rel (!%p1724_p6) target bundleno = 713 (0x2c9), region = 74 }
 0x2bb   : > { %v1011_v48 = vadd.f32 %v1010_v38, %v684_v31  ;;  %v1012_v2 = vpop.f32.mrb[11].mxu0 }
 0x2bc   : > { %v1461_v49 = vpack.c.bf16 %v1009_v37, %v1007_v0  ;;  %v1013_v3 = vadd.f32 %v1012_v2, %v688_v36 }
 0x2bd   : > { %v1175_v7 = vld [vmem:[%s1881_s25 + $0x18] sm:$0xff] (%p1724_p6) }
 0x2be   : > { %1140 = vst [vmem:[%s1881_s25 + $0x30] sm:$0xff] %v1461_v49  ;;  %v1463_v4 = vpack.c.bf16 %v1013_v3, %v1011_v48  ;;  %1176 = vst [vmem:[%s1156_s24 + $0x30] sm:$0xff] (%p1724_p6), %v1175_v7 }
 0x2bf   : > { %v1177_v8 = vld [vmem:[%s1881_s25 + $0x24] sm:$0xff] (%p1724_p6) }
 0x2c0   : > { %1142 = vst [vmem:[%s1881_s25 + $0x3c] sm:$0xff] %v1463_v4  ;;  %1178 = vst [vmem:[%s1156_s24 + $0x48] sm:$0xff] (%p1724_p6), %v1177_v8 }
 0x2c5   : > { %v1179_v9 = vld [vmem:[%s1881_s25 + $0x30] sm:$0xff] }
 0x2c6   : > { %1180 = vst [vmem:[%s1156_s24 + $0x60] sm:$0xff] %v1179_v9 }
 0x2c7   : > { %v1181_v51 = vld [vmem:[%s1881_s25 + $0x3c] sm:$0xff] }
 0x2c8   : > { %1182 = vst [vmem:[%s1156_s24 + $0x78] sm:$0xff] %v1181_v51 }
 0x2c9 PF: > { %s15_s22 = sadd.s32 1, %s1657_s22   ;;  %s2091_s18 = smov %s1645_s19 }
 0x2ca   : > { %p12_p13 = scmp.ge.s32.totalorder %s15_s22, 4   ;;  %s2092_s19 = smov %s1729_s28 }
 0x2cb   : > { %s2093_s20 = smov %s1653_s21  ;;  %s2094_s21 = smov %s2096_s23 }
 0x2cc   :  { %14 = sbr.rel (!%p12_p13) target bundleno = 3 (0x3), region = 149 }

// kernel: _lambda_.15
= control target key start
LH: loop header
LB: loop body
LE: loop exit
PB: predicated region body
PF: predicated region fallthrough
CT: control target
= control target key end

     0   :  { %v377_v38 = vlaneseq  ;;  %s780_s1 = inlined_call_operand.vmem [shape: bf16[256,256], index: 1, kind: input, shape index: {}]   ;;  %s781_s0 = inlined_call_operand.vmem [shape: bf16[48,256], index: 0, kind: input, shape index: {}]   ;;  %s782_s2 = inlined_call_operand.vmem [shape: f32[1,256], index: 2, kind: input, shape index: {}]   ;;  %s783_s3 = inlined_call_operand.vmem [shape: f32[48,256], index: 3, kind: input, shape index: {}]   ;;  %s784_s4 = inlined_call_operand.vmem [shape: f32[48,256], index: 4, kind: output, shape index: {}]  }
   0x1   :  { %v509_v0 = vld [vmem:[%s780_s1 + $0x4] ss:$8 sps:$4 sm:$0xff]   ;;  %v511_v1 = vld [vmem:[%s780_s1] ss:$8 sps:$4 sm:$0xff]   ;;  %v512_v2 = vld [vmem:[%s780_s1 + $0x14] ss:$8 sps:$4 sm:$0xff]  }
   0x2   :  { %477 = vmatprep.subr.bf16.mxu1 %v509_v0  ;;  %273 = vmatprep.subr.bf16.mxu0 %v509_v0  ;;  %v514_v3 = vld [vmem:[%s780_s1 + $0x10] ss:$8 sps:$4 sm:$0xff]   ;;  %v515_v4 = vld [vmem:[%s780_s1 + $0x24] ss:$8 sps:$4 sm:$0xff]   ;;  %v517_v5 = vld [vmem:[%s780_s1 + $0x20] ss:$8 sps:$4 sm:$0xff]  }
   0x3   :  { %493 = vmatpush1.bf16.msra.mxu1 %v511_v1  ;;  %274 = vmatpush1.bf16.msra.mxu0 %v511_v1  ;;  %v518_v6 = vld [vmem:[%s780_s1 + $0x34] ss:$8 sps:$4 sm:$0xff]   ;;  %v520_v7 = vld [vmem:[%s780_s1 + $0x30] ss:$8 sps:$4 sm:$0xff]   ;;  %v521_v8 = vld [vmem:[%s780_s1 + $0x44] ss:$8 sps:$4 sm:$0xff]  }
   0x4   :  { %478 = vmatprep.subr.bf16.mxu1 %v512_v2  ;;  %275 = vmatprep.subr.bf16.mxu0 %v512_v2  ;;  %v523_v9 = vld [vmem:[%s780_s1 + $0x40] ss:$8 sps:$4 sm:$0xff]   ;;  %v524_v10 = vld [vmem:[%s780_s1 + $0x54] ss:$8 sps:$4 sm:$0xff]   ;;  %v526_v11 = vld [vmem:[%s780_s1 + $0x50] ss:$8 sps:$4 sm:$0xff]  }
   0x5   :  { %v527_v12 = vld [vmem:[%s780_s1 + $0x64] ss:$8 sps:$4 sm:$0xff]   ;;  %v559_v13 = vld [vmem:[%s781_s0 + $0x14] ss:$8 sps:$4 sm:$0xff]   ;;  %v529_v14 = vld [vmem:[%s780_s1 + $0x60] ss:$8 sps:$4 sm:$0xff]  }
   0x6   :  { %v562_v15 = vld [vmem:[%s781_s0 + $0x4] ss:$8 sps:$4 sm:$0xff]   ;;  %v530_v16 = vld [vmem:[%s780_s1 + $0x74] ss:$8 sps:$4 sm:$0xff]   ;;  %315 = vmatprep.mubr.bf16.mxu1 %v559_v13  ;;  %v532_v17 = vld [vmem:[%s780_s1 + $0x70] ss:$8 sps:$4 sm:$0xff]  }
   0x7   :  { %494 = vmatpush1.bf16.msra.mxu1 %v514_v3  ;;  %276 = vmatpush1.bf16.msra.mxu0 %v514_v3  ;;  %v533_v18 = vld [vmem:[%s780_s1 + $0x84] ss:$8 sps:$4 sm:$0xff]   ;;  %v535_v19 = vld [vmem:[%s780_s1 + $0x80] ss:$8 sps:$4 sm:$0xff]   ;;  %v536_v20 = vld [vmem:[%s780_s1 + $0x94] ss:$8 sps:$4 sm:$0xff]  }
   0x8   :  { %479 = vmatprep.subr.bf16.mxu1 %v515_v4  ;;  %277 = vmatprep.subr.bf16.mxu0 %v515_v4  ;;  %v538_v21 = vld [vmem:[%s780_s1 + $0x90] ss:$8 sps:$4 sm:$0xff]   ;;  %v539_v22 = vld [vmem:[%s780_s1 + $0xa4] ss:$8 sps:$4 sm:$0xff]   ;;  %v541_v23 = vld [vmem:[%s780_s1 + $0xa0] ss:$8 sps:$4 sm:$0xff]  }
   0x9   :  { %305 = vmatprep.mubr.bf16.mxu0 %v562_v15  ;;  %v542_v24 = vld [vmem:[%s780_s1 + $0xb4] ss:$8 sps:$4 sm:$0xff]   ;;  %v544_v25 = vld [vmem:[%s780_s1 + $0xb0] ss:$8 sps:$4 sm:$0xff]   ;;  %v545_v26 = vld [vmem:[%s780_s1 + $0xc4] ss:$8 sps:$4 sm:$0xff]  }
   0xa   :  { %v547_v27 = vld [vmem:[%s780_s1 + $0xc0] ss:$8 sps:$4 sm:$0xff]   ;;  %v548_v28 = vld [vmem:[%s780_s1 + $0xd4] ss:$8 sps:$4 sm:$0xff]   ;;  %v550_v29 = vld [vmem:[%s780_s1 + $0xd0] ss:$8 sps:$4 sm:$0xff]  }
   0xb   :  { %495 = vmatpush1.bf16.msra.mxu1 %v517_v5  ;;  %278 = vmatpush1.bf16.msra.mxu0 %v517_v5  ;;  %v551_v30 = vld [vmem:[%s780_s1 + $0xe4] ss:$8 sps:$4 sm:$0xff]   ;;  %v553_v31 = vld [vmem:[%s780_s1 + $0xe0] ss:$8 sps:$4 sm:$0xff]   ;;  %v554_v32 = vld [vmem:[%s780_s1 + $0xf4] ss:$8 sps:$4 sm:$0xff]  }
   0xc   :  { %480 = vmatprep.subr.bf16.mxu1 %v518_v6  ;;  %279 = vmatprep.subr.bf16.mxu0 %v518_v6  ;;  %v556_v33 = vld [vmem:[%s780_s1 + $0xf0] ss:$8 sps:$4 sm:$0xff]   ;;  %v560_v35 = vld [vmem:[%s781_s0] ss:$8 sps:$4 sm:$0xff]   ;;  %v563_v36 = vld [vmem:[%s781_s0 + $0x24] ss:$8 sps:$4 sm:$0xff]  }
   0xd   :  { %v557_v34 = vld [vmem:[%s781_s0 + $0x10] ss:$8 sps:$4 sm:$0xff]   ;;  %v565_v37 = vld [vmem:[%s781_s0 + $0x20] ss:$8 sps:$4 sm:$0xff]   ;;  %v378_v39 = vshrl.u32 %v377_v38, 7 }
   0xe   :  { %v375_v41 = vld [vmem:[%s782_s2] sm:$0x3]  ;;  %v404_v51 = vld [vmem:[%s783_s3 + $0x28] sm:$0xff]  ;;  %v405_v57 = vld [vmem:[%s783_s3 + $0x30] sm:$0xff] }
   0xf   :  { %496 = vmatpush1.bf16.msra.mxu1 %v520_v7  ;;  %280 = vmatpush1.bf16.msra.mxu0 %v520_v7  ;;  %v379_v40 = vsub.s32 0, %v378_v39  ;;  %v383_v42 = vsub.s32 1, %v378_v39  ;;  %v403_v46 = vld [vmem:[%s783_s3 + $0x20] sm:$0xff]  ;;  %v400_v54 = vld [vmem:[%s783_s3 + $0x8] sm:$0xff]  ;;  %v401_v60 = vld [vmem:[%s783_s3 + $0x10] sm:$0xff] }
  0x10   :  { %481 = vmatprep.subr.bf16.mxu1 %v521_v8  ;;  %281 = vmatprep.subr.bf16.mxu0 %v521_v8  ;;  %v399_v48 = vld [vmem:[%s783_s3] sm:$0xff]  ;;  %v406_v0 = vld [vmem:[%s783_s3 + $0x38] sm:$0xff] }
  0x11   :  { %v380_v43 = vrot.slane %v375_v41, %v379_v40  ;;  %v384_v44 = vrot.slane %v375_v41, %v383_v42  ;;  %v402_v4 = vld [vmem:[%s783_s3 + $0x18] sm:$0xff] }
  0x13   :  { %497 = vmatpush1.bf16.msra.mxu1 %v523_v9  ;;  %282 = vmatpush1.bf16.msra.mxu0 %v523_v9 }
  0x14   :  { %482 = vmatprep.subr.bf16.mxu1 %v524_v10  ;;  %283 = vmatprep.subr.bf16.mxu0 %v524_v10 }
  0x17   :  { %498 = vmatpush1.bf16.msra.mxu1 %v526_v11  ;;  %284 = vmatpush1.bf16.msra.mxu0 %v526_v11 }
  0x18   :  { %483 = vmatprep.subr.bf16.mxu1 %v527_v12  ;;  %285 = vmatprep.subr.bf16.mxu0 %v527_v12 }
  0x1b   :  { %499 = vmatpush1.bf16.msra.mxu1 %v529_v14  ;;  %286 = vmatpush1.bf16.msra.mxu0 %v529_v14  ;;  %v407_v14 = vld [vmem:[%s783_s3 + $0x40] sm:$0xff] }
  0x1c   :  { %484 = vmatprep.subr.bf16.mxu1 %v530_v16  ;;  %287 = vmatprep.subr.bf16.mxu0 %v530_v16 }
  0x1f   :  { %500 = vmatpush1.bf16.msra.mxu1 %v532_v17  ;;  %288 = vmatpush1.bf16.msra.mxu0 %v532_v17  ;;  %v408_v17 = vld [vmem:[%s783_s3 + $0x48] sm:$0xff] }
  0x20   :  { %485 = vmatprep.subr.bf16.mxu1 %v533_v18  ;;  %289 = vmatprep.subr.bf16.mxu0 %v533_v18 }
  0x23   :  { %501 = vmatpush1.bf16.msra.mxu1 %v535_v19  ;;  %290 = vmatpush1.bf16.msra.mxu0 %v535_v19 }
  0x24   :  { %486 = vmatprep.subr.bf16.mxu1 %v536_v20  ;;  %291 = vmatprep.subr.bf16.mxu0 %v536_v20  ;;  %v409_v20 = vld [vmem:[%s783_s3 + $0x50] sm:$0xff] }
  0x27   :  { %502 = vmatpush1.bf16.msra.mxu1 %v538_v21  ;;  %292 = vmatpush1.bf16.msra.mxu0 %v538_v21 }
  0x28   :  { %487 = vmatprep.subr.bf16.mxu1 %v539_v22  ;;  %293 = vmatprep.subr.bf16.mxu0 %v539_v22 }
  0x2b   :  { %503 = vmatpush1.bf16.msra.mxu1 %v541_v23  ;;  %294 = vmatpush1.bf16.msra.mxu0 %v541_v23 }
  0x2c   :  { %488 = vmatprep.subr.bf16.mxu1 %v542_v24  ;;  %295 = vmatprep.subr.bf16.mxu0 %v542_v24  ;;  %v410_v24 = vld [vmem:[%s783_s3 + $0x58] sm:$0xff] }
  0x2f   :  { %504 = vmatpush1.bf16.msra.mxu1 %v544_v25  ;;  %296 = vmatpush1.bf16.msra.mxu0 %v544_v25 }
  0x30   :  { %489 = vmatprep.subr.bf16.mxu1 %v545_v26  ;;  %297 = vmatprep.subr.bf16.mxu0 %v545_v26 }
  0x33   :  { %505 = vmatpush1.bf16.msra.mxu1 %v547_v27  ;;  %298 = vmatpush1.bf16.msra.mxu0 %v547_v27 }
  0x34   :  { %490 = vmatprep.subr.bf16.mxu1 %v548_v28  ;;  %299 = vmatprep.subr.bf16.mxu0 %v548_v28 }
  0x37   :  { %506 = vmatpush1.bf16.msra.mxu1 %v550_v29  ;;  %300 = vmatpush1.bf16.msra.mxu0 %v550_v29 }
  0x38   :  { %491 = vmatprep.subr.bf16.mxu1 %v551_v30  ;;  %301 = vmatprep.subr.bf16.mxu0 %v551_v30 }
  0x3b   :  { %507 = vmatpush1.bf16.msra.mxu1 %v553_v31  ;;  %302 = vmatpush1.bf16.msra.mxu0 %v553_v31 }
  0x3c   :  { %492 = vmatprep.subr.bf16.mxu1 %v554_v32  ;;  %303 = vmatprep.subr.bf16.mxu0 %v554_v32 }
  0x3f   :  { %508 = vmatpush1.bf16.msra.mxu1 %v556_v33  ;;  %304 = vmatpush1.bf16.msra.mxu0 %v556_v33 }
  0x42   :  { %316 = vmatmul.mubr.bf16.vlgmr.msra.gmra.mrb[0].mxu1 %v557_v34  ;;  %306 = vmatmul.mubr.bf16.vlgmr.msra.gmra.mrb[0].mxu0 %v560_v35 }
  0x43   :  { %325 = vmatprep.mubr.bf16.mxu1 %v563_v36 }
  0x4a   :  { %326 = vmatmul.mubr.bf16.gmra.mrb[4].mxu1 %v565_v37 }
 0x115   :  { %v317_v45 = vpop.f32.mrb[0].mxu1  ;;  %v307_v47 = vpop.f32.mrb[0].mxu0 }
 0x116   :  { %v391_v49 = vadd.f32 %v380_v43, %v317_v45  ;;  %v319_v50 = vpop.f32.mrb[1].mxu1  ;;  %v387_v52 = vadd.f32 %v380_v43, %v307_v47  ;;  %v309_v53 = vpop.f32.mrb[1].mxu0 }
 0x117   :  { %v392_v55 = vadd.f32 %v384_v44, %v319_v50  ;;  %v321_v56 = vpop.f32.mrb[2].mxu1  ;;  %v388_v58 = vadd.f32 %v384_v44, %v309_v53  ;;  %v311_v59 = vpop.f32.mrb[2].mxu0 }
 0x118   :  { %v415_v61 = vadd.f32 %v403_v46, %v391_v49  ;;  %v393_v62 = vadd.f32 %v380_v43, %v321_v56  ;;  %v323_v63 = vpop.f32.mrb[3].mxu1  ;;  %v411_v1 = vadd.f32 %v399_v48, %v387_v52  ;;  %v389_v2 = vadd.f32 %v380_v43, %v311_v59  ;;  %v313_v3 = vpop.f32.mrb[3].mxu0 }
 0x119   :  { %v416_v5 = vadd.f32 %v404_v51, %v392_v55  ;;  %v394_v6 = vadd.f32 %v384_v44, %v323_v63  ;;  %v412_v7 = vadd.f32 %v400_v54, %v388_v58  ;;  %v390_v8 = vadd.f32 %v384_v44, %v313_v3 }
 0x11a   :  { %427 = vst [vmem:[%s784_s4 + $0x20] sm:$0xff] %v415_v61  ;;  %v417_v9 = vadd.f32 %v405_v57, %v393_v62  ;;  %423 = vst [vmem:[%s784_s4] sm:$0xff] %v411_v1  ;;  %v413_v10 = vadd.f32 %v401_v60, %v389_v2 }
 0x11b   :  { %428 = vst [vmem:[%s784_s4 + $0x28] sm:$0xff] %v416_v5  ;;  %v418_v11 = vadd.f32 %v406_v0, %v394_v6  ;;  %424 = vst [vmem:[%s784_s4 + $0x8] sm:$0xff] %v412_v7  ;;  %v414_v12 = vadd.f32 %v402_v4, %v390_v8 }
 0x11c   :  { %429 = vst [vmem:[%s784_s4 + $0x30] sm:$0xff] %v417_v9  ;;  %425 = vst [vmem:[%s784_s4 + $0x10] sm:$0xff] %v413_v10 }
 0x11d   :  { %430 = vst [vmem:[%s784_s4 + $0x38] sm:$0xff] %v418_v11  ;;  %426 = vst [vmem:[%s784_s4 + $0x18] sm:$0xff] %v414_v12  ;;  %v327_v13 = vpop.f32.mrb[4].mxu1 }
 0x11e   :  { %v395_v15 = vadd.f32 %v380_v43, %v327_v13  ;;  %v329_v16 = vpop.f32.mrb[5].mxu1 }
 0x11f   :  { %v396_v18 = vadd.f32 %v384_v44, %v329_v16  ;;  %v331_v19 = vpop.f32.mrb[6].mxu1 }
 0x120   :  { %v419_v21 = vadd.f32 %v407_v14, %v395_v15  ;;  %v397_v22 = vadd.f32 %v380_v43, %v331_v19  ;;  %v333_v23 = vpop.f32.mrb[7].mxu1 }
 0x121   :  { %v420_v25 = vadd.f32 %v408_v17, %v396_v18  ;;  %v398_v26 = vadd.f32 %v384_v44, %v333_v23 }
 0x122   :  { %431 = vst [vmem:[%s784_s4 + $0x40] sm:$0xff] %v419_v21  ;;  %v421_v27 = vadd.f32 %v409_v20, %v397_v22 }
 0x123   :  { %432 = vst [vmem:[%s784_s4 + $0x48] sm:$0xff] %v420_v25  ;;  %v422_v28 = vadd.f32 %v410_v24, %v398_v26 }
 0x124   :  { %433 = vst [vmem:[%s784_s4 + $0x50] sm:$0xff] %v421_v27 }
 0x125   :  { %434 = vst [vmem:[%s784_s4 + $0x58] sm:$0xff] %v422_v28 }

// kernel: _lambda_.16
= control target key start
LH: loop header
LB: loop body
LE: loop exit
PB: predicated region body
PF: predicated region fallthrough
CT: control target
= control target key end

     0   :  { %s1954_s18 = smov 0   ;;  %s1956_s19 = smov 0   ;;  %s2589_s0 = inlined_call_operand.vmem [shape: f32[48,256], index: 0, kind: input, shape index: {}]   ;;  %s2590_s1 = inlined_call_operand.vmem [shape: f32[1,256], index: 1, kind: input, shape index: {}]   ;;  %s2591_s2 = inlined_call_operand.vmem [shape: f32[1,256], index: 2, kind: input, shape index: {}]   ;;  %s2592_s3 = inlined_call_operand.vmem [shape: bf16[256,1024], index: 3, kind: input, shape index: {}]   ;;  %s2593_s4 = inlined_call_operand.vmem [shape: f32[1,1024], index: 4, kind: input, shape index: {}]   ;;  %s2594_s5 = inlined_call_operand.vmem [shape: bf16[48,1024], index: 5, kind: output, shape index: {}]  }
   0x1   :  { %s1958_s20 = smov 0   ;;  %s1960_s21 = smov 0  }
   0x2   :  { %s1962_s22 = smov 0  }
   0x3 LB: > { %s24_s23 = sadd.s32 1, %s1918_s21  ;;  %s1581_s24 = sadd.s32 4294967295, %s1922_s22   ;;  %s1922_s22 = sphi %s1962_s22, %s15_s22   ;;  %s1918_s21 = sphi %s1960_s21, %s2599_s21   ;;  %s1914_s20 = sphi %s1958_s20, %s2598_s20   ;;  %s1910_s19 = sphi %s1956_s19, %s2597_s19   ;;  %s1906_s18 = sphi %s1954_s18, %s2596_s18  }
   0x4   : > { %p25_p0 = scmp.ge.s32.totalorder %s24_s23, 2  ;;  %p109_p1 = scmp.ne.s32.totalorder %s1910_s19, %s1906_s18 }
   0x5   : > { %p110_p2 = scmp.eq.s32.totalorder %s1922_s22, 0  ;;  %p167_p4 = scmp.eq.s32.totalorder %s1581_s24, 1 }
   0x6   : > { %s2601_s23 = smov (%p25_p0, %s24_s23), 0  ;;  %s102_s26 = sadd.s32 1, %s1910_s19 }
   0x7   : > { %p111_p3 = por %p110_p2, %p109_p1  ;;  %s99_s25 = ssub.s32 %s1918_s21, %s2601_s23 }
   0x8   : > { %p100_p5 = scmp.eq.s32.totalorder %s99_s25, 0  ;;  %p1989_p6 = por %p167_p4, %p109_p1 }
   0x9   : > { %p1585_p7 = scmp.ge.s32.totalorder %s1922_s22, 2 }
   0xa   : > { %s1994_s28 = scalar_select %p100_p5, %s1910_s19, %s102_s26  }
   0xb   : > { %205 = sbr.rel (%p1585_p7) target bundleno = 54 (0x36), region = 28 }
  0x12   : > { %208 = sbr.rel (!%p111_p3) target bundleno = 54 (0x36), region = 32  ;;  %s210_s29 = sand.u32 (%p111_p3), 1, %s1910_s19  }
  0x13   : > { %s1673_s30 = sshll.u32 (%p111_p3), %s1918_s21, 4  ;;  %s1586_s6 = sshll.u32 (%p111_p3), %s210_s29, 9 }
  0x14   : > { %s2002_s9 = scalar_lea.vmem (%p111_p3), %s2592_s3, %s1673_s30  ;;  %s2007_s10 = scalar_lea.vmem (%p111_p3), [#allocation3], %s1586_s6 }
  0x15   : > { %v228_v0 = vld [vmem:[%s2002_s9] sm:$0xff] (%p111_p3)  ;;  %v230_v1 = vld [vmem:[%s2002_s9 + $0x8] sm:$0xff] (%p111_p3) }
  0x16   : > { %v232_v2 = vld [vmem:[%s2002_s9 + $0x20] sm:$0xff] (%p111_p3)  ;;  %229 = vst [vmem:[%s2007_s10] sm:$0xff] (%p111_p3), %v228_v0  ;;  %231 = vst [vmem:[%s2007_s10 + $0x8] sm:$0xff] (%p111_p3), %v230_v1  ;;  %v234_v3 = vld [vmem:[%s2002_s9 + $0x28] sm:$0xff] (%p111_p3) }
  0x17   : > { %233 = vst [vmem:[%s2007_s10 + $0x10] sm:$0xff] (%p111_p3), %v232_v2  ;;  %v236_v4 = vld [vmem:[%s2002_s9 + $0x40] sm:$0xff] (%p111_p3)  ;;  %v238_v5 = vld [vmem:[%s2002_s9 + $0x48] sm:$0xff] (%p111_p3)  ;;  %235 = vst [vmem:[%s2007_s10 + $0x18] sm:$0xff] (%p111_p3), %v234_v3 }
  0x18   : > { %237 = vst [vmem:[%s2007_s10 + $0x20] sm:$0xff] (%p111_p3), %v236_v4  ;;  %239 = vst [vmem:[%s2007_s10 + $0x28] sm:$0xff] (%p111_p3), %v238_v5  ;;  %v240_v6 = vld [vmem:[%s2002_s9 + $0x60] sm:$0xff] (%p111_p3)  ;;  %v242_v7 = vld [vmem:[%s2002_s9 + $0x68] sm:$0xff] (%p111_p3) }
  0x19   : > { %v244_v8 = vld [vmem:[%s2002_s9 + $0x80] sm:$0xff]  ;;  %241 = vst [vmem:[%s2007_s10 + $0x30] sm:$0xff] %v240_v6  ;;  %243 = vst [vmem:[%s2007_s10 + $0x38] sm:$0xff] %v242_v7  ;;  %v246_v9 = vld [vmem:[%s2002_s9 + $0x88] sm:$0xff] }
  0x1a   : > { %245 = vst [vmem:[%s2007_s10 + $0x40] sm:$0xff] %v244_v8  ;;  %v248_v10 = vld [vmem:[%s2002_s9 + $0xa0] sm:$0xff]  ;;  %v250_v11 = vld [vmem:[%s2002_s9 + $0xa8] sm:$0xff]  ;;  %247 = vst [vmem:[%s2007_s10 + $0x48] sm:$0xff] %v246_v9 }
  0x1b   : > { %249 = vst [vmem:[%s2007_s10 + $0x50] sm:$0xff] %v248_v10  ;;  %251 = vst [vmem:[%s2007_s10 + $0x58] sm:$0xff] %v250_v11  ;;  %v252_v12 = vld [vmem:[%s2002_s9 + $0xc0] sm:$0xff]  ;;  %v254_v13 = vld [vmem:[%s2002_s9 + $0xc8] sm:$0xff] }
  0x1c   : > { %v256_v14 = vld [vmem:[%s2002_s9 + $0xe0] sm:$0xff]  ;;  %253 = vst [vmem:[%s2007_s10 + $0x60] sm:$0xff] %v252_v12  ;;  %255 = vst [vmem:[%s2007_s10 + $0x68] sm:$0xff] %v254_v13  ;;  %v258_v15 = vld [vmem:[%s2002_s9 + $0xe8] sm:$0xff] }
  0x1d   : > { %257 = vst [vmem:[%s2007_s10 + $0x70] sm:$0xff] %v256_v14  ;;  %v260_v16 = vld [vmem:[%s2002_s9 + $0x100] sm:$0xff]  ;;  %v262_v17 = vld [vmem:[%s2002_s9 + $0x108] sm:$0xff]  ;;  %259 = vst [vmem:[%s2007_s10 + $0x78] sm:$0xff] %v258_v15 }
  0x1e   : > { %261 = vst [vmem:[%s2007_s10 + $0x80] sm:$0xff] %v260_v16  ;;  %263 = vst [vmem:[%s2007_s10 + $0x88] sm:$0xff] %v262_v17  ;;  %v264_v18 = vld [vmem:[%s2002_s9 + $0x120] sm:$0xff]  ;;  %v266_v19 = vld [vmem:[%s2002_s9 + $0x128] sm:$0xff] }
  0x1f   : > { %v268_v20 = vld [vmem:[%s2002_s9 + $0x140] sm:$0xff]  ;;  %265 = vst [vmem:[%s2007_s10 + $0x90] sm:$0xff] %v264_v18  ;;  %267 = vst [vmem:[%s2007_s10 + $0x98] sm:$0xff] %v266_v19  ;;  %v270_v21 = vld [vmem:[%s2002_s9 + $0x148] sm:$0xff] }
  0x20   : > { %269 = vst [vmem:[%s2007_s10 + $0xa0] sm:$0xff] %v268_v20  ;;  %v272_v22 = vld [vmem:[%s2002_s9 + $0x160] sm:$0xff]  ;;  %v274_v23 = vld [vmem:[%s2002_s9 + $0x168] sm:$0xff]  ;;  %271 = vst [vmem:[%s2007_s10 + $0xa8] sm:$0xff] %v270_v21 }
  0x21   : > { %273 = vst [vmem:[%s2007_s10 + $0xb0] sm:$0xff] %v272_v22  ;;  %275 = vst [vmem:[%s2007_s10 + $0xb8] sm:$0xff] %v274_v23  ;;  %v276_v24 = vld [vmem:[%s2002_s9 + $0x180] sm:$0xff]  ;;  %v278_v25 = vld [vmem:[%s2002_s9 + $0x188] sm:$0xff] }
  0x22   : > { %v280_v26 = vld [vmem:[%s2002_s9 + $0x1a0] sm:$0xff]  ;;  %277 = vst [vmem:[%s2007_s10 + $0xc0] sm:$0xff] %v276_v24  ;;  %279 = vst [vmem:[%s2007_s10 + $0xc8] sm:$0xff] %v278_v25  ;;  %v282_v27 = vld [vmem:[%s2002_s9 + $0x1a8] sm:$0xff] }
  0x23   : > { %281 = vst [vmem:[%s2007_s10 + $0xd0] sm:$0xff] %v280_v26  ;;  %v284_v28 = vld [vmem:[%s2002_s9 + $0x1c0] sm:$0xff]  ;;  %v286_v29 = vld [vmem:[%s2002_s9 + $0x1c8] sm:$0xff]  ;;  %283 = vst [vmem:[%s2007_s10 + $0xd8] sm:$0xff] %v282_v27 }
  0x24   : > { %285 = vst [vmem:[%s2007_s10 + $0xe0] sm:$0xff] %v284_v28  ;;  %287 = vst [vmem:[%s2007_s10 + $0xe8] sm:$0xff] %v286_v29  ;;  %v288_v30 = vld [vmem:[%s2002_s9 + $0x1e0] sm:$0xff]  ;;  %v290_v31 = vld [vmem:[%s2002_s9 + $0x1e8] sm:$0xff] }
  0x25   : > { %v292_v32 = vld [vmem:[%s2002_s9 + $0x200] sm:$0xff]  ;;  %289 = vst [vmem:[%s2007_s10 + $0xf0] sm:$0xff] %v288_v30  ;;  %291 = vst [vmem:[%s2007_s10 + $0xf8] sm:$0xff] %v290_v31  ;;  %v294_v33 = vld [vmem:[%s2002_s9 + $0x208] sm:$0xff] }
  0x26   : > { %293 = vst [vmem:[%s2007_s10 + $0x100] sm:$0xff] %v292_v32  ;;  %v296_v34 = vld [vmem:[%s2002_s9 + $0x220] sm:$0xff]  ;;  %v298_v35 = vld [vmem:[%s2002_s9 + $0x228] sm:$0xff]  ;;  %295 = vst [vmem:[%s2007_s10 + $0x108] sm:$0xff] %v294_v33 }
  0x27   : > { %297 = vst [vmem:[%s2007_s10 + $0x110] sm:$0xff] %v296_v34  ;;  %299 = vst [vmem:[%s2007_s10 + $0x118] sm:$0xff] %v298_v35  ;;  %v300_v36 = vld [vmem:[%s2002_s9 + $0x240] sm:$0xff]  ;;  %v302_v37 = vld [vmem:[%s2002_s9 + $0x248] sm:$0xff] }
  0x28   : > { %v304_v38 = vld [vmem:[%s2002_s9 + $0x260] sm:$0xff]  ;;  %301 = vst [vmem:[%s2007_s10 + $0x120] sm:$0xff] %v300_v36  ;;  %303 = vst [vmem:[%s2007_s10 + $0x128] sm:$0xff] %v302_v37  ;;  %v306_v39 = vld [vmem:[%s2002_s9 + $0x268] sm:$0xff] }
  0x29   : > { %305 = vst [vmem:[%s2007_s10 + $0x130] sm:$0xff] %v304_v38  ;;  %v308_v40 = vld [vmem:[%s2002_s9 + $0x280] sm:$0xff]  ;;  %v310_v41 = vld [vmem:[%s2002_s9 + $0x288] sm:$0xff]  ;;  %307 = vst [vmem:[%s2007_s10 + $0x138] sm:$0xff] %v306_v39 }
  0x2a   : > { %309 = vst [vmem:[%s2007_s10 + $0x140] sm:$0xff] %v308_v40  ;;  %311 = vst [vmem:[%s2007_s10 + $0x148] sm:$0xff] %v310_v41  ;;  %v312_v42 = vld [vmem:[%s2002_s9 + $0x2a0] sm:$0xff]  ;;  %v314_v43 = vld [vmem:[%s2002_s9 + $0x2a8] sm:$0xff] }
  0x2b   : > { %v316_v44 = vld [vmem:[%s2002_s9 + $0x2c0] sm:$0xff]  ;;  %313 = vst [vmem:[%s2007_s10 + $0x150] sm:$0xff] %v312_v42  ;;  %315 = vst [vmem:[%s2007_s10 + $0x158] sm:$0xff] %v314_v43  ;;  %v318_v45 = vld [vmem:[%s2002_s9 + $0x2c8] sm:$0xff] }
  0x2c   : > { %317 = vst [vmem:[%s2007_s10 + $0x160] sm:$0xff] %v316_v44  ;;  %v320_v46 = vld [vmem:[%s2002_s9 + $0x2e0] sm:$0xff]  ;;  %v322_v47 = vld [vmem:[%s2002_s9 + $0x2e8] sm:$0xff]  ;;  %319 = vst [vmem:[%s2007_s10 + $0x168] sm:$0xff] %v318_v45 }
  0x2d   : > { %321 = vst [vmem:[%s2007_s10 + $0x170] sm:$0xff] %v320_v46  ;;  %323 = vst [vmem:[%s2007_s10 + $0x178] sm:$0xff] %v322_v47  ;;  %v324_v48 = vld [vmem:[%s2002_s9 + $0x300] sm:$0xff]  ;;  %v326_v49 = vld [vmem:[%s2002_s9 + $0x308] sm:$0xff] }
  0x2e   : > { %v328_v50 = vld [vmem:[%s2002_s9 + $0x320] sm:$0xff]  ;;  %325 = vst [vmem:[%s2007_s10 + $0x180] sm:$0xff] %v324_v48  ;;  %327 = vst [vmem:[%s2007_s10 + $0x188] sm:$0xff] %v326_v49  ;;  %v330_v51 = vld [vmem:[%s2002_s9 + $0x328] sm:$0xff] }
  0x2f   : > { %329 = vst [vmem:[%s2007_s10 + $0x190] sm:$0xff] %v328_v50  ;;  %v332_v52 = vld [vmem:[%s2002_s9 + $0x340] sm:$0xff]  ;;  %v334_v53 = vld [vmem:[%s2002_s9 + $0x348] sm:$0xff]  ;;  %331 = vst [vmem:[%s2007_s10 + $0x198] sm:$0xff] %v330_v51 }
  0x30   : > { %333 = vst [vmem:[%s2007_s10 + $0x1a0] sm:$0xff] %v332_v52  ;;  %335 = vst [vmem:[%s2007_s10 + $0x1a8] sm:$0xff] %v334_v53  ;;  %v336_v54 = vld [vmem:[%s2002_s9 + $0x360] sm:$0xff]  ;;  %v338_v55 = vld [vmem:[%s2002_s9 + $0x368] sm:$0xff] }
  0x31   : > { %v340_v56 = vld [vmem:[%s2002_s9 + $0x380] sm:$0xff]  ;;  %337 = vst [vmem:[%s2007_s10 + $0x1b0] sm:$0xff] %v336_v54  ;;  %339 = vst [vmem:[%s2007_s10 + $0x1b8] sm:$0xff] %v338_v55  ;;  %v342_v57 = vld [vmem:[%s2002_s9 + $0x388] sm:$0xff] }
  0x32   : > { %341 = vst [vmem:[%s2007_s10 + $0x1c0] sm:$0xff] %v340_v56  ;;  %v344_v58 = vld [vmem:[%s2002_s9 + $0x3a0] sm:$0xff]  ;;  %v346_v59 = vld [vmem:[%s2002_s9 + $0x3a8] sm:$0xff]  ;;  %343 = vst [vmem:[%s2007_s10 + $0x1c8] sm:$0xff] %v342_v57 }
  0x33   : > { %345 = vst [vmem:[%s2007_s10 + $0x1d0] sm:$0xff] %v344_v58  ;;  %347 = vst [vmem:[%s2007_s10 + $0x1d8] sm:$0xff] %v346_v59  ;;  %v348_v60 = vld [vmem:[%s2002_s9 + $0x3c0] sm:$0xff]  ;;  %v350_v61 = vld [vmem:[%s2002_s9 + $0x3c8] sm:$0xff] }
  0x34   : > { %v352_v62 = vld [vmem:[%s2002_s9 + $0x3e0] sm:$0xff]  ;;  %349 = vst [vmem:[%s2007_s10 + $0x1e0] sm:$0xff] %v348_v60  ;;  %351 = vst [vmem:[%s2007_s10 + $0x1e8] sm:$0xff] %v350_v61  ;;  %v354_v63 = vld [vmem:[%s2002_s9 + $0x3e8] sm:$0xff] }
  0x35   : > { %353 = vst [vmem:[%s2007_s10 + $0x1f0] sm:$0xff] %v352_v62  ;;  %355 = vst [vmem:[%s2007_s10 + $0x1f8] sm:$0xff] %v354_v63 }
  0x36 PF: > { %p1589_p8 = scmp.ge.s32.totalorder %s1922_s22, 1  ;;  %p368_p9 = scmp.lt.s32.totalorder %s1922_s22, 3 }
  0x38   : > { %p369_p10 = pnand %p1589_p8, %p368_p9 }
  0x39   : > { %s375_s11 = sand.u32 (!%p369_p10), 1, %s1906_s18   ;;  %s1591_s12 = sshll.u32 (!%p369_p10), %s1914_s20, 2 }
  0x3a   : > { %372 = sbr.rel (%p369_p10) target bundleno = 762 (0x2fa), region = 59  ;;  %s1590_s13 = sshll.u32 (!%p369_p10), %s375_s11, 9 }
  0x3b   : > { %s1687_s14 = smul.u32 (!%p369_p10), 96, %s375_s11  ;;  %p420_p11 = scmp.lt.s32.totalorder (!%p369_p10), %s1591_s12, 7 }
  0x3c   : > { %s2144_s24 = scalar_lea.vmem (!%p369_p10), [#allocation3], %s1590_s13  ;;  %p1592_p12 = scmp.ne.s32.totalorder (!%p369_p10), %s1914_s20, 0 }
  0x3d   : > { %s2146_s25 = scalar_lea.vmem (!%p369_p10), [#allocation4], %s1687_s14 }
  0x41   : > { %s2603_s12 = smov (!%p420_p11, %s1591_s12), 7  ;;  %429 = sbr.rel (%p1592_p12) target bundleno = 398 (0x18e), region = 67 }
  0x42   : > { %s422_s17 = scalar_lea.vmem %s2593_s4, %s2603_s12  ;;  %v430_v0 = vld [vmem:[%s2589_s0] sm:$0xff] (!%p1592_p12)  ;;  %v431_v1 = vld [vmem:[%s2589_s0 + $0x8] sm:$0xff] (!%p1592_p12)  ;;  %v432_v5 = vld [vmem:[%s2589_s0 + $0x10] sm:$0xff] (!%p1592_p12)  ;;  %v541_v62 = vlaneseq (!%p1592_p12) }
  0x43   : > { %v434_v2 = vld [vmem:[%s2589_s0 + $0x20] sm:$0xff] (!%p1592_p12)  ;;  %v442_v3 = vadd.f32 (!%p1592_p12), %v431_v1, %v430_v0  ;;  %v435_v4 = vld [vmem:[%s2589_s0 + $0x28] sm:$0xff] (!%p1592_p12)  ;;  %v433_v6 = vld [vmem:[%s2589_s0 + $0x18] sm:$0xff] (!%p1592_p12) }
  0x44   : > { %v448_v7 = vadd.f32 (!%p1592_p12), %v435_v4, %v434_v2  ;;  %v436_v8 = vld [vmem:[%s2589_s0 + $0x30] sm:$0xff] (!%p1592_p12)  ;;  %v437_v9 = vld [vmem:[%s2589_s0 + $0x38] sm:$0xff] (!%p1592_p12)  ;;  %v445_v10 = vadd.f32 (!%p1592_p12), %v433_v6, %v432_v5  ;;  %v438_v12 = vld [vmem:[%s2589_s0 + $0x40] sm:$0xff] (!%p1592_p12) }
  0x45   : > { %443 = vadd.xlane.f32.xlu0 (!%p1592_p12), %v442_v3  ;;  %v451_v11 = vadd.f32 (!%p1592_p12), %v437_v9, %v436_v8  ;;  %v439_v13 = vld [vmem:[%s2589_s0 + $0x48] sm:$0xff] (!%p1592_p12)  ;;  %v440_v14 = vld [vmem:[%s2589_s0 + $0x50] sm:$0xff] (!%p1592_p12)  ;;  %v441_v15 = vld [vmem:[%s2589_s0 + $0x58] sm:$0xff] (!%p1592_p12) }
  0x46   : > { %449 = vadd.xlane.f32.xlu1 (!%p1592_p12), %v448_v7  ;;  %v454_v16 = vadd.f32 (!%p1592_p12), %v439_v13, %v438_v12  ;;  %v457_v17 = vadd.f32 (!%p1592_p12), %v441_v15, %v440_v14 }
  0x49   : > { %446 = vadd.xlane.f32.xlu0 %v445_v10 }
  0x4a   : > { %452 = vadd.xlane.f32.xlu1 %v451_v11 }
  0x4d   : > { %455 = vadd.xlane.f32.xlu0 %v454_v16 }
  0x4e   : > { %458 = vadd.xlane.f32.xlu1 %v457_v17 }
  0xd2   : > { %v444_v18 = vpop.xlane.xlu0 %443 }
  0xd3   : > { %v461_v19 = vmul.f32 0.00390625, %v444_v18  ;;  %v450_v20 = vpop.xlane.xlu1 %449 }
  0xd4   : > { %v463_v21 = vmul.f32 0.00390625, %v450_v20 }
  0xd5   : > { %v2185_v22 = vsub.f32 %v430_v0, %v461_v19  ;;  %v2187_v23 = vsub.f32 %v431_v1, %v461_v19 }
  0xd6   : > { %v2189_v24 = vsub.f32 %v434_v2, %v463_v21  ;;  %v2191_v25 = vsub.f32 %v435_v4, %v463_v21  ;;  %v447_v26 = vpop.xlane.xlu0 %446  ;;  %v542_v4 = vshrl.u32 %v541_v62, 7 }
  0xd7   : > { %v462_v27 = vmul.f32 0.00390625, %v447_v26  ;;  %v453_v28 = vpop.xlane.xlu1 %452  ;;  %v479_v29 = vmul.f32 %v2185_v22, %v2185_v22  ;;  %v480_v30 = vmul.f32 %v2187_v23, %v2187_v23  ;;  %v563_v26 = vld [vmem:[%s2591_s2] sm:$0x3] }
  0xd8   : > { %v464_v31 = vmul.f32 0.00390625, %v453_v28  ;;  %v483_v32 = vmul.f32 %v2189_v24, %v2189_v24  ;;  %v484_v33 = vmul.f32 %v2191_v25, %v2191_v25  ;;  %v543_v11 = vsub.s32 0, %v542_v4 }
  0xd9   : > { %v2201_v34 = vsub.f32 %v432_v5, %v462_v27  ;;  %v2203_v35 = vsub.f32 %v433_v6, %v462_v27  ;;  %v491_v36 = vadd.f32 %v480_v30, %v479_v29 }
  0xda   : > { %v2205_v37 = vsub.f32 %v436_v8, %v464_v31  ;;  %v2207_v38 = vsub.f32 %v437_v9, %v464_v31  ;;  %v456_v39 = vpop.xlane.xlu0 %455  ;;  %v497_v42 = vadd.f32 %v484_v33, %v483_v32  ;;  %v568_v30 = vrot.slane %v563_v26, %v543_v11 }
  0xdb   : > { %v465_v40 = vmul.f32 0.00390625, %v456_v39  ;;  %492 = vadd.xlane.f32.xlu0 %v491_v36  ;;  %v459_v41 = vpop.xlane.xlu1 %458  ;;  %v481_v43 = vmul.f32 %v2201_v34, %v2201_v34  ;;  %v482_v44 = vmul.f32 %v2203_v35, %v2203_v35 }
  0xdc   : > { %v466_v45 = vmul.f32 0.00390625, %v459_v41  ;;  %v485_v46 = vmul.f32 %v2205_v37, %v2205_v37  ;;  %v486_v47 = vmul.f32 %v2207_v38, %v2207_v38 }
  0xdd   : > { %v2217_v48 = vsub.f32 %v438_v12, %v465_v40  ;;  %v2219_v49 = vsub.f32 %v439_v13, %v465_v40  ;;  %v494_v50 = vadd.f32 %v482_v44, %v481_v43  ;;  %v547_v12 = vsub.s32 1, %v542_v4 }
  0xde   : > { %v2221_v51 = vsub.f32 %v440_v14, %v466_v45  ;;  %v2223_v52 = vsub.f32 %v441_v15, %v466_v45  ;;  %v500_v53 = vadd.f32 %v486_v47, %v485_v46  ;;  %v539_v15 = vld [vmem:[%s2590_s1] sm:$0x3] }
  0xdf   : > { %498 = vadd.xlane.f32.xlu0 %v497_v42  ;;  %495 = vadd.xlane.f32.xlu1 %v494_v50  ;;  %v487_v54 = vmul.f32 %v2217_v48, %v2217_v48  ;;  %v488_v55 = vmul.f32 %v2219_v49, %v2219_v49  ;;  %v544_v19 = vrot.slane %v539_v15, %v543_v11 }
  0xe0   : > { %v489_v56 = vmul.f32 %v2221_v51, %v2221_v51  ;;  %v490_v57 = vmul.f32 %v2223_v52, %v2223_v52  ;;  %v548_v20 = vrot.slane %v539_v15, %v547_v12  ;;  %v572_v31 = vrot.slane %v563_v26, %v547_v12 }
  0xe1   : > { %v503_v58 = vadd.f32 %v488_v55, %v487_v54 }
  0xe2   : > { %v506_v59 = vadd.f32 %v490_v57, %v489_v56 }
  0xe3   : > { %501 = vadd.xlane.f32.xlu1 %v500_v53  ;;  %504 = vadd.xlane.f32.xlu0 %v503_v58 }
  0xe7   : > { %507 = vadd.xlane.f32.xlu1 %v506_v59 }
 0x168   : > { %v493_v60 = vpop.xlane.xlu0 %492 }
 0x169   : > { %v509_v61 = vmul.f32 0.00390625, %v493_v60 }
 0x16b   : > { %v515_v63 = vadd.f32 1e-06, %v509_v61 }
 0x16c   : > { %v496_v0 = vpop.xlane.xlu1 %495  ;;  %v499_v1 = vpop.xlane.xlu0 %498 }
 0x16d   : > { %1728 = vrsqrt.f32 %v515_v63  ;;  %v510_v2 = vmul.f32 0.00390625, %v496_v0  ;;  %v511_v3 = vmul.f32 0.00390625, %v499_v1 }
 0x16f   : > { %v516_v5 = vadd.f32 1e-06, %v510_v2  ;;  %v517_v6 = vadd.f32 1e-06, %v511_v3 }
 0x170   : > { %v502_v7 = vpop.xlane.xlu1 %501  ;;  %v505_v8 = vpop.xlane.xlu0 %504 }
 0x171   : > { %1730 = vrsqrt.f32 %v516_v5  ;;  %v512_v9 = vmul.f32 0.00390625, %v502_v7  ;;  %v513_v10 = vmul.f32 0.00390625, %v505_v8 }
 0x172   : > { %1732 = vrsqrt.f32 %v517_v6 }
 0x173   : > { %v518_v13 = vadd.f32 1e-06, %v512_v9  ;;  %v519_v14 = vadd.f32 1e-06, %v513_v10 }
 0x174   : > { %v508_v16 = vpop.xlane.xlu1 %507 }
 0x175   : > { %1734 = vrsqrt.f32 %v518_v13  ;;  %v514_v17 = vmul.f32 0.00390625, %v508_v16 }
 0x176   : > { %1736 = vrsqrt.f32 %v519_v14 }
 0x177   : > { %v1729_v18 = vpop.eup %1728  ;;  %v520_v21 = vadd.f32 1e-06, %v514_v17 }
 0x178   : > { %v527_v27 = vmul.f32 %v1729_v18, %v2185_v22  ;;  %v528_v28 = vmul.f32 %v1729_v18, %v2187_v23 }
 0x179   : > { %1738 = vrsqrt.f32 %v520_v21 }
 0x17a   : > { %v551_v32 = vmul.f32 %v544_v19, %v527_v27  ;;  %v552_v33 = vmul.f32 %v548_v20, %v528_v28 }
 0x17b   : > { %v1731_v29 = vpop.eup %1730 }
 0x17c   : > { %v1733_v36 = vpop.eup %1732  ;;  %v529_v39 = vmul.f32 %v1731_v29, %v2201_v34  ;;  %v530_v40 = vmul.f32 %v1731_v29, %v2203_v35  ;;  %v575_v45 = vadd.f32 %v568_v30, %v551_v32  ;;  %v576_v23 = vadd.f32 %v572_v31, %v552_v33 }
 0x17d   : > { %v531_v41 = vmul.f32 %v1733_v36, %v2189_v24  ;;  %v532_v42 = vmul.f32 %v1733_v36, %v2191_v25 }
 0x17e   : > { %v553_v43 = vmul.f32 %v544_v19, %v529_v39  ;;  %v554_v44 = vmul.f32 %v548_v20, %v530_v40 }
 0x17f   : > { %v1735_v22 = vpop.eup %1734  ;;  %v555_v46 = vmul.f32 %v544_v19, %v531_v41  ;;  %v556_v47 = vmul.f32 %v548_v20, %v532_v42 }
 0x180   : > { %v1737_v50 = vpop.eup %1736  ;;  %v577_v53 = vadd.f32 %v568_v30, %v553_v43  ;;  %v578_v54 = vadd.f32 %v572_v31, %v554_v44  ;;  %v533_v55 = vmul.f32 %v1735_v22, %v2205_v37  ;;  %v534_v34 = vmul.f32 %v1735_v22, %v2207_v38 }
 0x181   : > { %v535_v35 = vmul.f32 %v1737_v50, %v2217_v48  ;;  %v536_v24 = vmul.f32 %v1737_v50, %v2219_v49  ;;  %v579_v60 = vadd.f32 %v568_v30, %v555_v46  ;;  %v580_v61 = vadd.f32 %v572_v31, %v556_v47 }
 0x182   : > { %v587_v56 = vpack.c.bf16 %v577_v53, %v575_v45  ;;  %v588_v25 = vpack.c.bf16 %v578_v54, %v576_v23  ;;  %v557_v57 = vmul.f32 %v544_v19, %v533_v55  ;;  %v558_v58 = vmul.f32 %v548_v20, %v534_v34 }
 0x183   : > { %v1739_v59 = vpop.eup %1738  ;;  %v559_v62 = vmul.f32 %v544_v19, %v535_v35  ;;  %v560_v63 = vmul.f32 %v548_v20, %v536_v24 }
 0x184   : > { %593 = vst [vmem:[#allocation2] sm:$0xff] %v587_v56  ;;  %594 = vst [vmem:[#allocation2 + $0x8] sm:$0xff] %v588_v25  ;;  %v581_v0 = vadd.f32 %v568_v30, %v557_v57  ;;  %v582_v1 = vadd.f32 %v572_v31, %v558_v58  ;;  %v537_v37 = vmul.f32 %v1739_v59, %v2221_v51 }
 0x185   : > { %v538_v38 = vmul.f32 %v1739_v59, %v2223_v52  ;;  %v583_v4 = vadd.f32 %v568_v30, %v559_v62  ;;  %v584_v5 = vadd.f32 %v572_v31, %v560_v63 }
 0x186   : > { %v589_v48 = vpack.c.bf16 %v581_v0, %v579_v60  ;;  %v590_v2 = vpack.c.bf16 %v582_v1, %v580_v61  ;;  %v561_v49 = vmul.f32 %v544_v19, %v537_v37 }
 0x187   : > { %v562_v3 = vmul.f32 %v548_v20, %v538_v38 }
 0x188   : > { %595 = vst [vmem:[#allocation2 + $0x10] sm:$0xff] %v589_v48  ;;  %596 = vst [vmem:[#allocation2 + $0x18] sm:$0xff] %v590_v2  ;;  %v585_v6 = vadd.f32 %v568_v30, %v561_v49 }
 0x189   : > { %v586_v7 = vadd.f32 %v572_v31, %v562_v3 }
 0x18a   : > { %v591_v8 = vpack.c.bf16 %v585_v6, %v583_v4 }
 0x18b   : > { %v592_v9 = vpack.c.bf16 %v586_v7, %v584_v5 }
 0x18c   : > { %597 = vst [vmem:[#allocation2 + $0x20] sm:$0xff] %v591_v8 }
 0x18d   : > { %598 = vst [vmem:[#allocation2 + $0x28] sm:$0xff] %v592_v9 }
 0x18e PF: > { %v1740_v51 = vld [vmem:[%s2144_s24 + $0x4] ss:$16 sps:$4 sm:$0xff]   ;;  %v1742_v52 = vld [vmem:[%s2144_s24 + $0xc] ss:$16 sps:$4 sm:$0xff]   ;;  %v1744_v10 = vld [vmem:[%s2144_s24] ss:$16 sps:$4 sm:$0xff]  }
 0x18f   : > { %1011 = vmatprep.subr.bf16.mxu0 %v1740_v51  ;;  %v1745_v11 = vld [vmem:[%s2144_s24 + $0x8] ss:$16 sps:$4 sm:$0xff]   ;;  %1074 = vmatprep.subr.bf16.mxu1 %v1742_v52  ;;  %v1746_v12 = vld [vmem:[%s2144_s24 + $0x24] ss:$16 sps:$4 sm:$0xff]   ;;  %v1748_v13 = vld [vmem:[%s2144_s24 + $0x2c] ss:$16 sps:$4 sm:$0xff]  }
 0x190   : > { %1012 = vmatpush1.bf16.msra.mxu0 %v1744_v10  ;;  %1075 = vmatpush1.bf16.msra.mxu1 %v1745_v11  ;;  %v1750_v14 = vld [vmem:[%s2144_s24 + $0x20] ss:$16 sps:$4 sm:$0xff]   ;;  %v1751_v15 = vld [vmem:[%s2144_s24 + $0x28] ss:$16 sps:$4 sm:$0xff]   ;;  %v1752_v16 = vld [vmem:[%s2144_s24 + $0x44] ss:$16 sps:$4 sm:$0xff]  }
 0x191   : > { %1013 = vmatprep.subr.bf16.mxu0 %v1746_v12  ;;  %1076 = vmatprep.subr.bf16.mxu1 %v1748_v13  ;;  %v1754_v17 = vld [vmem:[%s2144_s24 + $0x4c] ss:$16 sps:$4 sm:$0xff]   ;;  %v1756_v18 = vld [vmem:[%s2144_s24 + $0x40] ss:$16 sps:$4 sm:$0xff]   ;;  %v1757_v19 = vld [vmem:[%s2144_s24 + $0x48] ss:$16 sps:$4 sm:$0xff]  }
 0x192   : > { %v1758_v20 = vld [vmem:[%s2144_s24 + $0x64] ss:$16 sps:$4 sm:$0xff]   ;;  %v1760_v21 = vld [vmem:[%s2144_s24 + $0x6c] ss:$16 sps:$4 sm:$0xff]   ;;  %v1762_v26 = vld [vmem:[%s2144_s24 + $0x60] ss:$16 sps:$4 sm:$0xff]  }
 0x193   : > { %v1763_v27 = vld [vmem:[%s2144_s24 + $0x68] ss:$16 sps:$4 sm:$0xff]   ;;  %v1764_v28 = vld [vmem:[%s2144_s24 + $0x84] ss:$16 sps:$4 sm:$0xff]   ;;  %v1766_v29 = vld [vmem:[%s2144_s24 + $0x8c] ss:$16 sps:$4 sm:$0xff]  }
 0x194   : > { %1014 = vmatpush1.bf16.msra.mxu0 %v1750_v14  ;;  %1077 = vmatpush1.bf16.msra.mxu1 %v1751_v15  ;;  %v1768_v30 = vld [vmem:[%s2144_s24 + $0x80] ss:$16 sps:$4 sm:$0xff]   ;;  %v1769_v31 = vld [vmem:[%s2144_s24 + $0x88] ss:$16 sps:$4 sm:$0xff]   ;;  %v1770_v32 = vld [vmem:[%s2144_s24 + $0xa4] ss:$16 sps:$4 sm:$0xff]   ;;  %v671_v14 = vlaneseq }
 0x195   : > { %1015 = vmatprep.subr.bf16.mxu0 %v1752_v16  ;;  %1078 = vmatprep.subr.bf16.mxu1 %v1754_v17  ;;  %v1772_v33 = vld [vmem:[%s2144_s24 + $0xac] ss:$16 sps:$4 sm:$0xff]   ;;  %v1774_v36 = vld [vmem:[%s2144_s24 + $0xa0] ss:$16 sps:$4 sm:$0xff]   ;;  %v1775_v39 = vld [vmem:[%s2144_s24 + $0xa8] ss:$16 sps:$4 sm:$0xff]  }
 0x196   : > { %v1776_v40 = vld [vmem:[%s2144_s24 + $0xc4] ss:$16 sps:$4 sm:$0xff]   ;;  %v1778_v41 = vld [vmem:[%s2144_s24 + $0xcc] ss:$16 sps:$4 sm:$0xff]   ;;  %v1780_v42 = vld [vmem:[%s2144_s24 + $0xc0] ss:$16 sps:$4 sm:$0xff]  }
 0x197   : > { %v1781_v43 = vld [vmem:[%s2144_s24 + $0xc8] ss:$16 sps:$4 sm:$0xff]   ;;  %v1782_v44 = vld [vmem:[%s2144_s24 + $0xe4] ss:$16 sps:$4 sm:$0xff]   ;;  %v1784_v22 = vld [vmem:[%s2144_s24 + $0xec] ss:$16 sps:$4 sm:$0xff]  }
 0x198   : > { %1016 = vmatpush1.bf16.msra.mxu0 %v1756_v18  ;;  %1079 = vmatpush1.bf16.msra.mxu1 %v1757_v19  ;;  %v1786_v45 = vld [vmem:[%s2144_s24 + $0xe0] ss:$16 sps:$4 sm:$0xff]   ;;  %v1787_v23 = vld [vmem:[%s2144_s24 + $0xe8] ss:$16 sps:$4 sm:$0xff]   ;;  %v1788_v46 = vld [vmem:[%s2144_s24 + $0x104] ss:$16 sps:$4 sm:$0xff]  }
 0x199   : > { %1017 = vmatprep.subr.bf16.mxu0 %v1758_v20  ;;  %1080 = vmatprep.subr.bf16.mxu1 %v1760_v21  ;;  %v1790_v47 = vld [vmem:[%s2144_s24 + $0x10c] ss:$16 sps:$4 sm:$0xff]   ;;  %v1792_v50 = vld [vmem:[%s2144_s24 + $0x100] ss:$16 sps:$4 sm:$0xff]   ;;  %v1793_v53 = vld [vmem:[%s2144_s24 + $0x108] ss:$16 sps:$4 sm:$0xff]  }
 0x19a   : > { %v1794_v54 = vld [vmem:[%s2144_s24 + $0x124] ss:$16 sps:$4 sm:$0xff]   ;;  %v1796_v55 = vld [vmem:[%s2144_s24 + $0x12c] ss:$16 sps:$4 sm:$0xff]   ;;  %v1798_v34 = vld [vmem:[%s2144_s24 + $0x120] ss:$16 sps:$4 sm:$0xff]  }
 0x19b   : > { %v1799_v35 = vld [vmem:[%s2144_s24 + $0x128] ss:$16 sps:$4 sm:$0xff]   ;;  %v1800_v24 = vld [vmem:[%s2144_s24 + $0x144] ss:$16 sps:$4 sm:$0xff]   ;;  %v1802_v56 = vld [vmem:[%s2144_s24 + $0x14c] ss:$16 sps:$4 sm:$0xff]  }
 0x19c   : > { %1018 = vmatpush1.bf16.msra.mxu0 %v1762_v26  ;;  %1081 = vmatpush1.bf16.msra.mxu1 %v1763_v27  ;;  %v1804_v25 = vld [vmem:[%s2144_s24 + $0x140] ss:$16 sps:$4 sm:$0xff]   ;;  %v1805_v57 = vld [vmem:[%s2144_s24 + $0x148] ss:$16 sps:$4 sm:$0xff]   ;;  %v1806_v58 = vld [vmem:[%s2144_s24 + $0x164] ss:$16 sps:$4 sm:$0xff]  }
 0x19d   : > { %1019 = vmatprep.subr.bf16.mxu0 %v1764_v28  ;;  %1082 = vmatprep.subr.bf16.mxu1 %v1766_v29  ;;  %v1808_v59 = vld [vmem:[%s2144_s24 + $0x16c] ss:$16 sps:$4 sm:$0xff]   ;;  %v1810_v61 = vld [vmem:[%s2144_s24 + $0x160] ss:$16 sps:$4 sm:$0xff]   ;;  %v1811_v62 = vld [vmem:[%s2144_s24 + $0x168] ss:$16 sps:$4 sm:$0xff]  }
 0x19e   : > { %v600_v60 = vld [vmem:[#allocation2 + $0x8] sm:$0xff]  ;;  %v1812_v63 = vld [vmem:[%s2144_s24 + $0x184] ss:$16 sps:$4 sm:$0xff]   ;;  %v1816_v1 = vld [vmem:[%s2144_s24 + $0x180] ss:$16 sps:$4 sm:$0xff]   ;;  %v672_v15 = vshrl.u32 %v671_v14, 7 }
 0x19f   : > { %1043 = vmatprep.mubr.bf16.mxu0 %v600_v60  ;;  %1106 = vmatprep.mubr.bf16.mxu1 %v600_v60  ;;  %v1814_v0 = vld [vmem:[%s2144_s24 + $0x18c] ss:$16 sps:$4 sm:$0xff]   ;;  %v1817_v37 = vld [vmem:[%s2144_s24 + $0x188] ss:$16 sps:$4 sm:$0xff]   ;;  %v1818_v38 = vld [vmem:[%s2144_s24 + $0x1a4] ss:$16 sps:$4 sm:$0xff]  }
 0x1a0   : > { %1020 = vmatpush1.bf16.msra.mxu0 %v1768_v30  ;;  %1083 = vmatpush1.bf16.msra.mxu1 %v1769_v31  ;;  %v1820_v48 = vld [vmem:[%s2144_s24 + $0x1ac] ss:$16 sps:$4 sm:$0xff]   ;;  %v1822_v2 = vld [vmem:[%s2144_s24 + $0x1a0] ss:$16 sps:$4 sm:$0xff]   ;;  %v1823_v49 = vld [vmem:[%s2144_s24 + $0x1a8] ss:$16 sps:$4 sm:$0xff]  }
 0x1a1   : > { %1021 = vmatprep.subr.bf16.mxu0 %v1770_v32  ;;  %1084 = vmatprep.subr.bf16.mxu1 %v1772_v33  ;;  %v1824_v3 = vld [vmem:[%s2144_s24 + $0x1c4] ss:$16 sps:$4 sm:$0xff]   ;;  %v1826_v4 = vld [vmem:[%s2144_s24 + $0x1cc] ss:$16 sps:$4 sm:$0xff]   ;;  %v1828_v5 = vld [vmem:[%s2144_s24 + $0x1c0] ss:$16 sps:$4 sm:$0xff]  }
 0x1a2   : > { %v1829_v6 = vld [vmem:[%s2144_s24 + $0x1c8] ss:$16 sps:$4 sm:$0xff]   ;;  %v1830_v7 = vld [vmem:[%s2144_s24 + $0x1e4] ss:$16 sps:$4 sm:$0xff]   ;;  %v1832_v8 = vld [vmem:[%s2144_s24 + $0x1ec] ss:$16 sps:$4 sm:$0xff]  }
 0x1a3   : > { %v1834_v9 = vld [vmem:[%s2144_s24 + $0x1e0] ss:$16 sps:$4 sm:$0xff]   ;;  %v1835_v51 = vld [vmem:[%s2144_s24 + $0x1e8] ss:$16 sps:$4 sm:$0xff]   ;;  %v673_v16 = vsub.s32 0, %v672_v15  ;;  %v681_v17 = vsub.s32 2, %v672_v15 }
 0x1a4   : > { %1022 = vmatpush1.bf16.msra.mxu0 %v1774_v36  ;;  %1085 = vmatpush1.bf16.msra.mxu1 %v1775_v39  ;;  %v599_v52 = vld [vmem:[#allocation2] sm:$0xff]  ;;  %v602_v10 = vld [vmem:[#allocation2 + $0x18] sm:$0xff]  ;;  %v601_v11 = vld [vmem:[#allocation2 + $0x10] sm:$0xff]  ;;  %v677_v19 = vsub.s32 1, %v672_v15  ;;  %v685_v20 = vsub.s32 3, %v672_v15  ;;  %s1686_s12 = sshll.u32 (%p1989_p6), %s1914_s20, 4 }
 0x1a5   : > { %1023 = vmatprep.subr.bf16.mxu0 %v1776_v40  ;;  %1086 = vmatprep.subr.bf16.mxu1 %v1778_v41  ;;  %v604_v12 = vld [vmem:[#allocation2 + $0x28] sm:$0xff]  ;;  %v603_v13 = vld [vmem:[#allocation2 + $0x20] sm:$0xff]  ;;  %s1449_s29 = scalar_lea.vmem (%p1989_p6), %s2594_s5, %s1686_s12 }
 0x1a6   : > { %v669_v18 = vld [vmem:[%s422_s17] sm:$0xf] }
 0x1a7   : > { %v2320_v21 = vrot.slane %v669_v18, %v673_v16  ;;  %v2322_v26 = vrot.slane %v669_v18, %v681_v17  ;;  %v2324_v27 = vrot.slane %v669_v18, %v677_v19  ;;  %v2326_v28 = vrot.slane %v669_v18, %v685_v20 }
 0x1a8   : > { %1024 = vmatpush1.bf16.msra.mxu0 %v1780_v42  ;;  %1087 = vmatpush1.bf16.msra.mxu1 %v1781_v43 }
 0x1a9   : > { %1025 = vmatprep.subr.bf16.mxu0 %v1782_v44  ;;  %1088 = vmatprep.subr.bf16.mxu1 %v1784_v22 }
 0x1ac   : > { %1026 = vmatpush1.bf16.msra.mxu0 %v1786_v45  ;;  %1089 = vmatpush1.bf16.msra.mxu1 %v1787_v23 }
 0x1ad   : > { %1027 = vmatprep.subr.bf16.mxu0 %v1788_v46  ;;  %1090 = vmatprep.subr.bf16.mxu1 %v1790_v47 }
 0x1b0   : > { %1028 = vmatpush1.bf16.msra.mxu0 %v1792_v50  ;;  %1091 = vmatpush1.bf16.msra.mxu1 %v1793_v53 }
 0x1b1   : > { %1029 = vmatprep.subr.bf16.mxu0 %v1794_v54  ;;  %1092 = vmatprep.subr.bf16.mxu1 %v1796_v55 }
 0x1b4   : > { %1030 = vmatpush1.bf16.msra.mxu0 %v1798_v34  ;;  %1093 = vmatpush1.bf16.msra.mxu1 %v1799_v35 }
 0x1b5   : > { %1031 = vmatprep.subr.bf16.mxu0 %v1800_v24  ;;  %1094 = vmatprep.subr.bf16.mxu1 %v1802_v56 }
 0x1b8   : > { %1032 = vmatpush1.bf16.msra.mxu0 %v1804_v25  ;;  %1095 = vmatpush1.bf16.msra.mxu1 %v1805_v57 }
 0x1b9   : > { %1033 = vmatprep.subr.bf16.mxu0 %v1806_v58  ;;  %1096 = vmatprep.subr.bf16.mxu1 %v1808_v59 }
 0x1bc   : > { %1034 = vmatpush1.bf16.msra.mxu0 %v1810_v61  ;;  %1097 = vmatpush1.bf16.msra.mxu1 %v1811_v62 }
 0x1bd   : > { %1035 = vmatprep.subr.bf16.mxu0 %v1812_v63  ;;  %1098 = vmatprep.subr.bf16.mxu1 %v1814_v0 }
 0x1c0   : > { %1036 = vmatpush1.bf16.msra.mxu0 %v1816_v1  ;;  %1099 = vmatpush1.bf16.msra.mxu1 %v1817_v37 }
 0x1c1   : > { %1037 = vmatprep.subr.bf16.mxu0 %v1818_v38  ;;  %1100 = vmatprep.subr.bf16.mxu1 %v1820_v48 }
 0x1c4   : > { %1038 = vmatpush1.bf16.msra.mxu0 %v1822_v2  ;;  %1101 = vmatpush1.bf16.msra.mxu1 %v1823_v49 }
 0x1c5   : > { %1039 = vmatprep.subr.bf16.mxu0 %v1824_v3  ;;  %1102 = vmatprep.subr.bf16.mxu1 %v1826_v4 }
 0x1c8   : > { %1040 = vmatpush1.bf16.msra.mxu0 %v1828_v5  ;;  %1103 = vmatpush1.bf16.msra.mxu1 %v1829_v6 }
 0x1c9   : > { %1041 = vmatprep.subr.bf16.mxu0 %v1830_v7  ;;  %1104 = vmatprep.subr.bf16.mxu1 %v1832_v8 }
 0x1cc   : > { %1042 = vmatpush1.bf16.msra.mxu0 %v1834_v9  ;;  %1105 = vmatpush1.bf16.msra.mxu1 %v1835_v51 }
 0x1cf   : > { %1044 = vmatmul.mubr.bf16.vlgmr.msra.gmra.mrb[0].mxu0 %v599_v52  ;;  %1107 = vmatmul.mubr.bf16.vlgmr.msra.gmra.mrb[0].mxu1 %v599_v52 }
 0x1d0   : > { %1053 = vmatprep.mubr.bf16.mxu0 %v602_v10  ;;  %1116 = vmatprep.mubr.bf16.mxu1 %v602_v10 }
 0x1d7   : > { %1054 = vmatmul.mubr.bf16.gmra.mrb[4].mxu0 %v601_v11  ;;  %1117 = vmatmul.mubr.bf16.gmra.mrb[4].mxu1 %v601_v11 }
 0x1d8   : > { %1063 = vmatprep.mubr.bf16.mxu0 %v604_v12  ;;  %1126 = vmatprep.mubr.bf16.mxu1 %v604_v12 }
 0x1df   : > { %1064 = vmatmul.mubr.bf16.gmra.mrb[8].mxu0 %v603_v13  ;;  %1127 = vmatmul.mubr.bf16.gmra.mrb[8].mxu1 %v603_v13 }
 0x2a2   : > { %v1045_v29 = vpop.f32.mrb[0].mxu0  ;;  %v1108_v30 = vpop.f32.mrb[0].mxu1 }
 0x2a3   : > { %v2329_v31 = vadd.f32 %v1045_v29, %v2320_v21  ;;  %v2332_v32 = vadd.f32 %v1108_v30, %v2322_v26  ;;  %v1047_v33 = vpop.f32.mrb[1].mxu0  ;;  %v1110_v36 = vpop.f32.mrb[1].mxu1 }
 0x2a4   : > { %v2335_v39 = vadd.f32 %v1047_v33, %v2324_v27  ;;  %v2338_v40 = vadd.f32 %v1110_v36, %v2326_v28  ;;  %v1049_v41 = vpop.f32.mrb[2].mxu0  ;;  %v1112_v42 = vpop.f32.mrb[2].mxu1 }
 0x2a5   : > { %v1137_v43 = vmul.f32 %v2329_v31, %v2329_v31  ;;  %v1139_v44 = vmul.f32 %v2332_v32, %v2332_v32  ;;  %v2345_v22 = vadd.f32 %v1049_v41, %v2320_v21  ;;  %v2348_v45 = vadd.f32 %v1112_v42, %v2322_v26  ;;  %v1051_v23 = vpop.f32.mrb[3].mxu0  ;;  %v1114_v46 = vpop.f32.mrb[3].mxu1 }
 0x2a6   : > { %v1138_v47 = vmul.f32 %v2335_v39, %v2335_v39  ;;  %v1140_v50 = vmul.f32 %v2338_v40, %v2338_v40  ;;  %v2355_v53 = vadd.f32 %v1051_v23, %v2324_v27  ;;  %v2358_v54 = vadd.f32 %v1114_v46, %v2326_v28 }
 0x2a7   : > { %v1161_v55 = vmul.f32 %v1137_v43, %v2329_v31  ;;  %v1163_v34 = vmul.f32 %v1139_v44, %v2332_v32  ;;  %v1141_v35 = vmul.f32 %v2345_v22, %v2345_v22  ;;  %v1143_v24 = vmul.f32 %v2348_v45, %v2348_v45 }
 0x2a8   : > { %v1162_v56 = vmul.f32 %v1138_v47, %v2335_v39  ;;  %v1164_v25 = vmul.f32 %v1140_v50, %v2338_v40  ;;  %v1142_v57 = vmul.f32 %v2355_v53, %v2355_v53  ;;  %v1144_v58 = vmul.f32 %v2358_v54, %v2358_v54 }
 0x2a9   : > { %v1185_v59 = vmul.f32 0.044715, %v1161_v55  ;;  %v1187_v60 = vmul.f32 0.044715, %v1163_v34  ;;  %v1165_v61 = vmul.f32 %v1141_v35, %v2345_v22  ;;  %v1167_v62 = vmul.f32 %v1143_v24, %v2348_v45 }
 0x2aa   : > { %v1186_v63 = vmul.f32 0.044715, %v1162_v56  ;;  %v1188_v0 = vmul.f32 0.044715, %v1164_v25  ;;  %v1166_v1 = vmul.f32 %v1142_v57, %v2355_v53  ;;  %v1168_v37 = vmul.f32 %v1144_v58, %v2358_v54  ;;  %v1055_v38 = vpop.f32.mrb[4].mxu0  ;;  %v1118_v48 = vpop.f32.mrb[4].mxu1 }
 0x2ab   : > { %v1209_v2 = vadd.f32 %v1185_v59, %v2329_v31  ;;  %v1211_v49 = vadd.f32 %v1187_v60, %v2332_v32  ;;  %v1189_v3 = vmul.f32 0.044715, %v1165_v61  ;;  %v1191_v4 = vmul.f32 0.044715, %v1167_v62  ;;  %v1057_v5 = vpop.f32.mrb[5].mxu0  ;;  %v1120_v6 = vpop.f32.mrb[5].mxu1 }
 0x2ac   : > { %v1210_v7 = vadd.f32 %v1186_v63, %v2335_v39  ;;  %v1212_v8 = vadd.f32 %v1188_v0, %v2338_v40  ;;  %v1190_v9 = vmul.f32 0.044715, %v1166_v1  ;;  %v1192_v51 = vmul.f32 0.044715, %v1168_v37  ;;  %v1059_v52 = vpop.f32.mrb[6].mxu0  ;;  %v1122_v10 = vpop.f32.mrb[6].mxu1 }
 0x2ad   : > { %v1233_v11 = vmul.f32 0.7978846, %v1209_v2  ;;  %v1235_v12 = vmul.f32 0.7978846, %v1211_v49  ;;  %v1213_v13 = vadd.f32 %v1189_v3, %v2345_v22  ;;  %v1215_v14 = vadd.f32 %v1191_v4, %v2348_v45  ;;  %v1061_v15 = vpop.f32.mrb[7].mxu0  ;;  %v1124_v16 = vpop.f32.mrb[7].mxu1 }
 0x2ae   : > { %v1234_v17 = vmul.f32 0.7978846, %v1210_v7  ;;  %v1236_v18 = vmul.f32 0.7978846, %v1212_v8  ;;  %v1214_v19 = vadd.f32 %v1190_v9, %v2355_v53  ;;  %v1216_v20 = vadd.f32 %v1192_v51, %v2358_v54 }
 0x2af   : > { %1836 = vtanh.f32 %v1233_v11  ;;  %v1237_v29 = vmul.f32 0.7978846, %v1213_v13  ;;  %v1239_v30 = vmul.f32 0.7978846, %v1215_v14  ;;  %v2385_v33 = vadd.f32 %v1055_v38, %v2320_v21 }
 0x2b0   : > { %1838 = vtanh.f32 %v1235_v12  ;;  %v1238_v36 = vmul.f32 0.7978846, %v1214_v19  ;;  %v1240_v41 = vmul.f32 0.7978846, %v1216_v20  ;;  %v2388_v42 = vadd.f32 %v1118_v48, %v2322_v26 }
 0x2b1   : > { %1840 = vtanh.f32 %v1234_v17  ;;  %v1145_v43 = vmul.f32 %v2385_v33, %v2385_v33  ;;  %v2393_v44 = vadd.f32 %v1057_v5, %v2324_v27  ;;  %v2396_v23 = vadd.f32 %v1120_v6, %v2326_v28 }
 0x2b2   : > { %1842 = vtanh.f32 %v1236_v18  ;;  %v1147_v46 = vmul.f32 %v2388_v42, %v2388_v42  ;;  %v2401_v47 = vadd.f32 %v1059_v52, %v2320_v21  ;;  %v2404_v50 = vadd.f32 %v1122_v10, %v2322_v26  ;;  %v2406_v55 = vpop.f32.mrb[8].mxu0  ;;  %v2408_v34 = vpop.f32.mrb[8].mxu1 }
 0x2b3   : > { %1844 = vtanh.f32 %v1237_v29  ;;  %v1169_v35 = vmul.f32 %v1145_v43, %v2385_v33  ;;  %v1146_v24 = vmul.f32 %v2393_v44, %v2393_v44  ;;  %v1148_v56 = vmul.f32 %v2396_v23, %v2396_v23  ;;  %v2415_v25 = vpop.f32.mrb[9].mxu0  ;;  %v2417_v57 = vpop.f32.mrb[9].mxu1 }
 0x2b4   : > { %1846 = vtanh.f32 %v1239_v30  ;;  %v1171_v58 = vmul.f32 %v1147_v46, %v2388_v42  ;;  %v1149_v59 = vmul.f32 %v2401_v47, %v2401_v47  ;;  %v1151_v60 = vmul.f32 %v2404_v50, %v2404_v50  ;;  %v2424_v61 = vpop.f32.mrb[10].mxu0  ;;  %v2426_v62 = vpop.f32.mrb[10].mxu1 }
 0x2b5   : > { %1848 = vtanh.f32 %v1238_v36  ;;  %v1193_v63 = vmul.f32 0.044715, %v1169_v35  ;;  %v1170_v0 = vmul.f32 %v1146_v24, %v2393_v44  ;;  %v1172_v1 = vmul.f32 %v1148_v56, %v2396_v23  ;;  %v2430_v37 = vpop.f32.mrb[11].mxu0  ;;  %v2432_v38 = vpop.f32.mrb[11].mxu1 }
 0x2b6   : > { %1850 = vtanh.f32 %v1240_v41  ;;  %v1195_v48 = vmul.f32 0.044715, %v1171_v58  ;;  %v1173_v2 = vmul.f32 %v1149_v59, %v2401_v47  ;;  %v1175_v49 = vmul.f32 %v1151_v60, %v2404_v50 }
 0x2b7   : > { %v1217_v3 = vadd.f32 %v1193_v63, %v2385_v33  ;;  %v1194_v4 = vmul.f32 0.044715, %v1170_v0  ;;  %v1196_v5 = vmul.f32 0.044715, %v1172_v1  ;;  %v2438_v6 = vadd.f32 %v1061_v15, %v2324_v27 }
 0x2b8   : > { %v1219_v7 = vadd.f32 %v1195_v48, %v2388_v42  ;;  %v1197_v8 = vmul.f32 0.044715, %v1173_v2  ;;  %v1199_v9 = vmul.f32 0.044715, %v1175_v49  ;;  %v2442_v51 = vadd.f32 %v1124_v16, %v2326_v28 }
 0x2b9   : > { %v1837_v52 = vpop.eup %1836  ;;  %v1241_v10 = vmul.f32 0.7978846, %v1217_v3  ;;  %v1218_v11 = vadd.f32 %v1194_v4, %v2393_v44  ;;  %v1220_v12 = vadd.f32 %v1196_v5, %v2396_v23  ;;  %v1150_v13 = vmul.f32 %v2438_v6, %v2438_v6 }
 0x2ba   : > { %v1839_v14 = vpop.eup %1838  ;;  %v1281_v17 = vadd.f32 1.0, %v1837_v52  ;;  %v1243_v15 = vmul.f32 0.7978846, %v1219_v7  ;;  %v1221_v18 = vadd.f32 %v1197_v8, %v2401_v47  ;;  %v1223_v19 = vadd.f32 %v1199_v9, %v2404_v50 }
 0x2bb   : > { %v1841_v20 = vpop.eup %1840  ;;  %v1283_v29 = vadd.f32 1.0, %v1839_v14  ;;  %1852 = vtanh.f32 %v1241_v10  ;;  %v1242_v16 = vmul.f32 0.7978846, %v1218_v11  ;;  %v1244_v30 = vmul.f32 0.7978846, %v1220_v12 }
 0x2bc   : > { %v1843_v36 = vpop.eup %1842  ;;  %v1305_v41 = vmul.f32 0.5, %v1281_v17  ;;  %v1282_v43 = vadd.f32 1.0, %v1841_v20  ;;  %1854 = vtanh.f32 %v1243_v15  ;;  %v1245_v46 = vmul.f32 0.7978846, %v1221_v18 }
 0x2bd   : > { %v1845_v35 = vpop.eup %1844  ;;  %v1307_v24 = vmul.f32 0.5, %v1283_v29  ;;  %v1284_v56 = vadd.f32 1.0, %v1843_v36  ;;  %1856 = vtanh.f32 %v1242_v16  ;;  %v1247_v58 = vmul.f32 0.7978846, %v1223_v19 }
 0x2be   : > { %v1847_v59 = vpop.eup %1846  ;;  %v1329_v60 = vmul.f32 %v1305_v41, %v2329_v31  ;;  %v1306_v63 = vmul.f32 0.5, %v1282_v43  ;;  %v1285_v0 = vadd.f32 1.0, %v1845_v35  ;;  %1858 = vtanh.f32 %v1244_v30 }
 0x2bf   : > { %v1849_v1 = vpop.eup %1848  ;;  %v1331_v48 = vmul.f32 %v1307_v24, %v2332_v32  ;;  %v1308_v2 = vmul.f32 0.5, %v1284_v56  ;;  %v1287_v49 = vadd.f32 1.0, %v1847_v59  ;;  %1860 = vtanh.f32 %v1245_v46 }
 0x2c0   : > { %v1851_v3 = vpop.eup %1850  ;;  %v1330_v4 = vmul.f32 %v1306_v63, %v2335_v39  ;;  %v1309_v5 = vmul.f32 0.5, %v1285_v0  ;;  %v1286_v7 = vadd.f32 1.0, %v1849_v1  ;;  %1862 = vtanh.f32 %v1247_v58 }
 0x2c1   : > { %v1332_v8 = vmul.f32 %v1308_v2, %v2338_v40  ;;  %v1311_v9 = vmul.f32 0.5, %v1287_v49  ;;  %v1288_v31 = vadd.f32 1.0, %v1851_v3  ;;  %v1174_v52 = vmul.f32 %v1150_v13, %v2438_v6 }
 0x2c2   : > { %v1674_v10 = vpack.c.bf16 %v1330_v4, %v1329_v60  ;;  %v1333_v32 = vmul.f32 %v1309_v5, %v2345_v22  ;;  %v1310_v11 = vmul.f32 0.5, %v1286_v7  ;;  %v1152_v12 = vmul.f32 %v2442_v51, %v2442_v51 }
 0x2c3   : > { %v1675_v14 = vpack.c.bf16 %v1332_v8, %v1331_v48  ;;  %v1335_v39 = vmul.f32 %v1311_v9, %v2348_v45  ;;  %v1312_v17 = vmul.f32 0.5, %v1288_v31  ;;  %v1198_v15 = vmul.f32 0.044715, %v1174_v52 }
 0x2c4   : > { %1425 = vst [vmem:[%s2146_s25] sm:$0xff] %v1674_v10  ;;  %v1334_v40 = vmul.f32 %v1310_v11, %v2355_v53  ;;  %v1176_v18 = vmul.f32 %v1152_v12, %v2442_v51  ;;  %v2464_v13 = vadd.f32 %v2406_v55, %v2320_v21  ;;  %v2468_v22 = vadd.f32 %v2408_v34, %v2322_v26 }
 0x2c5   : > { %v1853_v19 = vpop.eup %1852  ;;  %1426 = vst [vmem:[%s2146_s25 + $0x8] sm:$0xff] %v1675_v14  ;;  %v1336_v45 = vmul.f32 %v1312_v17, %v2358_v54  ;;  %v1222_v20 = vadd.f32 %v1198_v15, %v2438_v6  ;;  %v2475_v53 = vadd.f32 %v2415_v25, %v2324_v27  ;;  %v2489_v3 = vadd.f32 %v2417_v57, %v2326_v28 }
 0x2c6   : > { %v1855_v29 = vpop.eup %1854  ;;  %v1676_v16 = vpack.c.bf16 %v1334_v40, %v1333_v32  ;;  %v1289_v55 = vadd.f32 1.0, %v1853_v19  ;;  %v1200_v30 = vmul.f32 0.044715, %v1176_v18  ;;  %v1153_v34 = vmul.f32 %v2464_v13, %v2464_v13 }
 0x2c7   : > { %v1857_v36 = vpop.eup %1856  ;;  %v1677_v41 = vpack.c.bf16 %v1336_v45, %v1335_v39  ;;  %v1291_v43 = vadd.f32 1.0, %v1855_v29  ;;  %v1246_v46 = vmul.f32 0.7978846, %v1222_v20  ;;  %v1155_v54 = vmul.f32 %v2468_v22, %v2468_v22 }
 0x2c8   : > { %v1859_v35 = vpop.eup %1858  ;;  %1427 = vst [vmem:[%s2146_s25 + $0x10] sm:$0xff] %v1676_v16  ;;  %v1313_v24 = vmul.f32 0.5, %v1289_v55  ;;  %v1290_v25 = vadd.f32 1.0, %v1857_v36  ;;  %v1224_v56 = vadd.f32 %v1200_v30, %v2442_v51  ;;  %v1177_v58 = vmul.f32 %v1153_v34, %v2464_v13 }
 0x2c9   : > { %v1861_v59 = vpop.eup %1860  ;;  %1428 = vst [vmem:[%s2146_s25 + $0x18] sm:$0xff] %v1677_v41  ;;  %v1315_v60 = vmul.f32 0.5, %v1291_v43  ;;  %v1292_v63 = vadd.f32 1.0, %v1859_v35  ;;  %1864 = vtanh.f32 %v1246_v46  ;;  %v1179_v0 = vmul.f32 %v1155_v54, %v2468_v22 }
 0x2ca   : > { %v1863_v1 = vpop.eup %1862  ;;  %v1337_v48 = vmul.f32 %v1313_v24, %v2385_v33  ;;  %v1314_v2 = vmul.f32 0.5, %v1290_v25  ;;  %v1248_v49 = vmul.f32 0.7978846, %v1224_v56  ;;  %v1293_v7 = vadd.f32 1.0, %v1861_v59 }
 0x2cb   : > { %v1339_v4 = vmul.f32 %v1315_v60, %v2388_v42  ;;  %v1316_v5 = vmul.f32 0.5, %v1292_v63  ;;  %v1201_v8 = vmul.f32 0.044715, %v1177_v58  ;;  %v1203_v31 = vmul.f32 0.044715, %v1179_v0 }
 0x2cc   : > { %v1338_v9 = vmul.f32 %v1314_v2, %v2393_v44  ;;  %1866 = vtanh.f32 %v1248_v49  ;;  %v1154_v10 = vmul.f32 %v2475_v53, %v2475_v53  ;;  %v1295_v32 = vadd.f32 1.0, %v1863_v1 }
 0x2cd   : > { %v1340_v52 = vmul.f32 %v1316_v5, %v2396_v23  ;;  %v1225_v33 = vadd.f32 %v1201_v8, %v2464_v13  ;;  %v1227_v42 = vadd.f32 %v1203_v31, %v2468_v22  ;;  %v1156_v11 = vmul.f32 %v2489_v3, %v2489_v3 }
 0x2ce   : > { %v1678_v57 = vpack.c.bf16 %v1338_v9, %v1337_v48  ;;  %v1317_v14 = vmul.f32 0.5, %v1293_v7  ;;  %v1178_v39 = vmul.f32 %v1154_v10, %v2475_v53  ;;  %v2505_v15 = vadd.f32 %v2424_v61, %v2320_v21 }
 0x2cf   : > { %v1679_v12 = vpack.c.bf16 %v1340_v52, %v1339_v4  ;;  %v1249_v44 = vmul.f32 0.7978846, %v1225_v33  ;;  %v1251_v23 = vmul.f32 0.7978846, %v1227_v42  ;;  %v1180_v17 = vmul.f32 %v1156_v11, %v2489_v3 }
 0x2d0   : > { %1429 = vst [vmem:[%s2146_s25 + $0x20] sm:$0xff] %v1678_v57  ;;  %v2509_v40 = vadd.f32 %v2426_v62, %v2322_v26  ;;  %v1202_v18 = vmul.f32 0.044715, %v1178_v39  ;;  %v2514_v19 = vadd.f32 %v2430_v37, %v2324_v27  ;;  %v2518_v45 = vadd.f32 %v2432_v38, %v2326_v28 }
 0x2d1   : > { %1430 = vst [vmem:[%s2146_s25 + $0x28] sm:$0xff] %v1679_v12  ;;  %1868 = vtanh.f32 %v1249_v44  ;;  %v1204_v20 = vmul.f32 0.044715, %v1180_v17  ;;  %v1157_v21 = vmul.f32 %v2505_v15, %v2505_v15  ;;  %v1319_v55 = vmul.f32 0.5, %v1295_v32 }
 0x2d2   : > { %1870 = vtanh.f32 %v1251_v23  ;;  %v1159_v26 = vmul.f32 %v2509_v40, %v2509_v40  ;;  %v1226_v62 = vadd.f32 %v1202_v18, %v2475_v53  ;;  %v1158_v29 = vmul.f32 %v2514_v19, %v2514_v19 }
 0x2d3   : > { %v1865_v61 = vpop.eup %1864  ;;  %v1160_v27 = vmul.f32 %v2518_v45, %v2518_v45  ;;  %v1228_v28 = vadd.f32 %v1204_v20, %v2489_v3  ;;  %v1181_v38 = vmul.f32 %v1157_v21, %v2505_v15  ;;  %v1341_v43 = vmul.f32 %v1317_v14, %v2401_v47 }
 0x2d4   : > { %v1294_v37 = vadd.f32 1.0, %v1865_v61  ;;  %v1183_v16 = vmul.f32 %v1159_v26, %v2509_v40  ;;  %v1250_v30 = vmul.f32 0.7978846, %v1226_v62  ;;  %v1182_v34 = vmul.f32 %v1158_v29, %v2514_v19 }
 0x2d5   : > { %v1184_v36 = vmul.f32 %v1160_v27, %v2518_v45  ;;  %v1252_v54 = vmul.f32 0.7978846, %v1228_v28  ;;  %v1205_v35 = vmul.f32 0.044715, %v1181_v38  ;;  %v1343_v63 = vmul.f32 %v1319_v55, %v2404_v50 }
 0x2d6   : > { %v1867_v41 = vpop.eup %1866  ;;  %v1318_v46 = vmul.f32 0.5, %v1294_v37  ;;  %1872 = vtanh.f32 %v1250_v30  ;;  %v1207_v25 = vmul.f32 0.044715, %v1183_v16  ;;  %v1206_v56 = vmul.f32 0.044715, %v1182_v34 }
 0x2d7   : > { %v1296_v24 = vadd.f32 1.0, %v1867_v41  ;;  %1874 = vtanh.f32 %v1252_v54  ;;  %v1229_v59 = vadd.f32 %v1205_v35, %v2505_v15  ;;  %v1208_v60 = vmul.f32 0.044715, %v1184_v36  ;;  %v1470_v36 = vld [vmem:[%s2146_s25 + $0x20] sm:$0xff] (%p1989_p6) }
 0x2d8   : > { %v1342_v58 = vmul.f32 %v1318_v46, %v2438_v6  ;;  %v1231_v1 = vadd.f32 %v1207_v25, %v2509_v40  ;;  %v1230_v47 = vadd.f32 %v1206_v56, %v2514_v19  ;;  %v1472_v41 = vld [vmem:[%s2146_s25 + $0x28] sm:$0xff] (%p1989_p6)  ;;  %1471 = vst [vmem:[%s1449_s29 + $0x40] sm:$0xff] (%p1989_p6), %v1470_v36 }
 0x2d9   : > { %v1320_v0 = vmul.f32 0.5, %v1296_v24  ;;  %v1253_v2 = vmul.f32 0.7978846, %v1229_v59  ;;  %v1232_v49 = vadd.f32 %v1208_v60, %v2518_v45  ;;  %1473 = vst [vmem:[%s1449_s29 + $0x48] sm:$0xff] (%p1989_p6), %v1472_v41 }
 0x2da   : > { %v1680_v48 = vpack.c.bf16 %v1342_v58, %v1341_v43  ;;  %v1255_v5 = vmul.f32 0.7978846, %v1231_v1  ;;  %v1254_v7 = vmul.f32 0.7978846, %v1230_v47 }
 0x2db   : > { %v1869_v4 = vpop.eup %1868  ;;  %v1344_v6 = vmul.f32 %v1320_v0, %v2442_v51  ;;  %1876 = vtanh.f32 %v1253_v2  ;;  %v1256_v50 = vmul.f32 0.7978846, %v1232_v49 }
 0x2dc   : > { %v1871_v8 = vpop.eup %1870  ;;  %1431 = vst [vmem:[%s2146_s25 + $0x30] sm:$0xff] %v1680_v48  ;;  %v1297_v9 = vadd.f32 1.0, %v1869_v4  ;;  %1878 = vtanh.f32 %v1255_v5 }
 0x2dd   : > { %v1681_v31 = vpack.c.bf16 %v1344_v6, %v1343_v63  ;;  %v1299_v52 = vadd.f32 1.0, %v1871_v8  ;;  %1880 = vtanh.f32 %v1254_v7 }
 0x2de   : > { %1882 = vtanh.f32 %v1256_v50  ;;  %v1321_v33 = vmul.f32 0.5, %v1297_v9 }
 0x2df   : > { %1432 = vst [vmem:[%s2146_s25 + $0x38] sm:$0xff] %v1681_v31  ;;  %v1323_v57 = vmul.f32 0.5, %v1299_v52 }
 0x2e0   : > { %v1873_v10 = vpop.eup %1872  ;;  %v1345_v51 = vmul.f32 %v1321_v33, %v2464_v13 }
 0x2e1   : > { %v1875_v32 = vpop.eup %1874  ;;  %v1298_v42 = vadd.f32 1.0, %v1873_v10  ;;  %v1347_v14 = vmul.f32 %v1323_v57, %v2468_v22 }
 0x2e2   : > { %v1300_v11 = vadd.f32 1.0, %v1875_v32 }
 0x2e3   : > { %v1322_v12 = vmul.f32 0.5, %v1298_v42  ;;  %v1474_v43 = vld [vmem:[%s2146_s25 + $0x30] sm:$0xff] (%p1989_p6) }
 0x2e4   : > { %v1324_v44 = vmul.f32 0.5, %v1300_v11  ;;  %1475 = vst [vmem:[%s1449_s29 + $0x60] sm:$0xff] (%p1989_p6), %v1474_v43 }
 0x2e5   : > { %v1877_v39 = vpop.eup %1876  ;;  %v1346_v23 = vmul.f32 %v1322_v12, %v2475_v53 }
 0x2e6   : > { %v1879_v17 = vpop.eup %1878  ;;  %v1348_v18 = vmul.f32 %v1324_v44, %v2489_v3  ;;  %v1301_v20 = vadd.f32 1.0, %v1877_v39  ;;  %v1476_v46 = vld [vmem:[%s2146_s25 + $0x38] sm:$0xff] (%p1989_p6) }
 0x2e7   : > { %v1881_v21 = vpop.eup %1880  ;;  %v1682_v26 = vpack.c.bf16 %v1346_v23, %v1345_v51  ;;  %v1303_v61 = vadd.f32 1.0, %v1879_v17  ;;  %1477 = vst [vmem:[%s1449_s29 + $0x68] sm:$0xff] (%p1989_p6), %v1476_v46 }
 0x2e8   : > { %v1883_v62 = vpop.eup %1882  ;;  %v1683_v29 = vpack.c.bf16 %v1348_v18, %v1347_v14  ;;  %v1325_v13 = vmul.f32 0.5, %v1301_v20  ;;  %v1302_v27 = vadd.f32 1.0, %v1881_v21 }
 0x2e9   : > { %1433 = vst [vmem:[%s2146_s25 + $0x40] sm:$0xff] %v1682_v26  ;;  %v1327_v22 = vmul.f32 0.5, %v1303_v61  ;;  %v1304_v37 = vadd.f32 1.0, %v1883_v62 }
 0x2ea   : > { %1434 = vst [vmem:[%s2146_s25 + $0x48] sm:$0xff] %v1683_v29  ;;  %v1349_v28 = vmul.f32 %v1325_v13, %v2505_v15  ;;  %v1326_v53 = vmul.f32 0.5, %v1302_v27  ;;  %v1462_v15 = vld [vmem:[%s2146_s25] sm:$0xff] (%p1989_p6) }
 0x2eb   : > { %v1351_v38 = vmul.f32 %v1327_v22, %v2509_v40  ;;  %v1328_v3 = vmul.f32 0.5, %v1304_v37  ;;  %1443 = sbr.rel (!%p1989_p6) target bundleno = 762 (0x2fa), region = 71  ;;  %v1464_v40 = vld [vmem:[%s2146_s25 + $0x8] sm:$0xff] (%p1989_p6)  ;;  %1463 = vst [vmem:[%s1449_s29] sm:$0xff] (%p1989_p6), %v1462_v15 }
 0x2ec   : > { %v1350_v16 = vmul.f32 %v1326_v53, %v2514_v19  ;;  %v1466_v19 = vld [vmem:[%s2146_s25 + $0x10] sm:$0xff] (%p1989_p6)  ;;  %1465 = vst [vmem:[%s1449_s29 + $0x8] sm:$0xff] (%p1989_p6), %v1464_v40 }
 0x2ed   : > { %v1352_v55 = vmul.f32 %v1328_v3, %v2518_v45  ;;  %v1468_v45 = vld [vmem:[%s2146_s25 + $0x18] sm:$0xff] (%p1989_p6)  ;;  %1467 = vst [vmem:[%s1449_s29 + $0x20] sm:$0xff] (%p1989_p6), %v1466_v19 }
 0x2ee   : > { %v1684_v30 = vpack.c.bf16 %v1350_v16, %v1349_v28  ;;  %1469 = vst [vmem:[%s1449_s29 + $0x28] sm:$0xff] (%p1989_p6), %v1468_v45 }
 0x2ef   : > { %v1685_v34 = vpack.c.bf16 %v1352_v55, %v1351_v38 }
 0x2f0   : > { %1435 = vst [vmem:[%s2146_s25 + $0x50] sm:$0xff] %v1684_v30  ;;  %v1478_v54 = vld [vmem:[%s2146_s25 + $0x40] sm:$0xff] (%p1989_p6) }
 0x2f1   : > { %1436 = vst [vmem:[%s2146_s25 + $0x58] sm:$0xff] %v1685_v34  ;;  %1479 = vst [vmem:[%s1449_s29 + $0x80] sm:$0xff] (%p1989_p6), %v1478_v54  ;;  %v1480_v35 = vld [vmem:[%s2146_s25 + $0x48] sm:$0xff] (%p1989_p6) }
 0x2f2   : > { %1481 = vst [vmem:[%s1449_s29 + $0x88] sm:$0xff] %v1480_v35 }
 0x2f7   : > { %v1482_v24 = vld [vmem:[%s2146_s25 + $0x50] sm:$0xff] }
 0x2f8   : > { %v1484_v25 = vld [vmem:[%s2146_s25 + $0x58] sm:$0xff]  ;;  %1483 = vst [vmem:[%s1449_s29 + $0xa0] sm:$0xff] %v1482_v24 }
 0x2f9   : > { %1485 = vst [vmem:[%s1449_s29 + $0xa8] sm:$0xff] %v1484_v25 }
 0x2fa PF: > { %s15_s22 = sadd.s32 1, %s1922_s22   ;;  %s2596_s18 = smov %s1910_s19 }
 0x2fb   : > { %p12_p13 = scmp.ge.s32.totalorder %s15_s22, 4   ;;  %s2597_s19 = smov %s1994_s28 }
 0x2fc   : > { %s2598_s20 = smov %s1918_s21  ;;  %s2599_s21 = smov %s2601_s23 }
 0x2fd   :  { %14 = sbr.rel (!%p12_p13) target bundleno = 3 (0x3), region = 131 }

// kernel: _lambda_.17
= control target key start
LH: loop header
LB: loop body
LE: loop exit
PB: predicated region body
PF: predicated region fallthrough
CT: control target
= control target key end

     0   :  { %s1565_s15 = smov 0   ;;  %s1567_s16 = smov 0   ;;  %s1787_s0 = inlined_call_operand.vmem [shape: bf16[48,1024], index: 0, kind: input, shape index: {}]   ;;  %s1788_s1 = inlined_call_operand.vmem [shape: bf16[1024,256], index: 1, kind: input, shape index: {}]   ;;  %s1789_s2 = inlined_call_operand.vmem [shape: f32[1,256], index: 2, kind: input, shape index: {}]   ;;  %s1790_s3 = inlined_call_operand.vmem [shape: f32[48,256], index: 3, kind: input, shape index: {}]   ;;  %s1791_s4 = inlined_call_operand.vmem [shape: f32[48,256], index: 4, kind: output, shape index: {}]  }
   0x1   :  { %s1569_s17 = smov 0   ;;  %s1571_s18 = smov 0  }
   0x2   :  { %s1573_s19 = smov 0  }
   0x3 LB: > { %s26_s20 = sadd.s32 1, %s1533_s18  ;;  %p49_p1 = scmp.ne.s32.totalorder %s1525_s16, %s1521_s15  ;;  %s1537_s19 = sphi %s1573_s19, %s14_s19   ;;  %s1533_s18 = sphi %s1571_s18, %s1795_s18   ;;  %s1529_s17 = sphi %s1569_s17, %s1794_s17   ;;  %s1525_s16 = sphi %s1567_s16, %s1793_s16   ;;  %s1521_s15 = sphi %s1565_s15, %s1792_s15  }
   0x4   : > { %p27_p0 = scmp.ge.s32.totalorder %s26_s20, 2  ;;  %p50_p2 = scmp.eq.s32.totalorder %s1537_s19, 0 }
   0x5   : > { %s42_s22 = sadd.s32 1, %s1525_s16  ;;  %p1239_p5 = scmp.ge.s32.totalorder %s1537_s19, 2 }
   0x6   : > { %s1797_s20 = smov (%p27_p0, %s26_s20), 0  ;;  %p51_p3 = por %p50_p2, %p49_p1 }
   0x7   : > { %s38_s21 = ssub.s32 %s1533_s18, %s1797_s20  ;;  %208 = sbr.rel (%p1239_p5) target bundleno = 24 (0x18), region = 24 }
   0x8   : > { %p40_p4 = scmp.eq.s32.totalorder %s38_s21, 0 }
   0xa   : > { %s1600_s23 = scalar_select %p40_p4, %s1525_s16, %s42_s22  }
   0xe   : > { %211 = sbr.rel (!%p51_p3) target bundleno = 24 (0x18), region = 28  ;;  %s213_s24 = sand.u32 (%p51_p3), 1, %s1525_s16  }
   0xf   : > { %s1328_s25 = sshll.u32 (%p51_p3), %s1533_s18, 4  ;;  %s1342_s26 = smul.u32 (%p51_p3), 96, %s213_s24 }
  0x10   : > { %s221_s29 = scalar_lea.vmem (%p51_p3), %s1787_s0, %s1328_s25 }
  0x11   : > { %v234_v0 = vld [vmem:[%s221_s29] sm:$0xff] (%p51_p3)  ;;  %v236_v1 = vld [vmem:[%s221_s29 + $0x8] sm:$0xff] (%p51_p3)  ;;  %s215_s30 = scalar_lea.vmem (%p51_p3), [#allocation3], %s1342_s26 }
  0x12   : > { %v238_v2 = vld [vmem:[%s221_s29 + $0x20] sm:$0xff] (%p51_p3)  ;;  %v240_v3 = vld [vmem:[%s221_s29 + $0x28] sm:$0xff] (%p51_p3)  ;;  %235 = vst [vmem:[%s215_s30] sm:$0xff] (%p51_p3), %v234_v0  ;;  %237 = vst [vmem:[%s215_s30 + $0x8] sm:$0xff] (%p51_p3), %v236_v1 }
  0x13   : > { %v242_v4 = vld [vmem:[%s221_s29 + $0x40] sm:$0xff] (%p51_p3)  ;;  %v244_v5 = vld [vmem:[%s221_s29 + $0x48] sm:$0xff] (%p51_p3)  ;;  %239 = vst [vmem:[%s215_s30 + $0x10] sm:$0xff] (%p51_p3), %v238_v2  ;;  %241 = vst [vmem:[%s215_s30 + $0x18] sm:$0xff] (%p51_p3), %v240_v3 }
  0x14   : > { %243 = vst [vmem:[%s215_s30 + $0x20] sm:$0xff] (%p51_p3), %v242_v4  ;;  %245 = vst [vmem:[%s215_s30 + $0x28] sm:$0xff] (%p51_p3), %v244_v5  ;;  %v246_v6 = vld [vmem:[%s221_s29 + $0x60] sm:$0xff] (%p51_p3)  ;;  %v248_v7 = vld [vmem:[%s221_s29 + $0x68] sm:$0xff] (%p51_p3) }
  0x15   : > { %v250_v8 = vld [vmem:[%s221_s29 + $0x80] sm:$0xff]  ;;  %247 = vst [vmem:[%s215_s30 + $0x30] sm:$0xff] %v246_v6  ;;  %249 = vst [vmem:[%s215_s30 + $0x38] sm:$0xff] %v248_v7  ;;  %v252_v9 = vld [vmem:[%s221_s29 + $0x88] sm:$0xff] }
  0x16   : > { %251 = vst [vmem:[%s215_s30 + $0x40] sm:$0xff] %v250_v8  ;;  %v254_v10 = vld [vmem:[%s221_s29 + $0xa0] sm:$0xff]  ;;  %v256_v11 = vld [vmem:[%s221_s29 + $0xa8] sm:$0xff]  ;;  %253 = vst [vmem:[%s215_s30 + $0x48] sm:$0xff] %v252_v9 }
  0x17   : > { %255 = vst [vmem:[%s215_s30 + $0x50] sm:$0xff] %v254_v10  ;;  %257 = vst [vmem:[%s215_s30 + $0x58] sm:$0xff] %v256_v11 }
  0x18 PF: > { %p1242_p6 = scmp.ge.s32.totalorder %s1537_s19, 1  ;;  %p277_p7 = scmp.lt.s32.totalorder %s1537_s19, 3 }
  0x1a   : > { %p278_p8 = pnand %p1242_p6, %p277_p7 }
  0x1b   : > { %s284_s5 = sand.u32 (!%p278_p8), 1, %s1521_s15   ;;  %s1243_s6 = sshll.u32 (!%p278_p8), %s1529_s17, 6 }
  0x1c   : > { %281 = sbr.rel (%p278_p8) target bundleno = 357 (0x165), region = 55  ;;  %p342_p9 = scmp.lt.s32.totalorder (!%p278_p8), %s1243_s6, 127 }
  0x1d   : > { %s1343_s7 = smul.u32 (!%p278_p8), 96, %s284_s5  ;;  %p1246_p10 = scmp.ne.s32.totalorder (!%p278_p8), %s1529_s17, 0 }
  0x1f   : > { %s1617_s12 = scalar_lea.vmem (!%p278_p8), [#allocation3], %s1343_s7 }
  0x23   : > { %s1799_s6 = smov (!%p342_p9, %s1243_s6), 127  ;;  %384 = sbr.rel (%p1246_p10) target bundleno = 43 (0x2b), region = 63 }
  0x24   : > { %s1329_s8 = sshll.u32 %s1799_s6, 3  ;;  %v1539_v12 = vmov (!%p1246_p10), 0.0  }
  0x25   : > { %s1615_s11 = scalar_lea.vmem %s1788_s1, %s1329_s8  ;;  %385 = vst [vmem:[#allocation2] sm:$0xff] (!%p1246_p10), %v1539_v12  ;;  %386 = vst [vmem:[#allocation2 + $0x8] sm:$0xff] (!%p1246_p10), %v1539_v12 }
  0x26   : > { %387 = vst [vmem:[#allocation2 + $0x10] sm:$0xff] (!%p1246_p10), %v1539_v12  ;;  %388 = vst [vmem:[#allocation2 + $0x18] sm:$0xff] (!%p1246_p10), %v1539_v12 }
  0x27   : > { %389 = vst [vmem:[#allocation2 + $0x20] sm:$0xff] (!%p1246_p10), %v1539_v12  ;;  %390 = vst [vmem:[#allocation2 + $0x28] sm:$0xff] (!%p1246_p10), %v1539_v12 }
  0x28   : > { %391 = vst [vmem:[#allocation2 + $0x30] sm:$0xff] (!%p1246_p10), %v1539_v12  ;;  %392 = vst [vmem:[#allocation2 + $0x38] sm:$0xff] (!%p1246_p10), %v1539_v12 }
  0x29   : > { %393 = vst [vmem:[#allocation2 + $0x40] sm:$0xff] (!%p1246_p10), %v1539_v12  ;;  %394 = vst [vmem:[#allocation2 + $0x48] sm:$0xff] (!%p1246_p10), %v1539_v12 }
  0x2a   : > { %395 = vst [vmem:[#allocation2 + $0x50] sm:$0xff] %v1539_v12  ;;  %396 = vst [vmem:[#allocation2 + $0x58] sm:$0xff] %v1539_v12 }
  0x2b PF: > { %v1385_v13 = vld [vmem:[%s1615_s11 + $0x4] ss:$8 sps:$4 sm:$0xff]   ;;  %v1389_v15 = vld [vmem:[%s1615_s11] ss:$8 sps:$4 sm:$0xff]   ;;  %v1391_v17 = vld [vmem:[%s1615_s11 + $0x14] ss:$8 sps:$4 sm:$0xff]  }
  0x2c   : > { %v1387_v14 = vld [vmem:[%s1615_s11 + $0x104] ss:$8 sps:$4 sm:$0xff]   ;;  %865 = vmatprep.subr.bf16.mxu1 %v1385_v13  ;;  %v1390_v16 = vld [vmem:[%s1615_s11 + $0x100] ss:$8 sps:$4 sm:$0xff]   ;;  %v1393_v18 = vld [vmem:[%s1615_s11 + $0x114] ss:$8 sps:$4 sm:$0xff]  }
  0x2d   : > { %928 = vmatprep.subr.bf16.mxu0 %v1387_v14  ;;  %866 = vmatpush1.bf16.msra.mxu1 %v1389_v15  ;;  %v1395_v19 = vld [vmem:[%s1615_s11 + $0x10] ss:$8 sps:$4 sm:$0xff]   ;;  %v1397_v21 = vld [vmem:[%s1615_s11 + $0x24] ss:$8 sps:$4 sm:$0xff]   ;;  %v1401_v23 = vld [vmem:[%s1615_s11 + $0x20] ss:$8 sps:$4 sm:$0xff]  }
  0x2e   : > { %929 = vmatpush1.bf16.msra.mxu0 %v1390_v16  ;;  %867 = vmatprep.subr.bf16.mxu1 %v1391_v17  ;;  %v1396_v20 = vld [vmem:[%s1615_s11 + $0x110] ss:$8 sps:$4 sm:$0xff]   ;;  %v1399_v22 = vld [vmem:[%s1615_s11 + $0x124] ss:$8 sps:$4 sm:$0xff]   ;;  %v1402_v24 = vld [vmem:[%s1615_s11 + $0x120] ss:$8 sps:$4 sm:$0xff]  }
  0x2f   : > { %930 = vmatprep.subr.bf16.mxu0 %v1393_v18  ;;  %v1403_v25 = vld [vmem:[%s1615_s11 + $0x34] ss:$8 sps:$4 sm:$0xff]   ;;  %v1407_v27 = vld [vmem:[%s1615_s11 + $0x30] ss:$8 sps:$4 sm:$0xff]   ;;  %v1409_v29 = vld [vmem:[%s1615_s11 + $0x44] ss:$8 sps:$4 sm:$0xff]  }
  0x30   : > { %v1405_v26 = vld [vmem:[%s1615_s11 + $0x134] ss:$8 sps:$4 sm:$0xff]   ;;  %v1408_v28 = vld [vmem:[%s1615_s11 + $0x130] ss:$8 sps:$4 sm:$0xff]   ;;  %v1411_v30 = vld [vmem:[%s1615_s11 + $0x144] ss:$8 sps:$4 sm:$0xff]  }
  0x31   : > { %868 = vmatpush1.bf16.msra.mxu1 %v1395_v19  ;;  %v1413_v31 = vld [vmem:[%s1615_s11 + $0x40] ss:$8 sps:$4 sm:$0xff]   ;;  %v1415_v33 = vld [vmem:[%s1615_s11 + $0x54] ss:$8 sps:$4 sm:$0xff]   ;;  %v1419_v35 = vld [vmem:[%s1615_s11 + $0x50] ss:$8 sps:$4 sm:$0xff]  }
  0x32   : > { %931 = vmatpush1.bf16.msra.mxu0 %v1396_v20  ;;  %869 = vmatprep.subr.bf16.mxu1 %v1397_v21  ;;  %v1414_v32 = vld [vmem:[%s1615_s11 + $0x140] ss:$8 sps:$4 sm:$0xff]   ;;  %v1417_v34 = vld [vmem:[%s1615_s11 + $0x154] ss:$8 sps:$4 sm:$0xff]   ;;  %v1420_v36 = vld [vmem:[%s1615_s11 + $0x150] ss:$8 sps:$4 sm:$0xff]  }
  0x33   : > { %932 = vmatprep.subr.bf16.mxu0 %v1399_v22  ;;  %v1421_v37 = vld [vmem:[%s1615_s11 + $0x64] ss:$8 sps:$4 sm:$0xff]   ;;  %v1425_v39 = vld [vmem:[%s1615_s11 + $0x60] ss:$8 sps:$4 sm:$0xff]   ;;  %v1427_v41 = vld [vmem:[%s1615_s11 + $0x74] ss:$8 sps:$4 sm:$0xff]  }
  0x34   : > { %v1423_v38 = vld [vmem:[%s1615_s11 + $0x164] ss:$8 sps:$4 sm:$0xff]   ;;  %v1426_v40 = vld [vmem:[%s1615_s11 + $0x160] ss:$8 sps:$4 sm:$0xff]   ;;  %v1429_v42 = vld [vmem:[%s1615_s11 + $0x174] ss:$8 sps:$4 sm:$0xff]  }
  0x35   : > { %870 = vmatpush1.bf16.msra.mxu1 %v1401_v23  ;;  %v1431_v43 = vld [vmem:[%s1615_s11 + $0x70] ss:$8 sps:$4 sm:$0xff]   ;;  %v1433_v45 = vld [vmem:[%s1615_s11 + $0x84] ss:$8 sps:$4 sm:$0xff]   ;;  %v1437_v47 = vld [vmem:[%s1615_s11 + $0x80] ss:$8 sps:$4 sm:$0xff]  }
  0x36   : > { %933 = vmatpush1.bf16.msra.mxu0 %v1402_v24  ;;  %871 = vmatprep.subr.bf16.mxu1 %v1403_v25  ;;  %v1432_v44 = vld [vmem:[%s1615_s11 + $0x170] ss:$8 sps:$4 sm:$0xff]   ;;  %v1435_v46 = vld [vmem:[%s1615_s11 + $0x184] ss:$8 sps:$4 sm:$0xff]   ;;  %v1438_v48 = vld [vmem:[%s1615_s11 + $0x180] ss:$8 sps:$4 sm:$0xff]  }
  0x37   : > { %934 = vmatprep.subr.bf16.mxu0 %v1405_v26  ;;  %v1439_v49 = vld [vmem:[%s1615_s11 + $0x94] ss:$8 sps:$4 sm:$0xff]   ;;  %v1443_v51 = vld [vmem:[%s1615_s11 + $0x90] ss:$8 sps:$4 sm:$0xff]   ;;  %v1445_v53 = vld [vmem:[%s1615_s11 + $0xa4] ss:$8 sps:$4 sm:$0xff]  }
  0x38   : > { %v1441_v50 = vld [vmem:[%s1615_s11 + $0x194] ss:$8 sps:$4 sm:$0xff]   ;;  %v1444_v52 = vld [vmem:[%s1615_s11 + $0x190] ss:$8 sps:$4 sm:$0xff]   ;;  %v1447_v54 = vld [vmem:[%s1615_s11 + $0x1a4] ss:$8 sps:$4 sm:$0xff]  }
  0x39   : > { %872 = vmatpush1.bf16.msra.mxu1 %v1407_v27  ;;  %v1449_v55 = vld [vmem:[%s1615_s11 + $0xa0] ss:$8 sps:$4 sm:$0xff]   ;;  %v1451_v57 = vld [vmem:[%s1615_s11 + $0xb4] ss:$8 sps:$4 sm:$0xff]   ;;  %v1455_v59 = vld [vmem:[%s1615_s11 + $0xb0] ss:$8 sps:$4 sm:$0xff]  }
  0x3a   : > { %935 = vmatpush1.bf16.msra.mxu0 %v1408_v28  ;;  %873 = vmatprep.subr.bf16.mxu1 %v1409_v29  ;;  %v1450_v56 = vld [vmem:[%s1615_s11 + $0x1a0] ss:$8 sps:$4 sm:$0xff]   ;;  %v1453_v58 = vld [vmem:[%s1615_s11 + $0x1b4] ss:$8 sps:$4 sm:$0xff]   ;;  %v1456_v60 = vld [vmem:[%s1615_s11 + $0x1b0] ss:$8 sps:$4 sm:$0xff]  }
  0x3b   : > { %936 = vmatprep.subr.bf16.mxu0 %v1411_v30  ;;  %v1457_v61 = vld [vmem:[%s1615_s11 + $0xc4] ss:$8 sps:$4 sm:$0xff]   ;;  %v1461_v1 = vld [vmem:[%s1615_s11 + $0xc0] ss:$8 sps:$4 sm:$0xff]   ;;  %v1463_v3 = vld [vmem:[%s1615_s11 + $0xd4] ss:$8 sps:$4 sm:$0xff]  }
  0x3c   : > { %v1483_v62 = vld [vmem:[%s1617_s12 + $0x4] ss:$16 sps:$4 sm:$0xff]   ;;  %v1486_v0 = vld [vmem:[%s1617_s12 + $0xc] ss:$16 sps:$4 sm:$0xff]   ;;  %v1462_v2 = vld [vmem:[%s1615_s11 + $0x1c0] ss:$8 sps:$4 sm:$0xff]  }
  0x3d   : > { %874 = vmatpush1.bf16.msra.mxu1 %v1413_v31  ;;  %v1459_v63 = vld [vmem:[%s1615_s11 + $0x1c4] ss:$8 sps:$4 sm:$0xff]   ;;  %897 = vmatprep.mubr.bf16.mxu1 %v1483_v62  ;;  %v1465_v4 = vld [vmem:[%s1615_s11 + $0x1d4] ss:$8 sps:$4 sm:$0xff]   ;;  %v1467_v5 = vld [vmem:[%s1615_s11 + $0xd0] ss:$8 sps:$4 sm:$0xff]  }
  0x3e   : > { %937 = vmatpush1.bf16.msra.mxu0 %v1414_v32  ;;  %875 = vmatprep.subr.bf16.mxu1 %v1415_v33  ;;  %v1468_v6 = vld [vmem:[%s1615_s11 + $0x1d0] ss:$8 sps:$4 sm:$0xff]   ;;  %v1469_v7 = vld [vmem:[%s1615_s11 + $0xe4] ss:$8 sps:$4 sm:$0xff]   ;;  %v1473_v9 = vld [vmem:[%s1615_s11 + $0xe0] ss:$8 sps:$4 sm:$0xff]  }
  0x3f   : > { %938 = vmatprep.subr.bf16.mxu0 %v1417_v34  ;;  %960 = vmatprep.mubr.bf16.mxu0 %v1486_v0  ;;  %v1471_v8 = vld [vmem:[%s1615_s11 + $0x1e4] ss:$8 sps:$4 sm:$0xff]   ;;  %v1474_v10 = vld [vmem:[%s1615_s11 + $0x1e0] ss:$8 sps:$4 sm:$0xff]   ;;  %v1475_v11 = vld [vmem:[%s1615_s11 + $0xf4] ss:$8 sps:$4 sm:$0xff]  }
  0x40   : > { %v1477_v12 = vld [vmem:[%s1615_s11 + $0x1f4] ss:$8 sps:$4 sm:$0xff]   ;;  %v1479_v13 = vld [vmem:[%s1615_s11 + $0xf0] ss:$8 sps:$4 sm:$0xff]   ;;  %v409_v26 = vld [vmem:[#allocation2] sm:$0xff]  ;;  %p1323_p11 = scmp.ne.s32.totalorder %s1529_s17, 1 }
  0x41   : > { %876 = vmatpush1.bf16.msra.mxu1 %v1419_v35  ;;  %v1480_v14 = vld [vmem:[%s1615_s11 + $0x1f0] ss:$8 sps:$4 sm:$0xff]   ;;  %v1487_v17 = vld [vmem:[%s1617_s12 + $0x24] ss:$16 sps:$4 sm:$0xff]   ;;  %v1489_v18 = vld [vmem:[%s1617_s12 + $0x2c] ss:$16 sps:$4 sm:$0xff]  }
  0x42   : > { %939 = vmatpush1.bf16.msra.mxu0 %v1420_v36  ;;  %877 = vmatprep.subr.bf16.mxu1 %v1421_v37  ;;  %v1481_v15 = vld [vmem:[%s1617_s12] ss:$16 sps:$4 sm:$0xff]   ;;  %v1484_v16 = vld [vmem:[%s1617_s12 + $0x8] ss:$16 sps:$4 sm:$0xff]   ;;  %v1493_v21 = vld [vmem:[%s1617_s12 + $0x44] ss:$16 sps:$4 sm:$0xff]  }
  0x43   : > { %940 = vmatprep.subr.bf16.mxu0 %v1423_v38  ;;  %v1491_v19 = vld [vmem:[%s1617_s12 + $0x20] ss:$16 sps:$4 sm:$0xff]   ;;  %v1492_v20 = vld [vmem:[%s1617_s12 + $0x28] ss:$16 sps:$4 sm:$0xff]   ;;  %v1495_v22 = vld [vmem:[%s1617_s12 + $0x4c] ss:$16 sps:$4 sm:$0xff]  }
  0x44   : > { %v1497_v23 = vld [vmem:[%s1617_s12 + $0x40] ss:$16 sps:$4 sm:$0xff]   ;;  %v1498_v24 = vld [vmem:[%s1617_s12 + $0x48] ss:$16 sps:$4 sm:$0xff]  }
  0x45   : > { %878 = vmatpush1.bf16.msra.mxu1 %v1425_v39  ;;  %v410_v30 = vld [vmem:[#allocation2 + $0x8] sm:$0xff]  ;;  %v411_v34 = vld [vmem:[#allocation2 + $0x10] sm:$0xff]  ;;  %v412_v39 = vld [vmem:[#allocation2 + $0x18] sm:$0xff] }
  0x46   : > { %941 = vmatpush1.bf16.msra.mxu0 %v1426_v40  ;;  %879 = vmatprep.subr.bf16.mxu1 %v1427_v41 }
  0x47   : > { %942 = vmatprep.subr.bf16.mxu0 %v1429_v42 }
  0x49   : > { %880 = vmatpush1.bf16.msra.mxu1 %v1431_v43 }
  0x4a   : > { %943 = vmatpush1.bf16.msra.mxu0 %v1432_v44  ;;  %881 = vmatprep.subr.bf16.mxu1 %v1433_v45 }
  0x4b   : > { %944 = vmatprep.subr.bf16.mxu0 %v1435_v46  ;;  %v413_v46 = vld [vmem:[#allocation2 + $0x20] sm:$0xff] }
  0x4d   : > { %882 = vmatpush1.bf16.msra.mxu1 %v1437_v47 }
  0x4e   : > { %945 = vmatpush1.bf16.msra.mxu0 %v1438_v48  ;;  %883 = vmatprep.subr.bf16.mxu1 %v1439_v49 }
  0x4f   : > { %946 = vmatprep.subr.bf16.mxu0 %v1441_v50  ;;  %v414_v50 = vld [vmem:[#allocation2 + $0x28] sm:$0xff] }
  0x51   : > { %884 = vmatpush1.bf16.msra.mxu1 %v1443_v51 }
  0x52   : > { %947 = vmatpush1.bf16.msra.mxu0 %v1444_v52  ;;  %885 = vmatprep.subr.bf16.mxu1 %v1445_v53 }
  0x53   : > { %948 = vmatprep.subr.bf16.mxu0 %v1447_v54  ;;  %v415_v54 = vld [vmem:[#allocation2 + $0x30] sm:$0xff] }
  0x55   : > { %886 = vmatpush1.bf16.msra.mxu1 %v1449_v55 }
  0x56   : > { %949 = vmatpush1.bf16.msra.mxu0 %v1450_v56  ;;  %887 = vmatprep.subr.bf16.mxu1 %v1451_v57 }
  0x57   : > { %950 = vmatprep.subr.bf16.mxu0 %v1453_v58 }
  0x59   : > { %888 = vmatpush1.bf16.msra.mxu1 %v1455_v59  ;;  %v416_v59 = vld [vmem:[#allocation2 + $0x38] sm:$0xff] }
  0x5a   : > { %951 = vmatpush1.bf16.msra.mxu0 %v1456_v60  ;;  %889 = vmatprep.subr.bf16.mxu1 %v1457_v61 }
  0x5b   : > { %952 = vmatprep.subr.bf16.mxu0 %v1459_v63 }
  0x5d   : > { %890 = vmatpush1.bf16.msra.mxu1 %v1461_v1 }
  0x5e   : > { %953 = vmatpush1.bf16.msra.mxu0 %v1462_v2  ;;  %891 = vmatprep.subr.bf16.mxu1 %v1463_v3  ;;  %v417_v2 = vld [vmem:[#allocation2 + $0x40] sm:$0xff] }
  0x5f   : > { %954 = vmatprep.subr.bf16.mxu0 %v1465_v4 }
  0x61   : > { %892 = vmatpush1.bf16.msra.mxu1 %v1467_v5 }
  0x62   : > { %955 = vmatpush1.bf16.msra.mxu0 %v1468_v6  ;;  %893 = vmatprep.subr.bf16.mxu1 %v1469_v7  ;;  %v418_v6 = vld [vmem:[#allocation2 + $0x48] sm:$0xff] }
  0x63   : > { %956 = vmatprep.subr.bf16.mxu0 %v1471_v8 }
  0x65   : > { %894 = vmatpush1.bf16.msra.mxu1 %v1473_v9 }
  0x66   : > { %957 = vmatpush1.bf16.msra.mxu0 %v1474_v10  ;;  %895 = vmatprep.subr.bf16.mxu1 %v1475_v11  ;;  %v419_v10 = vld [vmem:[#allocation2 + $0x50] sm:$0xff] }
  0x67   : > { %958 = vmatprep.subr.bf16.mxu0 %v1477_v12 }
  0x69   : > { %896 = vmatpush1.bf16.msra.mxu1 %v1479_v13 }
  0x6a   : > { %959 = vmatpush1.bf16.msra.mxu0 %v1480_v14 }
  0x6c   : > { %898 = vmatmul.mubr.bf16.vlgmr.msra.gmra.mrb[0].mxu1 %v1481_v15  ;;  %v420_v15 = vld [vmem:[#allocation2 + $0x58] sm:$0xff] }
  0x6d   : > { %961 = vmatmul.mubr.bf16.vlgmr.msra.gmra.mrb[0].mxu0 %v1484_v16  ;;  %907 = vmatprep.mubr.bf16.mxu1 %v1487_v17 }
  0x6e   : > { %970 = vmatprep.mubr.bf16.mxu0 %v1489_v18 }
  0x74   : > { %908 = vmatmul.mubr.bf16.gmra.mrb[4].mxu1 %v1491_v19 }
  0x75   : > { %971 = vmatmul.mubr.bf16.gmra.mrb[4].mxu0 %v1492_v20  ;;  %917 = vmatprep.mubr.bf16.mxu1 %v1493_v21  ;;  %v1033_v21 = vlaneseq (!%p1323_p11) }
  0x76   : > { %980 = vmatprep.mubr.bf16.mxu0 %v1495_v22 }
  0x77   : > { %v1034_v22 = vshrl.u32 (!%p1323_p11), %v1033_v21, 7 }
  0x7c   : > { %918 = vmatmul.mubr.bf16.gmra.mrb[8].mxu1 %v1497_v23  ;;  %v1031_v23 = vld [vmem:[%s1789_s2] sm:$0x3] (!%p1323_p11) }
  0x7d   : > { %981 = vmatmul.mubr.bf16.gmra.mrb[8].mxu0 %v1498_v24 }
 0x13f   : > { %v899_v25 = vpop.f32.mrb[0].mxu1 }
 0x140   : > { %v962_v27 = vpop.f32.mrb[0].mxu0  ;;  %v901_v29 = vpop.f32.mrb[1].mxu1 }
 0x141   : > { %v963_v28 = vadd.f32 %v962_v27, %v899_v25  ;;  %v964_v31 = vpop.f32.mrb[1].mxu0  ;;  %v903_v33 = vpop.f32.mrb[2].mxu1  ;;  %v1035_v25 = vsub.s32 (!%p1323_p11), 0, %v1034_v22  ;;  %v1039_v27 = vsub.s32 (!%p1323_p11), 1, %v1034_v22 }
 0x142   : > { %v965_v32 = vadd.f32 %v964_v31, %v901_v29  ;;  %v966_v35 = vpop.f32.mrb[2].mxu0  ;;  %v905_v38 = vpop.f32.mrb[3].mxu1  ;;  %v1055_v29 = vld [vmem:[%s1790_s3] sm:$0xff] (!%p1323_p11)  ;;  %v1057_v31 = vld [vmem:[%s1790_s3 + $0x10] sm:$0xff] (!%p1323_p11) }
 0x143   : > { %v991_v36 = vadd.f32 %v963_v28, %v409_v26  ;;  %v967_v37 = vadd.f32 %v966_v35, %v903_v33  ;;  %v968_v40 = vpop.f32.mrb[3].mxu0  ;;  %v1040_v35 = vrot.slane (!%p1323_p11), %v1031_v23, %v1039_v27 }
 0x144   : > { %v992_v41 = vadd.f32 %v965_v32, %v410_v30  ;;  %v969_v42 = vadd.f32 %v968_v40, %v905_v38  ;;  %v1056_v30 = vld [vmem:[%s1790_s3 + $0x8] sm:$0xff] (!%p1323_p11)  ;;  %v1059_v40 = vld [vmem:[%s1790_s3 + $0x20] sm:$0xff] (!%p1323_p11) }
 0x145   : > { %1003 = vst [vmem:[#allocation2] sm:$0xff] %v991_v36  ;;  %v993_v43 = vadd.f32 %v967_v37, %v411_v34  ;;  %v1036_v34 = vrot.slane (!%p1323_p11), %v1031_v23, %v1035_v25 }
 0x146   : > { %1004 = vst [vmem:[#allocation2 + $0x8] sm:$0xff] %v992_v41  ;;  %v994_v44 = vadd.f32 %v969_v42, %v412_v39  ;;  %v1058_v39 = vld [vmem:[%s1790_s3 + $0x18] sm:$0xff] (!%p1323_p11)  ;;  %v1060_v41 = vld [vmem:[%s1790_s3 + $0x28] sm:$0xff] (!%p1323_p11) }
 0x147   : > { %1005 = vst [vmem:[#allocation2 + $0x10] sm:$0xff] %v993_v43  ;;  %v909_v45 = vpop.f32.mrb[4].mxu1 }
 0x148   : > { %1006 = vst [vmem:[#allocation2 + $0x18] sm:$0xff] %v994_v44  ;;  %v972_v47 = vpop.f32.mrb[4].mxu0  ;;  %v911_v49 = vpop.f32.mrb[5].mxu1 }
 0x149   : > { %v973_v48 = vadd.f32 %v972_v47, %v909_v45  ;;  %v974_v51 = vpop.f32.mrb[5].mxu0  ;;  %v913_v53 = vpop.f32.mrb[6].mxu1  ;;  %v1062_v47 = vld [vmem:[%s1790_s3 + $0x38] sm:$0xff] (!%p1323_p11) }
 0x14a   : > { %v975_v52 = vadd.f32 %v974_v51, %v911_v49  ;;  %v976_v55 = vpop.f32.mrb[6].mxu0  ;;  %v915_v58 = vpop.f32.mrb[7].mxu1 }
 0x14b   : > { %v995_v56 = vadd.f32 %v973_v48, %v413_v46  ;;  %v977_v57 = vadd.f32 %v976_v55, %v913_v53  ;;  %v978_v60 = vpop.f32.mrb[7].mxu0  ;;  %v1061_v46 = vld [vmem:[%s1790_s3 + $0x30] sm:$0xff] (!%p1323_p11) }
 0x14c   : > { %v996_v61 = vadd.f32 %v975_v52, %v414_v50  ;;  %v979_v62 = vadd.f32 %v978_v60, %v915_v58  ;;  %v1019_v24 = vld [vmem:[#allocation2] sm:$0xff] (!%p1323_p11) }
 0x14d   : > { %1007 = vst [vmem:[#allocation2 + $0x20] sm:$0xff] %v995_v56  ;;  %v997_v63 = vadd.f32 %v977_v57, %v415_v54  ;;  %v1020_v26 = vld [vmem:[#allocation2 + $0x8] sm:$0xff] (!%p1323_p11)  ;;  %v1043_v42 = vadd.f32 (!%p1323_p11), %v1036_v34, %v1019_v24  ;;  %v1063_v60 = vld [vmem:[%s1790_s3 + $0x40] sm:$0xff] (!%p1323_p11) }
 0x14e   : > { %1008 = vst [vmem:[#allocation2 + $0x28] sm:$0xff] %v996_v61  ;;  %v998_v0 = vadd.f32 %v979_v62, %v416_v59  ;;  %v1021_v28 = vld [vmem:[#allocation2 + $0x10] sm:$0xff] (!%p1323_p11)  ;;  %v1044_v43 = vadd.f32 (!%p1323_p11), %v1040_v35, %v1020_v26 }
 0x14f   : > { %1009 = vst [vmem:[#allocation2 + $0x30] sm:$0xff] %v997_v63  ;;  %v919_v1 = vpop.f32.mrb[8].mxu1  ;;  %v1022_v32 = vld [vmem:[#allocation2 + $0x18] sm:$0xff] (!%p1323_p11)  ;;  %v1045_v44 = vadd.f32 (!%p1323_p11), %v1036_v34, %v1021_v28  ;;  %v1067_v56 = vadd.f32 (!%p1323_p11), %v1055_v29, %v1043_v42 }
 0x150   : > { %1010 = vst [vmem:[#allocation2 + $0x38] sm:$0xff] %v998_v0  ;;  %v982_v3 = vpop.f32.mrb[8].mxu0  ;;  %v921_v5 = vpop.f32.mrb[9].mxu1  ;;  %v1046_v45 = vadd.f32 (!%p1323_p11), %v1040_v35, %v1022_v32  ;;  %v1068_v57 = vadd.f32 (!%p1323_p11), %v1056_v30, %v1044_v43 }
 0x151   : > { %v983_v4 = vadd.f32 %v982_v3, %v919_v1  ;;  %v984_v7 = vpop.f32.mrb[9].mxu0  ;;  %v923_v9 = vpop.f32.mrb[10].mxu1  ;;  %v1069_v58 = vadd.f32 (!%p1323_p11), %v1057_v31, %v1045_v44  ;;  %v1064_v1 = vld [vmem:[%s1790_s3 + $0x48] sm:$0xff] (!%p1323_p11)  ;;  %v1066_v3 = vld [vmem:[%s1790_s3 + $0x58] sm:$0xff] (!%p1323_p11)  ;;  %1079 = vst [vmem:[%s1791_s4] sm:$0xff] (!%p1323_p11), %v1067_v56 }
 0x152   : > { %v985_v8 = vadd.f32 %v984_v7, %v921_v5  ;;  %v986_v11 = vpop.f32.mrb[10].mxu0  ;;  %v925_v14 = vpop.f32.mrb[11].mxu1  ;;  %1018 = sbr.rel (%p1323_p11) target bundleno = 357 (0x165), region = 67  ;;  %v1070_v59 = vadd.f32 (!%p1323_p11), %v1058_v39, %v1046_v45  ;;  %1080 = vst [vmem:[%s1791_s4 + $0x8] sm:$0xff] (!%p1323_p11), %v1068_v57 }
 0x153   : > { %v999_v12 = vadd.f32 %v983_v4, %v417_v2  ;;  %v987_v13 = vadd.f32 %v986_v11, %v923_v9  ;;  %v988_v16 = vpop.f32.mrb[11].mxu0  ;;  %v1065_v2 = vld [vmem:[%s1790_s3 + $0x50] sm:$0xff] (!%p1323_p11)  ;;  %1081 = vst [vmem:[%s1791_s4 + $0x10] sm:$0xff] (!%p1323_p11), %v1069_v58 }
 0x154   : > { %v1000_v17 = vadd.f32 %v985_v8, %v418_v6  ;;  %v989_v18 = vadd.f32 %v988_v16, %v925_v14  ;;  %v1023_v33 = vld [vmem:[#allocation2 + $0x20] sm:$0xff] (!%p1323_p11)  ;;  %1082 = vst [vmem:[%s1791_s4 + $0x18] sm:$0xff] (!%p1323_p11), %v1070_v59 }
 0x155   : > { %1011 = vst [vmem:[#allocation2 + $0x40] sm:$0xff] %v999_v12  ;;  %v1001_v19 = vadd.f32 %v987_v13, %v419_v10  ;;  %v1024_v36 = vld [vmem:[#allocation2 + $0x28] sm:$0xff] (!%p1323_p11)  ;;  %v1047_v49 = vadd.f32 (!%p1323_p11), %v1036_v34, %v1023_v33 }
 0x156   : > { %1012 = vst [vmem:[#allocation2 + $0x48] sm:$0xff] %v1000_v17  ;;  %v1002_v20 = vadd.f32 %v989_v18, %v420_v15  ;;  %v1025_v37 = vld [vmem:[#allocation2 + $0x30] sm:$0xff] (!%p1323_p11)  ;;  %v1048_v50 = vadd.f32 (!%p1323_p11), %v1040_v35, %v1024_v36 }
 0x157   : > { %1013 = vst [vmem:[#allocation2 + $0x50] sm:$0xff] %v1001_v19  ;;  %v1026_v38 = vld [vmem:[#allocation2 + $0x38] sm:$0xff] (!%p1323_p11)  ;;  %v1049_v51 = vadd.f32 (!%p1323_p11), %v1036_v34, %v1025_v37  ;;  %v1071_v61 = vadd.f32 (!%p1323_p11), %v1059_v40, %v1047_v49 }
 0x158   : > { %1014 = vst [vmem:[#allocation2 + $0x58] sm:$0xff] %v1002_v20  ;;  %v1050_v52 = vadd.f32 (!%p1323_p11), %v1040_v35, %v1026_v38  ;;  %v1072_v62 = vadd.f32 (!%p1323_p11), %v1060_v41, %v1048_v50 }
 0x159   : > { %v1073_v63 = vadd.f32 %v1061_v46, %v1049_v51  ;;  %1083 = vst [vmem:[%s1791_s4 + $0x20] sm:$0xff] %v1071_v61 }
 0x15a   : > { %v1074_v0 = vadd.f32 %v1062_v47, %v1050_v52  ;;  %1084 = vst [vmem:[%s1791_s4 + $0x28] sm:$0xff] %v1072_v62 }
 0x15b   : > { %1085 = vst [vmem:[%s1791_s4 + $0x30] sm:$0xff] %v1073_v63 }
 0x15c   : > { %v1027_v48 = vld [vmem:[#allocation2 + $0x40] sm:$0xff]  ;;  %1086 = vst [vmem:[%s1791_s4 + $0x38] sm:$0xff] %v1074_v0 }
 0x15d   : > { %v1028_v53 = vld [vmem:[#allocation2 + $0x48] sm:$0xff]  ;;  %v1051_v4 = vadd.f32 %v1036_v34, %v1027_v48 }
 0x15e   : > { %v1029_v54 = vld [vmem:[#allocation2 + $0x50] sm:$0xff]  ;;  %v1052_v5 = vadd.f32 %v1040_v35, %v1028_v53 }
 0x15f   : > { %v1030_v55 = vld [vmem:[#allocation2 + $0x58] sm:$0xff]  ;;  %v1053_v6 = vadd.f32 %v1036_v34, %v1029_v54  ;;  %v1075_v8 = vadd.f32 %v1063_v60, %v1051_v4 }
 0x160   : > { %v1054_v7 = vadd.f32 %v1040_v35, %v1030_v55  ;;  %v1076_v9 = vadd.f32 %v1064_v1, %v1052_v5 }
 0x161   : > { %v1077_v10 = vadd.f32 %v1065_v2, %v1053_v6  ;;  %1087 = vst [vmem:[%s1791_s4 + $0x40] sm:$0xff] %v1075_v8 }
 0x162   : > { %v1078_v11 = vadd.f32 %v1066_v3, %v1054_v7  ;;  %1088 = vst [vmem:[%s1791_s4 + $0x48] sm:$0xff] %v1076_v9 }
 0x163   : > { %1089 = vst [vmem:[%s1791_s4 + $0x50] sm:$0xff] %v1077_v10 }
 0x164   : > { %1090 = vst [vmem:[%s1791_s4 + $0x58] sm:$0xff] %v1078_v11 }
 0x165 PF: > { %s14_s19 = sadd.s32 1, %s1537_s19   ;;  %s1792_s15 = smov %s1525_s16 }
 0x166   : > { %p11_p12 = scmp.ge.s32.totalorder %s14_s19, 4   ;;  %s1793_s16 = smov %s1600_s23 }
 0x167   : > { %s1794_s17 = smov %s1533_s18  ;;  %s1795_s18 = smov %s1797_s20 }
 0x168   :  { %13 = sbr.rel (!%p11_p12) target bundleno = 3 (0x3), region = 111 }

// kernel: _lambda_.23
= control target key start
LH: loop header
LB: loop body
LE: loop exit
PB: predicated region body
PF: predicated region fallthrough
CT: control target
= control target key end

     0   :  { %v125_v62 = vlaneseq  ;;  %s357_s0 = inlined_call_operand.vmem [shape: f32[48,256], index: 0, kind: input, shape index: {}]   ;;  %s358_s1 = inlined_call_operand.vmem [shape: f32[1,256], index: 1, kind: input, shape index: {}]   ;;  %s359_s2 = inlined_call_operand.vmem [shape: f32[1,256], index: 2, kind: input, shape index: {}]   ;;  %s360_s3 = inlined_call_operand.vmem [shape: f32[48,256], index: 3, kind: output, shape index: {}]  }
   0x1   :  { %v14_v0 = vld [vmem:[%s357_s0] sm:$0xff]  ;;  %v15_v1 = vld [vmem:[%s357_s0 + $0x8] sm:$0xff]  ;;  %v16_v5 = vld [vmem:[%s357_s0 + $0x10] sm:$0xff] }
   0x2   :  { %v18_v2 = vld [vmem:[%s357_s0 + $0x20] sm:$0xff]  ;;  %v26_v3 = vadd.f32 %v15_v1, %v14_v0  ;;  %v19_v4 = vld [vmem:[%s357_s0 + $0x28] sm:$0xff]  ;;  %v17_v6 = vld [vmem:[%s357_s0 + $0x18] sm:$0xff] }
   0x3   :  { %v32_v7 = vadd.f32 %v19_v4, %v18_v2  ;;  %v20_v8 = vld [vmem:[%s357_s0 + $0x30] sm:$0xff]  ;;  %v21_v9 = vld [vmem:[%s357_s0 + $0x38] sm:$0xff]  ;;  %v29_v10 = vadd.f32 %v17_v6, %v16_v5  ;;  %v22_v12 = vld [vmem:[%s357_s0 + $0x40] sm:$0xff] }
   0x4   :  { %27 = vadd.xlane.f32.xlu0 %v26_v3  ;;  %v35_v11 = vadd.f32 %v21_v9, %v20_v8  ;;  %v23_v13 = vld [vmem:[%s357_s0 + $0x48] sm:$0xff]  ;;  %v24_v14 = vld [vmem:[%s357_s0 + $0x50] sm:$0xff]  ;;  %v25_v15 = vld [vmem:[%s357_s0 + $0x58] sm:$0xff] }
   0x5   :  { %33 = vadd.xlane.f32.xlu1 %v32_v7  ;;  %v38_v16 = vadd.f32 %v23_v13, %v22_v12  ;;  %v41_v17 = vadd.f32 %v25_v15, %v24_v14 }
   0x8   :  { %30 = vadd.xlane.f32.xlu0 %v29_v10 }
   0x9   :  { %36 = vadd.xlane.f32.xlu1 %v35_v11 }
   0xc   :  { %39 = vadd.xlane.f32.xlu0 %v38_v16 }
   0xd   :  { %42 = vadd.xlane.f32.xlu1 %v41_v17  ;;  %v147_v17 = vld [vmem:[%s359_s2] sm:$0x3] }
  0x91   :  { %v28_v18 = vpop.xlane.xlu0 %27 }
  0x92   :  { %v45_v19 = vmul.f32 0.00390625, %v28_v18  ;;  %v34_v20 = vpop.xlane.xlu1 %33 }
  0x93   :  { %v47_v21 = vmul.f32 0.00390625, %v34_v20 }
  0x94   :  { %v255_v22 = vsub.f32 %v14_v0, %v45_v19  ;;  %v257_v23 = vsub.f32 %v15_v1, %v45_v19 }
  0x95   :  { %v259_v24 = vsub.f32 %v18_v2, %v47_v21  ;;  %v261_v25 = vsub.f32 %v19_v4, %v47_v21  ;;  %v31_v26 = vpop.xlane.xlu0 %30  ;;  %v126_v4 = vshrl.u32 %v125_v62, 7 }
  0x96   :  { %v46_v27 = vmul.f32 0.00390625, %v31_v26  ;;  %v37_v28 = vpop.xlane.xlu1 %36  ;;  %v63_v29 = vmul.f32 %v255_v22, %v255_v22  ;;  %v64_v30 = vmul.f32 %v257_v23, %v257_v23 }
  0x97   :  { %v48_v31 = vmul.f32 0.00390625, %v37_v28  ;;  %v67_v32 = vmul.f32 %v259_v24, %v259_v24  ;;  %v68_v33 = vmul.f32 %v261_v25, %v261_v25  ;;  %v127_v11 = vsub.s32 0, %v126_v4 }
  0x98   :  { %v271_v34 = vsub.f32 %v16_v5, %v46_v27  ;;  %v273_v35 = vsub.f32 %v17_v6, %v46_v27  ;;  %v75_v36 = vadd.f32 %v64_v30, %v63_v29 }
  0x99   :  { %v275_v37 = vsub.f32 %v20_v8, %v48_v31  ;;  %v277_v38 = vsub.f32 %v21_v9, %v48_v31  ;;  %v40_v39 = vpop.xlane.xlu0 %39  ;;  %v81_v42 = vadd.f32 %v68_v33, %v67_v32  ;;  %v152_v27 = vrot.slane %v147_v17, %v127_v11 }
  0x9a   :  { %v49_v40 = vmul.f32 0.00390625, %v40_v39  ;;  %76 = vadd.xlane.f32.xlu0 %v75_v36  ;;  %v43_v41 = vpop.xlane.xlu1 %42  ;;  %v65_v43 = vmul.f32 %v271_v34, %v271_v34  ;;  %v66_v44 = vmul.f32 %v273_v35, %v273_v35 }
  0x9b   :  { %v50_v45 = vmul.f32 0.00390625, %v43_v41  ;;  %v69_v46 = vmul.f32 %v275_v37, %v275_v37  ;;  %v70_v47 = vmul.f32 %v277_v38, %v277_v38 }
  0x9c   :  { %v287_v48 = vsub.f32 %v22_v12, %v49_v40  ;;  %v289_v49 = vsub.f32 %v23_v13, %v49_v40  ;;  %v78_v50 = vadd.f32 %v66_v44, %v65_v43  ;;  %v131_v12 = vsub.s32 1, %v126_v4  ;;  %v123_v13 = vld [vmem:[%s358_s1] sm:$0x3] }
  0x9d   :  { %v291_v51 = vsub.f32 %v24_v14, %v50_v45  ;;  %v293_v52 = vsub.f32 %v25_v15, %v50_v45  ;;  %v84_v53 = vadd.f32 %v70_v47, %v69_v46  ;;  %v128_v19 = vrot.slane %v123_v13, %v127_v11 }
  0x9e   :  { %82 = vadd.xlane.f32.xlu0 %v81_v42  ;;  %79 = vadd.xlane.f32.xlu1 %v78_v50  ;;  %v71_v54 = vmul.f32 %v287_v48, %v287_v48  ;;  %v72_v55 = vmul.f32 %v289_v49, %v289_v49  ;;  %v132_v20 = vrot.slane %v123_v13, %v131_v12 }
  0x9f   :  { %v73_v56 = vmul.f32 %v291_v51, %v291_v51  ;;  %v74_v57 = vmul.f32 %v293_v52, %v293_v52  ;;  %v156_v28 = vrot.slane %v147_v17, %v131_v12 }
  0xa0   :  { %v87_v58 = vadd.f32 %v72_v55, %v71_v54 }
  0xa1   :  { %v90_v59 = vadd.f32 %v74_v57, %v73_v56 }
  0xa2   :  { %85 = vadd.xlane.f32.xlu1 %v84_v53  ;;  %88 = vadd.xlane.f32.xlu0 %v87_v58 }
  0xa6   :  { %91 = vadd.xlane.f32.xlu1 %v90_v59 }
 0x127   :  { %v77_v60 = vpop.xlane.xlu0 %76 }
 0x128   :  { %v93_v61 = vmul.f32 0.00390625, %v77_v60 }
 0x12a   :  { %v99_v63 = vadd.f32 1e-06, %v93_v61 }
 0x12b   :  { %v80_v0 = vpop.xlane.xlu1 %79  ;;  %v83_v1 = vpop.xlane.xlu0 %82 }
 0x12c   :  { %187 = vrsqrt.f32 %v99_v63  ;;  %v94_v2 = vmul.f32 0.00390625, %v80_v0  ;;  %v95_v3 = vmul.f32 0.00390625, %v83_v1 }
 0x12e   :  { %v100_v5 = vadd.f32 1e-06, %v94_v2  ;;  %v101_v6 = vadd.f32 1e-06, %v95_v3 }
 0x12f   :  { %v86_v7 = vpop.xlane.xlu1 %85  ;;  %v89_v8 = vpop.xlane.xlu0 %88 }
 0x130   :  { %189 = vrsqrt.f32 %v100_v5  ;;  %v96_v9 = vmul.f32 0.00390625, %v86_v7  ;;  %v97_v10 = vmul.f32 0.00390625, %v89_v8 }
 0x131   :  { %191 = vrsqrt.f32 %v101_v6 }
 0x132   :  { %v102_v14 = vadd.f32 1e-06, %v96_v9  ;;  %v103_v15 = vadd.f32 1e-06, %v97_v10 }
 0x133   :  { %v92_v16 = vpop.xlane.xlu1 %91 }
 0x134   :  { %193 = vrsqrt.f32 %v102_v14  ;;  %v98_v18 = vmul.f32 0.00390625, %v92_v16 }
 0x135   :  { %195 = vrsqrt.f32 %v103_v15 }
 0x136   :  { %v188_v21 = vpop.eup %187  ;;  %v104_v26 = vadd.f32 1e-06, %v98_v18 }
 0x137   :  { %v111_v29 = vmul.f32 %v188_v21, %v255_v22  ;;  %v112_v30 = vmul.f32 %v188_v21, %v257_v23 }
 0x138   :  { %197 = vrsqrt.f32 %v104_v26 }
 0x139   :  { %v135_v31 = vmul.f32 %v128_v19, %v111_v29  ;;  %v136_v32 = vmul.f32 %v132_v20, %v112_v30 }
 0x13a   :  { %v190_v33 = vpop.eup %189 }
 0x13b   :  { %v192_v36 = vpop.eup %191  ;;  %v159_v39 = vadd.f32 %v152_v27, %v135_v31  ;;  %v160_v40 = vadd.f32 %v156_v28, %v136_v32  ;;  %v113_v41 = vmul.f32 %v190_v33, %v271_v34  ;;  %v114_v42 = vmul.f32 %v190_v33, %v273_v35 }
 0x13c   :  { %v115_v43 = vmul.f32 %v192_v36, %v259_v24  ;;  %v116_v44 = vmul.f32 %v192_v36, %v261_v25 }
 0x13d   :  { %171 = vst [vmem:[%s360_s3] sm:$0xff] %v159_v39  ;;  %172 = vst [vmem:[%s360_s3 + $0x8] sm:$0xff] %v160_v40  ;;  %v137_v22 = vmul.f32 %v128_v19, %v113_v41  ;;  %v138_v23 = vmul.f32 %v132_v20, %v114_v42 }
 0x13e   :  { %v194_v45 = vpop.eup %193  ;;  %v139_v46 = vmul.f32 %v128_v19, %v115_v43  ;;  %v140_v47 = vmul.f32 %v132_v20, %v116_v44 }
 0x13f   :  { %v196_v34 = vpop.eup %195  ;;  %v161_v50 = vadd.f32 %v152_v27, %v137_v22  ;;  %v162_v35 = vadd.f32 %v156_v28, %v138_v23  ;;  %v117_v24 = vmul.f32 %v194_v45, %v275_v37  ;;  %v118_v25 = vmul.f32 %v194_v45, %v277_v38 }
 0x140   :  { %v163_v53 = vadd.f32 %v152_v27, %v139_v46  ;;  %v164_v54 = vadd.f32 %v156_v28, %v140_v47  ;;  %v119_v55 = vmul.f32 %v196_v34, %v287_v48  ;;  %v120_v56 = vmul.f32 %v196_v34, %v289_v49 }
 0x141   :  { %173 = vst [vmem:[%s360_s3 + $0x10] sm:$0xff] %v161_v50  ;;  %174 = vst [vmem:[%s360_s3 + $0x18] sm:$0xff] %v162_v35  ;;  %v141_v57 = vmul.f32 %v128_v19, %v117_v24  ;;  %v142_v58 = vmul.f32 %v132_v20, %v118_v25 }
 0x142   :  { %v198_v59 = vpop.eup %197  ;;  %175 = vst [vmem:[%s360_s3 + $0x20] sm:$0xff] %v163_v53  ;;  %176 = vst [vmem:[%s360_s3 + $0x28] sm:$0xff] %v164_v54  ;;  %v143_v37 = vmul.f32 %v128_v19, %v119_v55  ;;  %v144_v38 = vmul.f32 %v132_v20, %v120_v56 }
 0x143   :  { %v165_v48 = vadd.f32 %v152_v27, %v141_v57  ;;  %v166_v49 = vadd.f32 %v156_v28, %v142_v58  ;;  %v121_v60 = vmul.f32 %v198_v59, %v291_v51  ;;  %v122_v61 = vmul.f32 %v198_v59, %v293_v52 }
 0x144   :  { %v167_v62 = vadd.f32 %v152_v27, %v143_v37  ;;  %v168_v63 = vadd.f32 %v156_v28, %v144_v38 }
 0x145   :  { %177 = vst [vmem:[%s360_s3 + $0x30] sm:$0xff] %v165_v48  ;;  %178 = vst [vmem:[%s360_s3 + $0x38] sm:$0xff] %v166_v49  ;;  %v145_v0 = vmul.f32 %v128_v19, %v121_v60  ;;  %v146_v1 = vmul.f32 %v132_v20, %v122_v61 }
 0x146   :  { %179 = vst [vmem:[%s360_s3 + $0x40] sm:$0xff] %v167_v62  ;;  %180 = vst [vmem:[%s360_s3 + $0x48] sm:$0xff] %v168_v63 }
 0x147   :  { %v169_v51 = vadd.f32 %v152_v27, %v145_v0  ;;  %v170_v52 = vadd.f32 %v156_v28, %v146_v1 }
 0x149   :  { %181 = vst [vmem:[%s360_s3 + $0x50] sm:$0xff] %v169_v51  ;;  %182 = vst [vmem:[%s360_s3 + $0x58] sm:$0xff] %v170_v52 }

</bundles_post_ra>
